<compile_context>
chip_gen: v5e
topology: v5e:2x2
jax: 0.10.0
libtpu: 0.0.40
codegen_flags: <defaults>
</compile_context>

<pallas_src>
import jax
import jax.numpy as jnp
from jax import lax
from jax.experimental import pallas as pl
from jax.experimental.pallas import tpu as pltpu

# ----------------------------- small ViT config -----------------------------
B = 2                         # batch
C = 3                         # image channels
IMG = 16                      # image spatial size
PATCH = 4                     # patch size (conv kernel == stride)
P = (IMG // PATCH) ** 2       # 16 patches
T = P + 1                     # +1 cls token -> 17 tokens
T_PAD = 24                    # tokens padded up to a sublane multiple (8)
BT = B * T_PAD                # 48-row activation slab
KP = C * PATCH * PATCH        # 48 flattened patch length
D = 64                        # transformer width
HEADS = 4
DH = D // HEADS               # 16
MLP = 4 * D                   # 256
E = 32                        # output embedding dim (proj)
LAYERS = 2
EPS = 1e-5                    # nn.LayerNorm default
NEG = -1e30                   # additive mask for padded key columns


# ------------------------------ kernel helpers -------------------------------
def _ln(x, g, b):
    """LayerNorm over the last axis (torch.nn.LayerNorm, eps=1e-5).

    Uses sum(x) / sum(x*x) so the two XLU reductions can issue back-to-back
    instead of the serial mean -> subtract -> square -> reduce chain.
    """
    n_inv = 1.0 / x.shape[-1]
    s1 = jnp.sum(x, axis=-1, keepdims=True)
    s2 = jnp.sum(x * x, axis=-1, keepdims=True)
    m = s1 * n_inv
    v = s2 * n_inv - m * m
    return (x - m) * lax.rsqrt(v + EPS) * g + b


# ------------------------------- fused kernel --------------------------------
def fused_vit_kernel(patches_ref, w_patch_ref, pos_cls_ref, gpre_ref, bpre_ref,
                     g1_ref, b1_ref, wqkv_ref, bqkv_ref, wo_ref, bo_ref,
                     g2_ref, b2_ref, w1_ref, bm1_ref, w2_ref, bm2_ref,
                     gpost_ref, bpost_ref, proj_ref, out_ref):
    """Entire ViT forward in one kernel on a (BT, D) activation slab.

    patches_ref: (BT, KP)   rows b*T_PAD are zeros (cls slots), rows beyond the
                            real 17 tokens of each batch block are zero padding
    pos_cls_ref: (BT, D)    positional embedding (cls folded into row 0 of each
                            batch block, padded rows zero), pre-tiled over batch
    layer refs:  leading LAYERS axis, indexed with static Python ints
    """
    # ---- patch embed (ONE slab matmul) + (pos + cls) + ln_pre ----
    emb = jnp.dot(patches_ref[...].astype(jnp.bfloat16), w_patch_ref[...],
                  preferred_element_type=jnp.float32)               # (BT, D)
    x = _ln(emb + pos_cls_ref[...], gpre_ref[...], bpre_ref[...])

    # additive key-padding mask, built once (columns >= T are padded tokens)
    col = lax.broadcasted_iota(jnp.int32, (T_PAD, T_PAD), 1)
    neg_mask = jnp.where(col < T, 0.0, NEG).astype(jnp.float32)     # (T_PAD, T_PAD)

    # ---- transformer layers (statically unrolled) ----
    for l in range(LAYERS):
        # --- pre-LN multi-head self-attention ---
        h = _ln(x, g1_ref[l], b1_ref[l])
        # QKV projection once over the whole slab (softmax scale pre-folded
        # into the Q columns of wqkv / bqkv)
        qkv = jnp.dot(h.astype(jnp.bfloat16), wqkv_ref[l],
                      preferred_element_type=jnp.float32) + bqkv_ref[l]  # (BT, 3D)

        ao_parts = []
        for b in range(B):                        # static loop, B=2
            r0 = b * T_PAD
            head_outs = []
            for hd in range(HEADS):               # static loop, 4 heads
                c0 = hd * DH
                q = qkv[r0:r0 + T_PAD, c0:c0 + DH]
                k = qkv[r0:r0 + T_PAD, D + c0:D + c0 + DH]
                v = qkv[r0:r0 + T_PAD, 2 * D + c0:2 * D + c0 + DH]
                # trans_b matmul: contract last dims, no explicit K transpose
                s = lax.dot_general(q.astype(jnp.bfloat16),
                                    k.astype(jnp.bfloat16),
                                    (((1,), (1,)), ((), ())),
                                    preferred_element_type=jnp.float32)
                s = s + neg_mask
                s = s - jnp.max(s, axis=-1, keepdims=True)
                p = jnp.exp(s)
                p = p * pl.reciprocal(jnp.sum(p, axis=-1, keepdims=True),
                                      approx=True)
                head_outs.append(
                    jnp.dot(p.astype(jnp.bfloat16), v.astype(jnp.bfloat16),
                            preferred_element_type=jnp.float32))    # (T_PAD, DH)
            ao_parts.append(jnp.concatenate(head_outs, axis=-1))    # (T_PAD, D)
        ao = jnp.concatenate(ao_parts, axis=0)                      # (BT, D)
        # single out-projection over the whole slab
        x = x + jnp.dot(ao.astype(jnp.bfloat16), wo_ref[l],
                        preferred_element_type=jnp.float32) + bo_ref[l]

        # --- pre-LN MLP, once over the whole slab ---
        h2 = _ln(x, g2_ref[l], b2_ref[l])
        h2 = jnp.dot(h2.astype(jnp.bfloat16), w1_ref[l],
                     preferred_element_type=jnp.float32) + bm1_ref[l]
        # TODO(synk): open_clip nn.GELU is exact erf; tanh approximation used here.
        h2 = jax.nn.gelu(h2, approximate=True)
        h2 = jnp.dot(h2.astype(jnp.bfloat16), w2_ref[l],
                     preferred_element_type=jnp.float32) + bm2_ref[l]
        x = x + h2

    # ---- ln_post on the cls tokens (row b*T_PAD of each batch block) + proj ----
    cls = jnp.concatenate([x[b * T_PAD:b * T_PAD + 1, :] for b in range(B)],
                          axis=0)                                   # (B, D)
    h = _ln(cls, gpost_ref[...], bpost_ref[...])
    out_ref[...] = jnp.dot(h.astype(jnp.bfloat16), proj_ref[...],
                           preferred_element_type=jnp.float32)      # (B, E)


# ------------------------------ pallas wrapper --------------------------------
def _full_spec(shape):
    # whole-array block (block shape == full array dims)
    return pl.BlockSpec(shape, lambda i: (0,) * len(shape))


def vit_forward(patches, pos_cls, params):
    operands = (
        patches, params["w_patch"], pos_cls,
        params["ln_pre_g"], params["ln_pre_b"],
        params["ln1_g"], params["ln1_b"],
        params["w_qkv"], params["b_qkv"],
        params["w_o"], params["b_o"],
        params["ln2_g"], params["ln2_b"],
        params["w_1"], params["b_1"],
        params["w_2"], params["b_2"],
        params["ln_post_g"], params["ln_post_b"], params["proj"],
    )
    return pl.pallas_call(
        fused_vit_kernel,
        out_shape=jax.ShapeDtypeStruct((B, E), jnp.float32),
        grid=(1,),
        in_specs=[_full_spec(op.shape) for op in operands],
        out_specs=_full_spec((B, E)),
        compiler_params=pltpu.CompilerParams(dimension_semantics=("arbitrary",)),
    )(*operands)


# --------------------------- parameter construction ---------------------------
def init_params(key):
    def nrm(k, shape, scale=0.02):
        return (scale * jax.random.normal(k, shape)).astype(jnp.float32)

    keys = jax.random.split(key, 8)
    scale = 1.0 / (DH ** 0.5)

    # fold the softmax 1/sqrt(DH) scale into the Q columns of w_qkv / b_qkv
    w_qkv = nrm(keys[4], (LAYERS, D, 3 * D))
    w_qkv = w_qkv.at[:, :, 0:D].multiply(scale)
    b_qkv = jnp.zeros((LAYERS, 1, 3 * D), jnp.float32)
    b_qkv = b_qkv.at[:, :, 0:D].multiply(scale)

    return {
        # conv1 (patch embed) flattened: (KP, D); open_clip conv1 has bias=False.
        # matmul weights are stored bf16 (MXU inputs); biases / LN params f32.
        "w_patch": nrm(keys[0], (KP, D)).astype(jnp.bfloat16),
        "cls": nrm(keys[1], (1, D)),
        "pos": nrm(keys[2], (T, D)),
        "ln_pre_g": jnp.ones((1, D), jnp.float32),
        "ln_pre_b": jnp.zeros((1, D), jnp.float32),
        "ln_post_g": jnp.ones((1, D), jnp.float32),
        "ln_post_b": jnp.zeros((1, D), jnp.float32),
        "proj": nrm(keys[3], (D, E)).astype(jnp.bfloat16),
        # per-layer weights stacked along a leading LAYERS axis
        "ln1_g": jnp.ones((LAYERS, 1, D), jnp.float32),
        "ln1_b": jnp.zeros((LAYERS, 1, D), jnp.float32),
        "w_qkv": w_qkv.astype(jnp.bfloat16),
        "b_qkv": b_qkv,
        "w_o": nrm(keys[5], (LAYERS, D, D)).astype(jnp.bfloat16),
        "b_o": jnp.zeros((LAYERS, 1, D), jnp.float32),
        "ln2_g": jnp.ones((LAYERS, 1, D), jnp.float32),
        "ln2_b": jnp.zeros((LAYERS, 1, D), jnp.float32),
        "w_1": nrm(keys[6], (LAYERS, D, MLP)).astype(jnp.bfloat16),
        "b_1": jnp.zeros((LAYERS, 1, MLP), jnp.float32),
        "w_2": nrm(keys[7], (LAYERS, MLP, D)).astype(jnp.bfloat16),
        "b_2": jnp.zeros((LAYERS, 1, D), jnp.float32),
    }


# -------------------------------- forward pass --------------------------------
@jax.jit
def encode_image(x, params):
    """x: (B, C, IMG, IMG) float32, NCHW like the PyTorch module."""
    if x.ndim == 3:                      # mirrors `if x.dim() == 3: x = x.unsqueeze(0)`
        x = x[None]
    # patchify (equivalent to Conv2d(kernel=stride=PATCH) then flatten) -- glue only
    g = IMG // PATCH
    patches = x.reshape(B, C, g, PATCH, g, PATCH)
    patches = patches.transpose(0, 2, 4, 1, 3, 5).reshape(B, P, KP)
    # prepend one zero row per batch (cls slot) and pad tokens up to T_PAD
    patches = jnp.pad(patches, ((0, 0), (1, T_PAD - T), (0, 0)))     # (B, T_PAD, KP)
    patches = patches.reshape(BT, KP)                                # (BT, KP) slab
    # fold the cls embedding into row 0 of the positional table; pad + tile over batch
    pos_cls = params["pos"].at[0:1, :].add(params["cls"])            # (T, D)
    pos_cls = jnp.pad(pos_cls, ((0, T_PAD - T), (0, 0)))             # (T_PAD, D)
    pos_cls = jnp.tile(pos_cls, (B, 1))                              # (BT, D)
    return vit_forward(patches, pos_cls, params)


# ------------------------------------ main ------------------------------------
if __name__ == "__main__":
    key = jax.random.PRNGKey(0)
    k_img, k_par = jax.random.split(key)
    x = jax.random.normal(k_img, (B, C, IMG, IMG), dtype=jnp.float32)
    params = init_params(k_par)

    out = jax.block_until_ready(encode_image(x, params))
    assert out.shape == (B, E) and out.dtype == jnp.float32
    assert bool(jnp.all(jnp.isfinite(out)))
    print("KERNEL_OK")
</pallas_src>

<mosaic_0001>
module attributes {stable_mosaic.version = 11 : i64} {
  func.func @fused_vit_kernel(%arg0: i32, %arg1: memref<48x48xf32, #tpu.memory_space<vmem>>, %arg2: memref<48x64xbf16, #tpu.memory_space<vmem>>, %arg3: memref<48x64xf32, #tpu.memory_space<vmem>>, %arg4: memref<1x64xf32, #tpu.memory_space<vmem>>, %arg5: memref<1x64xf32, #tpu.memory_space<vmem>>, %arg6: memref<2x1x64xf32, #tpu.memory_space<vmem>>, %arg7: memref<2x1x64xf32, #tpu.memory_space<vmem>>, %arg8: memref<2x64x192xbf16, #tpu.memory_space<vmem>>, %arg9: memref<2x1x192xf32, #tpu.memory_space<vmem>>, %arg10: memref<2x64x64xbf16, #tpu.memory_space<vmem>>, %arg11: memref<2x1x64xf32, #tpu.memory_space<vmem>>, %arg12: memref<2x1x64xf32, #tpu.memory_space<vmem>>, %arg13: memref<2x1x64xf32, #tpu.memory_space<vmem>>, %arg14: memref<2x64x256xbf16, #tpu.memory_space<vmem>>, %arg15: memref<2x1x256xf32, #tpu.memory_space<vmem>>, %arg16: memref<2x256x64xbf16, #tpu.memory_space<vmem>>, %arg17: memref<2x1x64xf32, #tpu.memory_space<vmem>>, %arg18: memref<1x64xf32, #tpu.memory_space<vmem>>, %arg19: memref<1x64xf32, #tpu.memory_space<vmem>>, %arg20: memref<64x32xbf16, #tpu.memory_space<vmem>>, %arg21: memref<2x32xf32, #tpu.memory_space<vmem>>) attributes {dimension_semantics = [#tpu.dimension_semantics<arbitrary>], iteration_bounds = array<i64: 1>, scalar_prefetch = 0 : i64, scratch_operands = 0 : i64, tpu.core_type = #tpu.core_type<tc>, window_params = [{pipeline_mode = #tpu.pipeline_mode<synchronous>, transform_indices = @transform_0, window_bounds = array<i64: 48, 48>}, {pipeline_mode = #tpu.pipeline_mode<synchronous>, transform_indices = @transform_1, window_bounds = array<i64: 48, 64>}, {pipeline_mode = #tpu.pipeline_mode<synchronous>, transform_indices = @transform_2, window_bounds = array<i64: 48, 64>}, {pipeline_mode = #tpu.pipeline_mode<synchronous>, transform_indices = @transform_3, window_bounds = array<i64: 1, 64>}, {pipeline_mode = #tpu.pipeline_mode<synchronous>, transform_indices = @transform_4, window_bounds = array<i64: 1, 64>}, {pipeline_mode = #tpu.pipeline_mode<synchronous>, transform_indices = @transform_5, window_bounds = array<i64: 2, 1, 64>}, {pipeline_mode = #tpu.pipeline_mode<synchronous>, transform_indices = @transform_6, window_bounds = array<i64: 2, 1, 64>}, {pipeline_mode = #tpu.pipeline_mode<synchronous>, transform_indices = @transform_7, window_bounds = array<i64: 2, 64, 192>}, {pipeline_mode = #tpu.pipeline_mode<synchronous>, transform_indices = @transform_8, window_bounds = array<i64: 2, 1, 192>}, {pipeline_mode = #tpu.pipeline_mode<synchronous>, transform_indices = @transform_9, window_bounds = array<i64: 2, 64, 64>}, {pipeline_mode = #tpu.pipeline_mode<synchronous>, transform_indices = @transform_10, window_bounds = array<i64: 2, 1, 64>}, {pipeline_mode = #tpu.pipeline_mode<synchronous>, transform_indices = @transform_11, window_bounds = array<i64: 2, 1, 64>}, {pipeline_mode = #tpu.pipeline_mode<synchronous>, transform_indices = @transform_12, window_bounds = array<i64: 2, 1, 64>}, {pipeline_mode = #tpu.pipeline_mode<synchronous>, transform_indices = @transform_13, window_bounds = array<i64: 2, 64, 256>}, {pipeline_mode = #tpu.pipeline_mode<synchronous>, transform_indices = @transform_14, window_bounds = array<i64: 2, 1, 256>}, {pipeline_mode = #tpu.pipeline_mode<synchronous>, transform_indices = @transform_15, window_bounds = array<i64: 2, 256, 64>}, {pipeline_mode = #tpu.pipeline_mode<synchronous>, transform_indices = @transform_16, window_bounds = array<i64: 2, 1, 64>}, {pipeline_mode = #tpu.pipeline_mode<synchronous>, transform_indices = @transform_17, window_bounds = array<i64: 1, 64>}, {pipeline_mode = #tpu.pipeline_mode<synchronous>, transform_indices = @transform_18, window_bounds = array<i64: 1, 64>}, {pipeline_mode = #tpu.pipeline_mode<synchronous>, transform_indices = @transform_19, window_bounds = array<i64: 64, 32>}, {pipeline_mode = #tpu.pipeline_mode<synchronous>, transform_indices = @transform_20, window_bounds = array<i64: 2, 32>}]} {
    %c0 = arith.constant 0 : index
    %c0_0 = arith.constant 0 : index
    %0 = vector.load %arg1[%c0, %c0_0] : memref<48x48xf32, #tpu.memory_space<vmem>>, vector<48x48xf32>
    %1 = arith.truncf %0 : vector<48x48xf32> to vector<48x48xbf16>
    %c0_1 = arith.constant 0 : index
    %c0_2 = arith.constant 0 : index
    %2 = vector.load %arg2[%c0_1, %c0_2] : memref<48x64xbf16, #tpu.memory_space<vmem>>, vector<48x64xbf16>
    %cst = arith.constant dense<0.000000e+00> : vector<48x64xf32>
    %3 = tpu.matmul %1, %2, %cst {dimension_numbers = #tpu.dot_dimension_numbers<[1], [0], [0], [1], [0, 0, 1, 1], [], []>} : vector<48x48xbf16>, vector<48x64xbf16>, vector<48x64xf32> -> vector<48x64xf32>
    %c0_3 = arith.constant 0 : index
    %c0_4 = arith.constant 0 : index
    %4 = vector.load %arg3[%c0_3, %c0_4] : memref<48x64xf32, #tpu.memory_space<vmem>>, vector<48x64xf32>
    %5 = arith.addf %3, %4 : vector<48x64xf32>
    %c0_5 = arith.constant 0 : index
    %c0_6 = arith.constant 0 : index
    %6 = vector.load %arg4[%c0_5, %c0_6] : memref<1x64xf32, #tpu.memory_space<vmem>>, vector<1x64xf32>
    %c0_7 = arith.constant 0 : index
    %c0_8 = arith.constant 0 : index
    %7 = vector.load %arg5[%c0_7, %c0_8] : memref<1x64xf32, #tpu.memory_space<vmem>>, vector<1x64xf32>
    %cst_9 = arith.constant dense<0.000000e+00> : vector<48xf32>
    %8 = vector.multi_reduction <add>, %5, %cst_9 [1] : vector<48x64xf32> to vector<48xf32>
    %9 = vector.shape_cast %8 : vector<48xf32> to vector<48x1xf32>
    %10 = arith.mulf %5, %5 : vector<48x64xf32>
    %cst_10 = arith.constant dense<0.000000e+00> : vector<48xf32>
    %11 = vector.multi_reduction <add>, %10, %cst_10 [1] : vector<48x64xf32> to vector<48xf32>
    %12 = vector.shape_cast %11 : vector<48xf32> to vector<48x1xf32>
    %cst_11 = arith.constant 1.562500e-02 : f32
    %13 = vector.broadcast %cst_11 : f32 to vector<48x1xf32>
    %14 = arith.mulf %9, %13 : vector<48x1xf32>
    %cst_12 = arith.constant 1.562500e-02 : f32
    %15 = vector.broadcast %cst_12 : f32 to vector<48x1xf32>
    %16 = arith.mulf %12, %15 : vector<48x1xf32>
    %17 = arith.mulf %14, %14 : vector<48x1xf32>
    %18 = arith.subf %16, %17 : vector<48x1xf32>
    %19 = vector.broadcast %14 : vector<48x1xf32> to vector<48x64xf32>
    %20 = arith.subf %5, %19 : vector<48x64xf32>
    %cst_13 = arith.constant 9.99999974E-6 : f32
    %21 = vector.broadcast %cst_13 : f32 to vector<48x1xf32>
    %22 = arith.addf %18, %21 : vector<48x1xf32>
    %23 = math.rsqrt %22 : vector<48x1xf32>
    %24 = vector.broadcast %23 : vector<48x1xf32> to vector<48x64xf32>
    %25 = arith.mulf %20, %24 : vector<48x64xf32>
    %26 = vector.broadcast %6 : vector<1x64xf32> to vector<48x64xf32>
    %27 = arith.mulf %25, %26 : vector<48x64xf32>
    %28 = vector.broadcast %7 : vector<1x64xf32> to vector<48x64xf32>
    %29 = arith.addf %27, %28 : vector<48x64xf32>
    %30 = tpu.iota {dimensions = array<i32: 1>} : vector<24x24xi32>
    %c17_i32 = arith.constant 17 : i32
    %31 = vector.broadcast %c17_i32 : i32 to vector<24x24xi32>
    %32 = arith.cmpi slt, %30, %31 : vector<24x24xi32>
    %cst_14 = arith.constant 0.000000e+00 : f32
    %cst_15 = arith.constant -1.000000e+30 : f32
    %33 = vector.broadcast %cst_14 : f32 to vector<24x24xf32>
    %34 = vector.broadcast %cst_15 : f32 to vector<24x24xf32>
    %35 = arith.select %32, %33, %34 : vector<24x24xi1>, vector<24x24xf32>
    %c0_16 = arith.constant 0 : index
    %c0_17 = arith.constant 0 : index
    %c0_18 = arith.constant 0 : index
    %36 = vector.load %arg6[%c0_16, %c0_17, %c0_18] : memref<2x1x64xf32, #tpu.memory_space<vmem>>, vector<1x1x64xf32>
    %37 = vector.shape_cast %36 : vector<1x1x64xf32> to vector<1x64xf32>
    %c0_19 = arith.constant 0 : index
    %c0_20 = arith.constant 0 : index
    %c0_21 = arith.constant 0 : index
    %38 = vector.load %arg7[%c0_19, %c0_20, %c0_21] : memref<2x1x64xf32, #tpu.memory_space<vmem>>, vector<1x1x64xf32>
    %39 = vector.shape_cast %38 : vector<1x1x64xf32> to vector<1x64xf32>
    %cst_22 = arith.constant dense<0.000000e+00> : vector<48xf32>
    %40 = vector.multi_reduction <add>, %29, %cst_22 [1] : vector<48x64xf32> to vector<48xf32>
    %41 = vector.shape_cast %40 : vector<48xf32> to vector<48x1xf32>
    %42 = arith.mulf %29, %29 : vector<48x64xf32>
    %cst_23 = arith.constant dense<0.000000e+00> : vector<48xf32>
    %43 = vector.multi_reduction <add>, %42, %cst_23 [1] : vector<48x64xf32> to vector<48xf32>
    %44 = vector.shape_cast %43 : vector<48xf32> to vector<48x1xf32>
    %cst_24 = arith.constant 1.562500e-02 : f32
    %45 = vector.broadcast %cst_24 : f32 to vector<48x1xf32>
    %46 = arith.mulf %41, %45 : vector<48x1xf32>
    %cst_25 = arith.constant 1.562500e-02 : f32
    %47 = vector.broadcast %cst_25 : f32 to vector<48x1xf32>
    %48 = arith.mulf %44, %47 : vector<48x1xf32>
    %49 = arith.mulf %46, %46 : vector<48x1xf32>
    %50 = arith.subf %48, %49 : vector<48x1xf32>
    %51 = vector.broadcast %46 : vector<48x1xf32> to vector<48x64xf32>
    %52 = arith.subf %29, %51 : vector<48x64xf32>
    %cst_26 = arith.constant 9.99999974E-6 : f32
    %53 = vector.broadcast %cst_26 : f32 to vector<48x1xf32>
    %54 = arith.addf %50, %53 : vector<48x1xf32>
    %55 = math.rsqrt %54 : vector<48x1xf32>
    %56 = vector.broadcast %55 : vector<48x1xf32> to vector<48x64xf32>
    %57 = arith.mulf %52, %56 : vector<48x64xf32>
    %58 = vector.broadcast %37 : vector<1x64xf32> to vector<48x64xf32>
    %59 = arith.mulf %57, %58 : vector<48x64xf32>
    %60 = vector.broadcast %39 : vector<1x64xf32> to vector<48x64xf32>
    %61 = arith.addf %59, %60 : vector<48x64xf32>
    %62 = arith.truncf %61 : vector<48x64xf32> to vector<48x64xbf16>
    %c0_27 = arith.constant 0 : index
    %c0_28 = arith.constant 0 : index
    %c0_29 = arith.constant 0 : index
    %63 = vector.load %arg8[%c0_27, %c0_28, %c0_29] : memref<2x64x192xbf16, #tpu.memory_space<vmem>>, vector<1x64x192xbf16>
    %64 = vector.shape_cast %63 : vector<1x64x192xbf16> to vector<64x192xbf16>
    %cst_30 = arith.constant dense<0.000000e+00> : vector<48x192xf32>
    %65 = tpu.matmul %62, %64, %cst_30 {dimension_numbers = #tpu.dot_dimension_numbers<[1], [0], [0], [1], [0, 0, 1, 1], [], []>} : vector<48x64xbf16>, vector<64x192xbf16>, vector<48x192xf32> -> vector<48x192xf32>
    %c0_31 = arith.constant 0 : index
    %c0_32 = arith.constant 0 : index
    %c0_33 = arith.constant 0 : index
    %66 = vector.load %arg9[%c0_31, %c0_32, %c0_33] : memref<2x1x192xf32, #tpu.memory_space<vmem>>, vector<1x1x192xf32>
    %67 = vector.shape_cast %66 : vector<1x1x192xf32> to vector<1x192xf32>
    %68 = vector.broadcast %67 : vector<1x192xf32> to vector<48x192xf32>
    %69 = arith.addf %65, %68 : vector<48x192xf32>
    %70 = vector.extract_strided_slice %69 {offsets = [0, 0], sizes = [24, 16], strides = [1, 1]} : vector<48x192xf32> to vector<24x16xf32>
    %71 = vector.extract_strided_slice %69 {offsets = [0, 64], sizes = [24, 16], strides = [1, 1]} : vector<48x192xf32> to vector<24x16xf32>
    %72 = vector.extract_strided_slice %69 {offsets = [0, 128], sizes = [24, 16], strides = [1, 1]} : vector<48x192xf32> to vector<24x16xf32>
    %73 = arith.truncf %70 : vector<24x16xf32> to vector<24x16xbf16>
    %74 = arith.truncf %71 : vector<24x16xf32> to vector<24x16xbf16>
    %cst_34 = arith.constant dense<0.000000e+00> : vector<24x24xf32>
    %75 = tpu.matmul %73, %74, %cst_34 {dimension_numbers = #tpu.dot_dimension_numbers<[1], [1], [0], [0], [0, 0, 1, 0], [], []>} : vector<24x16xbf16>, vector<24x16xbf16>, vector<24x24xf32> -> vector<24x24xf32>
    %76 = arith.addf %75, %35 : vector<24x24xf32>
    %cst_35 = arith.constant dense<0xFF800000> : vector<24xf32>
    %77 = vector.multi_reduction <maximumf>, %76, %cst_35 [1] : vector<24x24xf32> to vector<24xf32>
    %78 = vector.shape_cast %77 : vector<24xf32> to vector<24x1xf32>
    %79 = vector.broadcast %78 : vector<24x1xf32> to vector<24x24xf32>
    %80 = arith.subf %76, %79 : vector<24x24xf32>
    %81 = math.exp %80 : vector<24x24xf32>
    %cst_36 = arith.constant dense<0.000000e+00> : vector<24xf32>
    %82 = vector.multi_reduction <add>, %81, %cst_36 [1] : vector<24x24xf32> to vector<24xf32>
    %83 = vector.shape_cast %82 : vector<24xf32> to vector<24x1xf32>
    %84 = tpu.reciprocal %83 {approx = true} : vector<24x1xf32> -> vector<24x1xf32>
    %85 = vector.broadcast %84 : vector<24x1xf32> to vector<24x24xf32>
    %86 = arith.mulf %81, %85 : vector<24x24xf32>
    %87 = arith.truncf %86 : vector<24x24xf32> to vector<24x24xbf16>
    %88 = arith.truncf %72 : vector<24x16xf32> to vector<24x16xbf16>
    %cst_37 = arith.constant dense<0.000000e+00> : vector<24x16xf32>
    %89 = tpu.matmul %87, %88, %cst_37 {dimension_numbers = #tpu.dot_dimension_numbers<[1], [0], [0], [1], [0, 0, 1, 1], [], []>} : vector<24x24xbf16>, vector<24x16xbf16>, vector<24x16xf32> -> vector<24x16xf32>
    %90 = vector.extract_strided_slice %69 {offsets = [0, 16], sizes = [24, 16], strides = [1, 1]} : vector<48x192xf32> to vector<24x16xf32>
    %91 = vector.extract_strided_slice %69 {offsets = [0, 80], sizes = [24, 16], strides = [1, 1]} : vector<48x192xf32> to vector<24x16xf32>
    %92 = vector.extract_strided_slice %69 {offsets = [0, 144], sizes = [24, 16], strides = [1, 1]} : vector<48x192xf32> to vector<24x16xf32>
    %93 = arith.truncf %90 : vector<24x16xf32> to vector<24x16xbf16>
    %94 = arith.truncf %91 : vector<24x16xf32> to vector<24x16xbf16>
    %cst_38 = arith.constant dense<0.000000e+00> : vector<24x24xf32>
    %95 = tpu.matmul %93, %94, %cst_38 {dimension_numbers = #tpu.dot_dimension_numbers<[1], [1], [0], [0], [0, 0, 1, 0], [], []>} : vector<24x16xbf16>, vector<24x16xbf16>, vector<24x24xf32> -> vector<24x24xf32>
    %96 = arith.addf %95, %35 : vector<24x24xf32>
    %cst_39 = arith.constant dense<0xFF800000> : vector<24xf32>
    %97 = vector.multi_reduction <maximumf>, %96, %cst_39 [1] : vector<24x24xf32> to vector<24xf32>
    %98 = vector.shape_cast %97 : vector<24xf32> to vector<24x1xf32>
    %99 = vector.broadcast %98 : vector<24x1xf32> to vector<24x24xf32>
    %100 = arith.subf %96, %99 : vector<24x24xf32>
    %101 = math.exp %100 : vector<24x24xf32>
    %cst_40 = arith.constant dense<0.000000e+00> : vector<24xf32>
    %102 = vector.multi_reduction <add>, %101, %cst_40 [1] : vector<24x24xf32> to vector<24xf32>
    %103 = vector.shape_cast %102 : vector<24xf32> to vector<24x1xf32>
    %104 = tpu.reciprocal %103 {approx = true} : vector<24x1xf32> -> vector<24x1xf32>
    %105 = vector.broadcast %104 : vector<24x1xf32> to vector<24x24xf32>
    %106 = arith.mulf %101, %105 : vector<24x24xf32>
    %107 = arith.truncf %106 : vector<24x24xf32> to vector<24x24xbf16>
    %108 = arith.truncf %92 : vector<24x16xf32> to vector<24x16xbf16>
    %cst_41 = arith.constant dense<0.000000e+00> : vector<24x16xf32>
    %109 = tpu.matmul %107, %108, %cst_41 {dimension_numbers = #tpu.dot_dimension_numbers<[1], [0], [0], [1], [0, 0, 1, 1], [], []>} : vector<24x24xbf16>, vector<24x16xbf16>, vector<24x16xf32> -> vector<24x16xf32>
    %110 = vector.extract_strided_slice %69 {offsets = [0, 32], sizes = [24, 16], strides = [1, 1]} : vector<48x192xf32> to vector<24x16xf32>
    %111 = vector.extract_strided_slice %69 {offsets = [0, 96], sizes = [24, 16], strides = [1, 1]} : vector<48x192xf32> to vector<24x16xf32>
    %112 = vector.extract_strided_slice %69 {offsets = [0, 160], sizes = [24, 16], strides = [1, 1]} : vector<48x192xf32> to vector<24x16xf32>
    %113 = arith.truncf %110 : vector<24x16xf32> to vector<24x16xbf16>
    %114 = arith.truncf %111 : vector<24x16xf32> to vector<24x16xbf16>
    %cst_42 = arith.constant dense<0.000000e+00> : vector<24x24xf32>
    %115 = tpu.matmul %113, %114, %cst_42 {dimension_numbers = #tpu.dot_dimension_numbers<[1], [1], [0], [0], [0, 0, 1, 0], [], []>} : vector<24x16xbf16>, vector<24x16xbf16>, vector<24x24xf32> -> vector<24x24xf32>
    %116 = arith.addf %115, %35 : vector<24x24xf32>
    %cst_43 = arith.constant dense<0xFF800000> : vector<24xf32>
    %117 = vector.multi_reduction <maximumf>, %116, %cst_43 [1] : vector<24x24xf32> to vector<24xf32>
    %118 = vector.shape_cast %117 : vector<24xf32> to vector<24x1xf32>
    %119 = vector.broadcast %118 : vector<24x1xf32> to vector<24x24xf32>
    %120 = arith.subf %116, %119 : vector<24x24xf32>
    %121 = math.exp %120 : vector<24x24xf32>
    %cst_44 = arith.constant dense<0.000000e+00> : vector<24xf32>
    %122 = vector.multi_reduction <add>, %121, %cst_44 [1] : vector<24x24xf32> to vector<24xf32>
    %123 = vector.shape_cast %122 : vector<24xf32> to vector<24x1xf32>
    %124 = tpu.reciprocal %123 {approx = true} : vector<24x1xf32> -> vector<24x1xf32>
    %125 = vector.broadcast %124 : vector<24x1xf32> to vector<24x24xf32>
    %126 = arith.mulf %121, %125 : vector<24x24xf32>
    %127 = arith.truncf %126 : vector<24x24xf32> to vector<24x24xbf16>
    %128 = arith.truncf %112 : vector<24x16xf32> to vector<24x16xbf16>
    %cst_45 = arith.constant dense<0.000000e+00> : vector<24x16xf32>
    %129 = tpu.matmul %127, %128, %cst_45 {dimension_numbers = #tpu.dot_dimension_numbers<[1], [0], [0], [1], [0, 0, 1, 1], [], []>} : vector<24x24xbf16>, vector<24x16xbf16>, vector<24x16xf32> -> vector<24x16xf32>
    %130 = vector.extract_strided_slice %69 {offsets = [0, 48], sizes = [24, 16], strides = [1, 1]} : vector<48x192xf32> to vector<24x16xf32>
    %131 = vector.extract_strided_slice %69 {offsets = [0, 112], sizes = [24, 16], strides = [1, 1]} : vector<48x192xf32> to vector<24x16xf32>
    %132 = vector.extract_strided_slice %69 {offsets = [0, 176], sizes = [24, 16], strides = [1, 1]} : vector<48x192xf32> to vector<24x16xf32>
    %133 = arith.truncf %130 : vector<24x16xf32> to vector<24x16xbf16>
    %134 = arith.truncf %131 : vector<24x16xf32> to vector<24x16xbf16>
    %cst_46 = arith.constant dense<0.000000e+00> : vector<24x24xf32>
    %135 = tpu.matmul %133, %134, %cst_46 {dimension_numbers = #tpu.dot_dimension_numbers<[1], [1], [0], [0], [0, 0, 1, 0], [], []>} : vector<24x16xbf16>, vector<24x16xbf16>, vector<24x24xf32> -> vector<24x24xf32>
    %136 = arith.addf %135, %35 : vector<24x24xf32>
    %cst_47 = arith.constant dense<0xFF800000> : vector<24xf32>
    %137 = vector.multi_reduction <maximumf>, %136, %cst_47 [1] : vector<24x24xf32> to vector<24xf32>
    %138 = vector.shape_cast %137 : vector<24xf32> to vector<24x1xf32>
    %139 = vector.broadcast %138 : vector<24x1xf32> to vector<24x24xf32>
    %140 = arith.subf %136, %139 : vector<24x24xf32>
    %141 = math.exp %140 : vector<24x24xf32>
    %cst_48 = arith.constant dense<0.000000e+00> : vector<24xf32>
    %142 = vector.multi_reduction <add>, %141, %cst_48 [1] : vector<24x24xf32> to vector<24xf32>
    %143 = vector.shape_cast %142 : vector<24xf32> to vector<24x1xf32>
    %144 = tpu.reciprocal %143 {approx = true} : vector<24x1xf32> -> vector<24x1xf32>
    %145 = vector.broadcast %144 : vector<24x1xf32> to vector<24x24xf32>
    %146 = arith.mulf %141, %145 : vector<24x24xf32>
    %147 = arith.truncf %146 : vector<24x24xf32> to vector<24x24xbf16>
    %148 = arith.truncf %132 : vector<24x16xf32> to vector<24x16xbf16>
    %cst_49 = arith.constant dense<0.000000e+00> : vector<24x16xf32>
    %149 = tpu.matmul %147, %148, %cst_49 {dimension_numbers = #tpu.dot_dimension_numbers<[1], [0], [0], [1], [0, 0, 1, 1], [], []>} : vector<24x24xbf16>, vector<24x16xbf16>, vector<24x16xf32> -> vector<24x16xf32>
    %150 = tpu.concatenate %89, %109, %129, %149 in 1 : vector<24x16xf32>, vector<24x16xf32>, vector<24x16xf32>, vector<24x16xf32> -> vector<24x64xf32>
    %151 = vector.extract_strided_slice %69 {offsets = [24, 0], sizes = [24, 16], strides = [1, 1]} : vector<48x192xf32> to vector<24x16xf32>
    %152 = vector.extract_strided_slice %69 {offsets = [24, 64], sizes = [24, 16], strides = [1, 1]} : vector<48x192xf32> to vector<24x16xf32>
    %153 = vector.extract_strided_slice %69 {offsets = [24, 128], sizes = [24, 16], strides = [1, 1]} : vector<48x192xf32> to vector<24x16xf32>
    %154 = arith.truncf %151 : vector<24x16xf32> to vector<24x16xbf16>
    %155 = arith.truncf %152 : vector<24x16xf32> to vector<24x16xbf16>
    %cst_50 = arith.constant dense<0.000000e+00> : vector<24x24xf32>
    %156 = tpu.matmul %154, %155, %cst_50 {dimension_numbers = #tpu.dot_dimension_numbers<[1], [1], [0], [0], [0, 0, 1, 0], [], []>} : vector<24x16xbf16>, vector<24x16xbf16>, vector<24x24xf32> -> vector<24x24xf32>
    %157 = arith.addf %156, %35 : vector<24x24xf32>
    %cst_51 = arith.constant dense<0xFF800000> : vector<24xf32>
    %158 = vector.multi_reduction <maximumf>, %157, %cst_51 [1] : vector<24x24xf32> to vector<24xf32>
    %159 = vector.shape_cast %158 : vector<24xf32> to vector<24x1xf32>
    %160 = vector.broadcast %159 : vector<24x1xf32> to vector<24x24xf32>
    %161 = arith.subf %157, %160 : vector<24x24xf32>
    %162 = math.exp %161 : vector<24x24xf32>
    %cst_52 = arith.constant dense<0.000000e+00> : vector<24xf32>
    %163 = vector.multi_reduction <add>, %162, %cst_52 [1] : vector<24x24xf32> to vector<24xf32>
    %164 = vector.shape_cast %163 : vector<24xf32> to vector<24x1xf32>
    %165 = tpu.reciprocal %164 {approx = true} : vector<24x1xf32> -> vector<24x1xf32>
    %166 = vector.broadcast %165 : vector<24x1xf32> to vector<24x24xf32>
    %167 = arith.mulf %162, %166 : vector<24x24xf32>
    %168 = arith.truncf %167 : vector<24x24xf32> to vector<24x24xbf16>
    %169 = arith.truncf %153 : vector<24x16xf32> to vector<24x16xbf16>
    %cst_53 = arith.constant dense<0.000000e+00> : vector<24x16xf32>
    %170 = tpu.matmul %168, %169, %cst_53 {dimension_numbers = #tpu.dot_dimension_numbers<[1], [0], [0], [1], [0, 0, 1, 1], [], []>} : vector<24x24xbf16>, vector<24x16xbf16>, vector<24x16xf32> -> vector<24x16xf32>
    %171 = vector.extract_strided_slice %69 {offsets = [24, 16], sizes = [24, 16], strides = [1, 1]} : vector<48x192xf32> to vector<24x16xf32>
    %172 = vector.extract_strided_slice %69 {offsets = [24, 80], sizes = [24, 16], strides = [1, 1]} : vector<48x192xf32> to vector<24x16xf32>
    %173 = vector.extract_strided_slice %69 {offsets = [24, 144], sizes = [24, 16], strides = [1, 1]} : vector<48x192xf32> to vector<24x16xf32>
    %174 = arith.truncf %171 : vector<24x16xf32> to vector<24x16xbf16>
    %175 = arith.truncf %172 : vector<24x16xf32> to vector<24x16xbf16>
    %cst_54 = arith.constant dense<0.000000e+00> : vector<24x24xf32>
    %176 = tpu.matmul %174, %175, %cst_54 {dimension_numbers = #tpu.dot_dimension_numbers<[1], [1], [0], [0], [0, 0, 1, 0], [], []>} : vector<24x16xbf16>, vector<24x16xbf16>, vector<24x24xf32> -> vector<24x24xf32>
    %177 = arith.addf %176, %35 : vector<24x24xf32>
    %cst_55 = arith.constant dense<0xFF800000> : vector<24xf32>
    %178 = vector.multi_reduction <maximumf>, %177, %cst_55 [1] : vector<24x24xf32> to vector<24xf32>
    %179 = vector.shape_cast %178 : vector<24xf32> to vector<24x1xf32>
    %180 = vector.broadcast %179 : vector<24x1xf32> to vector<24x24xf32>
    %181 = arith.subf %177, %180 : vector<24x24xf32>
    %182 = math.exp %181 : vector<24x24xf32>
    %cst_56 = arith.constant dense<0.000000e+00> : vector<24xf32>
    %183 = vector.multi_reduction <add>, %182, %cst_56 [1] : vector<24x24xf32> to vector<24xf32>
    %184 = vector.shape_cast %183 : vector<24xf32> to vector<24x1xf32>
    %185 = tpu.reciprocal %184 {approx = true} : vector<24x1xf32> -> vector<24x1xf32>
    %186 = vector.broadcast %185 : vector<24x1xf32> to vector<24x24xf32>
    %187 = arith.mulf %182, %186 : vector<24x24xf32>
    %188 = arith.truncf %187 : vector<24x24xf32> to vector<24x24xbf16>
    %189 = arith.truncf %173 : vector<24x16xf32> to vector<24x16xbf16>
    %cst_57 = arith.constant dense<0.000000e+00> : vector<24x16xf32>
    %190 = tpu.matmul %188, %189, %cst_57 {dimension_numbers = #tpu.dot_dimension_numbers<[1], [0], [0], [1], [0, 0, 1, 1], [], []>} : vector<24x24xbf16>, vector<24x16xbf16>, vector<24x16xf32> -> vector<24x16xf32>
    %191 = vector.extract_strided_slice %69 {offsets = [24, 32], sizes = [24, 16], strides = [1, 1]} : vector<48x192xf32> to vector<24x16xf32>
    %192 = vector.extract_strided_slice %69 {offsets = [24, 96], sizes = [24, 16], strides = [1, 1]} : vector<48x192xf32> to vector<24x16xf32>
    %193 = vector.extract_strided_slice %69 {offsets = [24, 160], sizes = [24, 16], strides = [1, 1]} : vector<48x192xf32> to vector<24x16xf32>
    %194 = arith.truncf %191 : vector<24x16xf32> to vector<24x16xbf16>
    %195 = arith.truncf %192 : vector<24x16xf32> to vector<24x16xbf16>
    %cst_58 = arith.constant dense<0.000000e+00> : vector<24x24xf32>
    %196 = tpu.matmul %194, %195, %cst_58 {dimension_numbers = #tpu.dot_dimension_numbers<[1], [1], [0], [0], [0, 0, 1, 0], [], []>} : vector<24x16xbf16>, vector<24x16xbf16>, vector<24x24xf32> -> vector<24x24xf32>
    %197 = arith.addf %196, %35 : vector<24x24xf32>
    %cst_59 = arith.constant dense<0xFF800000> : vector<24xf32>
    %198 = vector.multi_reduction <maximumf>, %197, %cst_59 [1] : vector<24x24xf32> to vector<24xf32>
    %199 = vector.shape_cast %198 : vector<24xf32> to vector<24x1xf32>
    %200 = vector.broadcast %199 : vector<24x1xf32> to vector<24x24xf32>
    %201 = arith.subf %197, %200 : vector<24x24xf32>
    %202 = math.exp %201 : vector<24x24xf32>
    %cst_60 = arith.constant dense<0.000000e+00> : vector<24xf32>
    %203 = vector.multi_reduction <add>, %202, %cst_60 [1] : vector<24x24xf32> to vector<24xf32>
    %204 = vector.shape_cast %203 : vector<24xf32> to vector<24x1xf32>
    %205 = tpu.reciprocal %204 {approx = true} : vector<24x1xf32> -> vector<24x1xf32>
    %206 = vector.broadcast %205 : vector<24x1xf32> to vector<24x24xf32>
    %207 = arith.mulf %202, %206 : vector<24x24xf32>
    %208 = arith.truncf %207 : vector<24x24xf32> to vector<24x24xbf16>
    %209 = arith.truncf %193 : vector<24x16xf32> to vector<24x16xbf16>
    %cst_61 = arith.constant dense<0.000000e+00> : vector<24x16xf32>
    %210 = tpu.matmul %208, %209, %cst_61 {dimension_numbers = #tpu.dot_dimension_numbers<[1], [0], [0], [1], [0, 0, 1, 1], [], []>} : vector<24x24xbf16>, vector<24x16xbf16>, vector<24x16xf32> -> vector<24x16xf32>
    %211 = vector.extract_strided_slice %69 {offsets = [24, 48], sizes = [24, 16], strides = [1, 1]} : vector<48x192xf32> to vector<24x16xf32>
    %212 = vector.extract_strided_slice %69 {offsets = [24, 112], sizes = [24, 16], strides = [1, 1]} : vector<48x192xf32> to vector<24x16xf32>
    %213 = vector.extract_strided_slice %69 {offsets = [24, 176], sizes = [24, 16], strides = [1, 1]} : vector<48x192xf32> to vector<24x16xf32>
    %214 = arith.truncf %211 : vector<24x16xf32> to vector<24x16xbf16>
    %215 = arith.truncf %212 : vector<24x16xf32> to vector<24x16xbf16>
    %cst_62 = arith.constant dense<0.000000e+00> : vector<24x24xf32>
    %216 = tpu.matmul %214, %215, %cst_62 {dimension_numbers = #tpu.dot_dimension_numbers<[1], [1], [0], [0], [0, 0, 1, 0], [], []>} : vector<24x16xbf16>, vector<24x16xbf16>, vector<24x24xf32> -> vector<24x24xf32>
    %217 = arith.addf %216, %35 : vector<24x24xf32>
    %cst_63 = arith.constant dense<0xFF800000> : vector<24xf32>
    %218 = vector.multi_reduction <maximumf>, %217, %cst_63 [1] : vector<24x24xf32> to vector<24xf32>
    %219 = vector.shape_cast %218 : vector<24xf32> to vector<24x1xf32>
    %220 = vector.broadcast %219 : vector<24x1xf32> to vector<24x24xf32>
    %221 = arith.subf %217, %220 : vector<24x24xf32>
    %222 = math.exp %221 : vector<24x24xf32>
    %cst_64 = arith.constant dense<0.000000e+00> : vector<24xf32>
    %223 = vector.multi_reduction <add>, %222, %cst_64 [1] : vector<24x24xf32> to vector<24xf32>
    %224 = vector.shape_cast %223 : vector<24xf32> to vector<24x1xf32>
    %225 = tpu.reciprocal %224 {approx = true} : vector<24x1xf32> -> vector<24x1xf32>
    %226 = vector.broadcast %225 : vector<24x1xf32> to vector<24x24xf32>
    %227 = arith.mulf %222, %226 : vector<24x24xf32>
    %228 = arith.truncf %227 : vector<24x24xf32> to vector<24x24xbf16>
    %229 = arith.truncf %213 : vector<24x16xf32> to vector<24x16xbf16>
    %cst_65 = arith.constant dense<0.000000e+00> : vector<24x16xf32>
    %230 = tpu.matmul %228, %229, %cst_65 {dimension_numbers = #tpu.dot_dimension_numbers<[1], [0], [0], [1], [0, 0, 1, 1], [], []>} : vector<24x24xbf16>, vector<24x16xbf16>, vector<24x16xf32> -> vector<24x16xf32>
    %231 = tpu.concatenate %170, %190, %210, %230 in 1 : vector<24x16xf32>, vector<24x16xf32>, vector<24x16xf32>, vector<24x16xf32> -> vector<24x64xf32>
    %232 = tpu.concatenate %150, %231 in 0 : vector<24x64xf32>, vector<24x64xf32> -> vector<48x64xf32>
    %233 = arith.truncf %232 : vector<48x64xf32> to vector<48x64xbf16>
    %c0_66 = arith.constant 0 : index
    %c0_67 = arith.constant 0 : index
    %c0_68 = arith.constant 0 : index
    %234 = vector.load %arg10[%c0_66, %c0_67, %c0_68] : memref<2x64x64xbf16, #tpu.memory_space<vmem>>, vector<1x64x64xbf16>
    %235 = vector.shape_cast %234 : vector<1x64x64xbf16> to vector<64x64xbf16>
    %cst_69 = arith.constant dense<0.000000e+00> : vector<48x64xf32>
    %236 = tpu.matmul %233, %235, %cst_69 {dimension_numbers = #tpu.dot_dimension_numbers<[1], [0], [0], [1], [0, 0, 1, 1], [], []>} : vector<48x64xbf16>, vector<64x64xbf16>, vector<48x64xf32> -> vector<48x64xf32>
    %237 = arith.addf %29, %236 : vector<48x64xf32>
    %c0_70 = arith.constant 0 : index
    %c0_71 = arith.constant 0 : index
    %c0_72 = arith.constant 0 : index
    %238 = vector.load %arg11[%c0_70, %c0_71, %c0_72] : memref<2x1x64xf32, #tpu.memory_space<vmem>>, vector<1x1x64xf32>
    %239 = vector.shape_cast %238 : vector<1x1x64xf32> to vector<1x64xf32>
    %240 = vector.broadcast %239 : vector<1x64xf32> to vector<48x64xf32>
    %241 = arith.addf %237, %240 : vector<48x64xf32>
    %c0_73 = arith.constant 0 : index
    %c0_74 = arith.constant 0 : index
    %c0_75 = arith.constant 0 : index
    %242 = vector.load %arg12[%c0_73, %c0_74, %c0_75] : memref<2x1x64xf32, #tpu.memory_space<vmem>>, vector<1x1x64xf32>
    %243 = vector.shape_cast %242 : vector<1x1x64xf32> to vector<1x64xf32>
    %c0_76 = arith.constant 0 : index
    %c0_77 = arith.constant 0 : index
    %c0_78 = arith.constant 0 : index
    %244 = vector.load %arg13[%c0_76, %c0_77, %c0_78] : memref<2x1x64xf32, #tpu.memory_space<vmem>>, vector<1x1x64xf32>
    %245 = vector.shape_cast %244 : vector<1x1x64xf32> to vector<1x64xf32>
    %cst_79 = arith.constant dense<0.000000e+00> : vector<48xf32>
    %246 = vector.multi_reduction <add>, %241, %cst_79 [1] : vector<48x64xf32> to vector<48xf32>
    %247 = vector.shape_cast %246 : vector<48xf32> to vector<48x1xf32>
    %248 = arith.mulf %241, %241 : vector<48x64xf32>
    %cst_80 = arith.constant dense<0.000000e+00> : vector<48xf32>
    %249 = vector.multi_reduction <add>, %248, %cst_80 [1] : vector<48x64xf32> to vector<48xf32>
    %250 = vector.shape_cast %249 : vector<48xf32> to vector<48x1xf32>
    %cst_81 = arith.constant 1.562500e-02 : f32
    %251 = vector.broadcast %cst_81 : f32 to vector<48x1xf32>
    %252 = arith.mulf %247, %251 : vector<48x1xf32>
    %cst_82 = arith.constant 1.562500e-02 : f32
    %253 = vector.broadcast %cst_82 : f32 to vector<48x1xf32>
    %254 = arith.mulf %250, %253 : vector<48x1xf32>
    %255 = arith.mulf %252, %252 : vector<48x1xf32>
    %256 = arith.subf %254, %255 : vector<48x1xf32>
    %257 = vector.broadcast %252 : vector<48x1xf32> to vector<48x64xf32>
    %258 = arith.subf %241, %257 : vector<48x64xf32>
    %cst_83 = arith.constant 9.99999974E-6 : f32
    %259 = vector.broadcast %cst_83 : f32 to vector<48x1xf32>
    %260 = arith.addf %256, %259 : vector<48x1xf32>
    %261 = math.rsqrt %260 : vector<48x1xf32>
    %262 = vector.broadcast %261 : vector<48x1xf32> to vector<48x64xf32>
    %263 = arith.mulf %258, %262 : vector<48x64xf32>
    %264 = vector.broadcast %243 : vector<1x64xf32> to vector<48x64xf32>
    %265 = arith.mulf %263, %264 : vector<48x64xf32>
    %266 = vector.broadcast %245 : vector<1x64xf32> to vector<48x64xf32>
    %267 = arith.addf %265, %266 : vector<48x64xf32>
    %268 = arith.truncf %267 : vector<48x64xf32> to vector<48x64xbf16>
    %c0_84 = arith.constant 0 : index
    %c0_85 = arith.constant 0 : index
    %c0_86 = arith.constant 0 : index
    %269 = vector.load %arg14[%c0_84, %c0_85, %c0_86] : memref<2x64x256xbf16, #tpu.memory_space<vmem>>, vector<1x64x256xbf16>
    %270 = vector.shape_cast %269 : vector<1x64x256xbf16> to vector<64x256xbf16>
    %cst_87 = arith.constant dense<0.000000e+00> : vector<48x256xf32>
    %271 = tpu.matmul %268, %270, %cst_87 {dimension_numbers = #tpu.dot_dimension_numbers<[1], [0], [0], [1], [0, 0, 1, 1], [], []>} : vector<48x64xbf16>, vector<64x256xbf16>, vector<48x256xf32> -> vector<48x256xf32>
    %c0_88 = arith.constant 0 : index
    %c0_89 = arith.constant 0 : index
    %c0_90 = arith.constant 0 : index
    %272 = vector.load %arg15[%c0_88, %c0_89, %c0_90] : memref<2x1x256xf32, #tpu.memory_space<vmem>>, vector<1x1x256xf32>
    %273 = vector.shape_cast %272 : vector<1x1x256xf32> to vector<1x256xf32>
    %274 = vector.broadcast %273 : vector<1x256xf32> to vector<48x256xf32>
    %275 = arith.addf %271, %274 : vector<48x256xf32>
    %276 = arith.mulf %275, %275 : vector<48x256xf32>
    %277 = arith.mulf %275, %276 : vector<48x256xf32>
    %cst_91 = arith.constant 4.471500e-02 : f32
    %278 = vector.broadcast %cst_91 : f32 to vector<48x256xf32>
    %279 = arith.mulf %278, %277 : vector<48x256xf32>
    %280 = arith.addf %275, %279 : vector<48x256xf32>
    %cst_92 = arith.constant 0.797884583 : f32
    %281 = vector.broadcast %cst_92 : f32 to vector<48x256xf32>
    %282 = arith.mulf %281, %280 : vector<48x256xf32>
    %283 = math.tanh %282 : vector<48x256xf32>
    %cst_93 = arith.constant 1.000000e+00 : f32
    %284 = vector.broadcast %cst_93 : f32 to vector<48x256xf32>
    %285 = arith.addf %284, %283 : vector<48x256xf32>
    %cst_94 = arith.constant 5.000000e-01 : f32
    %286 = vector.broadcast %cst_94 : f32 to vector<48x256xf32>
    %287 = arith.mulf %286, %285 : vector<48x256xf32>
    %288 = arith.mulf %275, %287 : vector<48x256xf32>
    %289 = arith.truncf %288 : vector<48x256xf32> to vector<48x256xbf16>
    %c0_95 = arith.constant 0 : index
    %c0_96 = arith.constant 0 : index
    %c0_97 = arith.constant 0 : index
    %290 = vector.load %arg16[%c0_95, %c0_96, %c0_97] : memref<2x256x64xbf16, #tpu.memory_space<vmem>>, vector<1x256x64xbf16>
    %291 = vector.shape_cast %290 : vector<1x256x64xbf16> to vector<256x64xbf16>
    %cst_98 = arith.constant dense<0.000000e+00> : vector<48x64xf32>
    %292 = tpu.matmul %289, %291, %cst_98 {dimension_numbers = #tpu.dot_dimension_numbers<[1], [0], [0], [1], [0, 0, 1, 1], [], []>} : vector<48x256xbf16>, vector<256x64xbf16>, vector<48x64xf32> -> vector<48x64xf32>
    %c0_99 = arith.constant 0 : index
    %c0_100 = arith.constant 0 : index
    %c0_101 = arith.constant 0 : index
    %293 = vector.load %arg17[%c0_99, %c0_100, %c0_101] : memref<2x1x64xf32, #tpu.memory_space<vmem>>, vector<1x1x64xf32>
    %294 = vector.shape_cast %293 : vector<1x1x64xf32> to vector<1x64xf32>
    %295 = vector.broadcast %294 : vector<1x64xf32> to vector<48x64xf32>
    %296 = arith.addf %292, %295 : vector<48x64xf32>
    %297 = arith.addf %241, %296 : vector<48x64xf32>
    %c1 = arith.constant 1 : index
    %c0_102 = arith.constant 0 : index
    %c0_103 = arith.constant 0 : index
    %298 = vector.load %arg6[%c1, %c0_102, %c0_103] : memref<2x1x64xf32, #tpu.memory_space<vmem>>, vector<1x1x64xf32>
    %299 = vector.shape_cast %298 : vector<1x1x64xf32> to vector<1x64xf32>
    %c1_104 = arith.constant 1 : index
    %c0_105 = arith.constant 0 : index
    %c0_106 = arith.constant 0 : index
    %300 = vector.load %arg7[%c1_104, %c0_105, %c0_106] : memref<2x1x64xf32, #tpu.memory_space<vmem>>, vector<1x1x64xf32>
    %301 = vector.shape_cast %300 : vector<1x1x64xf32> to vector<1x64xf32>
    %cst_107 = arith.constant dense<0.000000e+00> : vector<48xf32>
    %302 = vector.multi_reduction <add>, %297, %cst_107 [1] : vector<48x64xf32> to vector<48xf32>
    %303 = vector.shape_cast %302 : vector<48xf32> to vector<48x1xf32>
    %304 = arith.mulf %297, %297 : vector<48x64xf32>
    %cst_108 = arith.constant dense<0.000000e+00> : vector<48xf32>
    %305 = vector.multi_reduction <add>, %304, %cst_108 [1] : vector<48x64xf32> to vector<48xf32>
    %306 = vector.shape_cast %305 : vector<48xf32> to vector<48x1xf32>
    %cst_109 = arith.constant 1.562500e-02 : f32
    %307 = vector.broadcast %cst_109 : f32 to vector<48x1xf32>
    %308 = arith.mulf %303, %307 : vector<48x1xf32>
    %cst_110 = arith.constant 1.562500e-02 : f32
    %309 = vector.broadcast %cst_110 : f32 to vector<48x1xf32>
    %310 = arith.mulf %306, %309 : vector<48x1xf32>
    %311 = arith.mulf %308, %308 : vector<48x1xf32>
    %312 = arith.subf %310, %311 : vector<48x1xf32>
    %313 = vector.broadcast %308 : vector<48x1xf32> to vector<48x64xf32>
    %314 = arith.subf %297, %313 : vector<48x64xf32>
    %cst_111 = arith.constant 9.99999974E-6 : f32
    %315 = vector.broadcast %cst_111 : f32 to vector<48x1xf32>
    %316 = arith.addf %312, %315 : vector<48x1xf32>
    %317 = math.rsqrt %316 : vector<48x1xf32>
    %318 = vector.broadcast %317 : vector<48x1xf32> to vector<48x64xf32>
    %319 = arith.mulf %314, %318 : vector<48x64xf32>
    %320 = vector.broadcast %299 : vector<1x64xf32> to vector<48x64xf32>
    %321 = arith.mulf %319, %320 : vector<48x64xf32>
    %322 = vector.broadcast %301 : vector<1x64xf32> to vector<48x64xf32>
    %323 = arith.addf %321, %322 : vector<48x64xf32>
    %324 = arith.truncf %323 : vector<48x64xf32> to vector<48x64xbf16>
    %c1_112 = arith.constant 1 : index
    %c0_113 = arith.constant 0 : index
    %c0_114 = arith.constant 0 : index
    %325 = vector.load %arg8[%c1_112, %c0_113, %c0_114] : memref<2x64x192xbf16, #tpu.memory_space<vmem>>, vector<1x64x192xbf16>
    %326 = vector.shape_cast %325 : vector<1x64x192xbf16> to vector<64x192xbf16>
    %cst_115 = arith.constant dense<0.000000e+00> : vector<48x192xf32>
    %327 = tpu.matmul %324, %326, %cst_115 {dimension_numbers = #tpu.dot_dimension_numbers<[1], [0], [0], [1], [0, 0, 1, 1], [], []>} : vector<48x64xbf16>, vector<64x192xbf16>, vector<48x192xf32> -> vector<48x192xf32>
    %c1_116 = arith.constant 1 : index
    %c0_117 = arith.constant 0 : index
    %c0_118 = arith.constant 0 : index
    %328 = vector.load %arg9[%c1_116, %c0_117, %c0_118] : memref<2x1x192xf32, #tpu.memory_space<vmem>>, vector<1x1x192xf32>
    %329 = vector.shape_cast %328 : vector<1x1x192xf32> to vector<1x192xf32>
    %330 = vector.broadcast %329 : vector<1x192xf32> to vector<48x192xf32>
    %331 = arith.addf %327, %330 : vector<48x192xf32>
    %332 = vector.extract_strided_slice %331 {offsets = [0, 0], sizes = [24, 16], strides = [1, 1]} : vector<48x192xf32> to vector<24x16xf32>
    %333 = vector.extract_strided_slice %331 {offsets = [0, 64], sizes = [24, 16], strides = [1, 1]} : vector<48x192xf32> to vector<24x16xf32>
    %334 = vector.extract_strided_slice %331 {offsets = [0, 128], sizes = [24, 16], strides = [1, 1]} : vector<48x192xf32> to vector<24x16xf32>
    %335 = arith.truncf %332 : vector<24x16xf32> to vector<24x16xbf16>
    %336 = arith.truncf %333 : vector<24x16xf32> to vector<24x16xbf16>
    %cst_119 = arith.constant dense<0.000000e+00> : vector<24x24xf32>
    %337 = tpu.matmul %335, %336, %cst_119 {dimension_numbers = #tpu.dot_dimension_numbers<[1], [1], [0], [0], [0, 0, 1, 0], [], []>} : vector<24x16xbf16>, vector<24x16xbf16>, vector<24x24xf32> -> vector<24x24xf32>
    %338 = arith.addf %337, %35 : vector<24x24xf32>
    %cst_120 = arith.constant dense<0xFF800000> : vector<24xf32>
    %339 = vector.multi_reduction <maximumf>, %338, %cst_120 [1] : vector<24x24xf32> to vector<24xf32>
    %340 = vector.shape_cast %339 : vector<24xf32> to vector<24x1xf32>
    %341 = vector.broadcast %340 : vector<24x1xf32> to vector<24x24xf32>
    %342 = arith.subf %338, %341 : vector<24x24xf32>
    %343 = math.exp %342 : vector<24x24xf32>
    %cst_121 = arith.constant dense<0.000000e+00> : vector<24xf32>
    %344 = vector.multi_reduction <add>, %343, %cst_121 [1] : vector<24x24xf32> to vector<24xf32>
    %345 = vector.shape_cast %344 : vector<24xf32> to vector<24x1xf32>
    %346 = tpu.reciprocal %345 {approx = true} : vector<24x1xf32> -> vector<24x1xf32>
    %347 = vector.broadcast %346 : vector<24x1xf32> to vector<24x24xf32>
    %348 = arith.mulf %343, %347 : vector<24x24xf32>
    %349 = arith.truncf %348 : vector<24x24xf32> to vector<24x24xbf16>
    %350 = arith.truncf %334 : vector<24x16xf32> to vector<24x16xbf16>
    %cst_122 = arith.constant dense<0.000000e+00> : vector<24x16xf32>
    %351 = tpu.matmul %349, %350, %cst_122 {dimension_numbers = #tpu.dot_dimension_numbers<[1], [0], [0], [1], [0, 0, 1, 1], [], []>} : vector<24x24xbf16>, vector<24x16xbf16>, vector<24x16xf32> -> vector<24x16xf32>
    %352 = vector.extract_strided_slice %331 {offsets = [0, 16], sizes = [24, 16], strides = [1, 1]} : vector<48x192xf32> to vector<24x16xf32>
    %353 = vector.extract_strided_slice %331 {offsets = [0, 80], sizes = [24, 16], strides = [1, 1]} : vector<48x192xf32> to vector<24x16xf32>
    %354 = vector.extract_strided_slice %331 {offsets = [0, 144], sizes = [24, 16], strides = [1, 1]} : vector<48x192xf32> to vector<24x16xf32>
    %355 = arith.truncf %352 : vector<24x16xf32> to vector<24x16xbf16>
    %356 = arith.truncf %353 : vector<24x16xf32> to vector<24x16xbf16>
    %cst_123 = arith.constant dense<0.000000e+00> : vector<24x24xf32>
    %357 = tpu.matmul %355, %356, %cst_123 {dimension_numbers = #tpu.dot_dimension_numbers<[1], [1], [0], [0], [0, 0, 1, 0], [], []>} : vector<24x16xbf16>, vector<24x16xbf16>, vector<24x24xf32> -> vector<24x24xf32>
    %358 = arith.addf %357, %35 : vector<24x24xf32>
    %cst_124 = arith.constant dense<0xFF800000> : vector<24xf32>
    %359 = vector.multi_reduction <maximumf>, %358, %cst_124 [1] : vector<24x24xf32> to vector<24xf32>
    %360 = vector.shape_cast %359 : vector<24xf32> to vector<24x1xf32>
    %361 = vector.broadcast %360 : vector<24x1xf32> to vector<24x24xf32>
    %362 = arith.subf %358, %361 : vector<24x24xf32>
    %363 = math.exp %362 : vector<24x24xf32>
    %cst_125 = arith.constant dense<0.000000e+00> : vector<24xf32>
    %364 = vector.multi_reduction <add>, %363, %cst_125 [1] : vector<24x24xf32> to vector<24xf32>
    %365 = vector.shape_cast %364 : vector<24xf32> to vector<24x1xf32>
    %366 = tpu.reciprocal %365 {approx = true} : vector<24x1xf32> -> vector<24x1xf32>
    %367 = vector.broadcast %366 : vector<24x1xf32> to vector<24x24xf32>
    %368 = arith.mulf %363, %367 : vector<24x24xf32>
    %369 = arith.truncf %368 : vector<24x24xf32> to vector<24x24xbf16>
    %370 = arith.truncf %354 : vector<24x16xf32> to vector<24x16xbf16>
    %cst_126 = arith.constant dense<0.000000e+00> : vector<24x16xf32>
    %371 = tpu.matmul %369, %370, %cst_126 {dimension_numbers = #tpu.dot_dimension_numbers<[1], [0], [0], [1], [0, 0, 1, 1], [], []>} : vector<24x24xbf16>, vector<24x16xbf16>, vector<24x16xf32> -> vector<24x16xf32>
    %372 = vector.extract_strided_slice %331 {offsets = [0, 32], sizes = [24, 16], strides = [1, 1]} : vector<48x192xf32> to vector<24x16xf32>
    %373 = vector.extract_strided_slice %331 {offsets = [0, 96], sizes = [24, 16], strides = [1, 1]} : vector<48x192xf32> to vector<24x16xf32>
    %374 = vector.extract_strided_slice %331 {offsets = [0, 160], sizes = [24, 16], strides = [1, 1]} : vector<48x192xf32> to vector<24x16xf32>
    %375 = arith.truncf %372 : vector<24x16xf32> to vector<24x16xbf16>
    %376 = arith.truncf %373 : vector<24x16xf32> to vector<24x16xbf16>
    %cst_127 = arith.constant dense<0.000000e+00> : vector<24x24xf32>
    %377 = tpu.matmul %375, %376, %cst_127 {dimension_numbers = #tpu.dot_dimension_numbers<[1], [1], [0], [0], [0, 0, 1, 0], [], []>} : vector<24x16xbf16>, vector<24x16xbf16>, vector<24x24xf32> -> vector<24x24xf32>
    %378 = arith.addf %377, %35 : vector<24x24xf32>
    %cst_128 = arith.constant dense<0xFF800000> : vector<24xf32>
    %379 = vector.multi_reduction <maximumf>, %378, %cst_128 [1] : vector<24x24xf32> to vector<24xf32>
    %380 = vector.shape_cast %379 : vector<24xf32> to vector<24x1xf32>
    %381 = vector.broadcast %380 : vector<24x1xf32> to vector<24x24xf32>
    %382 = arith.subf %378, %381 : vector<24x24xf32>
    %383 = math.exp %382 : vector<24x24xf32>
    %cst_129 = arith.constant dense<0.000000e+00> : vector<24xf32>
    %384 = vector.multi_reduction <add>, %383, %cst_129 [1] : vector<24x24xf32> to vector<24xf32>
    %385 = vector.shape_cast %384 : vector<24xf32> to vector<24x1xf32>
    %386 = tpu.reciprocal %385 {approx = true} : vector<24x1xf32> -> vector<24x1xf32>
    %387 = vector.broadcast %386 : vector<24x1xf32> to vector<24x24xf32>
    %388 = arith.mulf %383, %387 : vector<24x24xf32>
    %389 = arith.truncf %388 : vector<24x24xf32> to vector<24x24xbf16>
    %390 = arith.truncf %374 : vector<24x16xf32> to vector<24x16xbf16>
    %cst_130 = arith.constant dense<0.000000e+00> : vector<24x16xf32>
    %391 = tpu.matmul %389, %390, %cst_130 {dimension_numbers = #tpu.dot_dimension_numbers<[1], [0], [0], [1], [0, 0, 1, 1], [], []>} : vector<24x24xbf16>, vector<24x16xbf16>, vector<24x16xf32> -> vector<24x16xf32>
    %392 = vector.extract_strided_slice %331 {offsets = [0, 48], sizes = [24, 16], strides = [1, 1]} : vector<48x192xf32> to vector<24x16xf32>
    %393 = vector.extract_strided_slice %331 {offsets = [0, 112], sizes = [24, 16], strides = [1, 1]} : vector<48x192xf32> to vector<24x16xf32>
    %394 = vector.extract_strided_slice %331 {offsets = [0, 176], sizes = [24, 16], strides = [1, 1]} : vector<48x192xf32> to vector<24x16xf32>
    %395 = arith.truncf %392 : vector<24x16xf32> to vector<24x16xbf16>
    %396 = arith.truncf %393 : vector<24x16xf32> to vector<24x16xbf16>
    %cst_131 = arith.constant dense<0.000000e+00> : vector<24x24xf32>
    %397 = tpu.matmul %395, %396, %cst_131 {dimension_numbers = #tpu.dot_dimension_numbers<[1], [1], [0], [0], [0, 0, 1, 0], [], []>} : vector<24x16xbf16>, vector<24x16xbf16>, vector<24x24xf32> -> vector<24x24xf32>
    %398 = arith.addf %397, %35 : vector<24x24xf32>
    %cst_132 = arith.constant dense<0xFF800000> : vector<24xf32>
    %399 = vector.multi_reduction <maximumf>, %398, %cst_132 [1] : vector<24x24xf32> to vector<24xf32>
    %400 = vector.shape_cast %399 : vector<24xf32> to vector<24x1xf32>
    %401 = vector.broadcast %400 : vector<24x1xf32> to vector<24x24xf32>
    %402 = arith.subf %398, %401 : vector<24x24xf32>
    %403 = math.exp %402 : vector<24x24xf32>
    %cst_133 = arith.constant dense<0.000000e+00> : vector<24xf32>
    %404 = vector.multi_reduction <add>, %403, %cst_133 [1] : vector<24x24xf32> to vector<24xf32>
    %405 = vector.shape_cast %404 : vector<24xf32> to vector<24x1xf32>
    %406 = tpu.reciprocal %405 {approx = true} : vector<24x1xf32> -> vector<24x1xf32>
    %407 = vector.broadcast %406 : vector<24x1xf32> to vector<24x24xf32>
    %408 = arith.mulf %403, %407 : vector<24x24xf32>
    %409 = arith.truncf %408 : vector<24x24xf32> to vector<24x24xbf16>
    %410 = arith.truncf %394 : vector<24x16xf32> to vector<24x16xbf16>
    %cst_134 = arith.constant dense<0.000000e+00> : vector<24x16xf32>
    %411 = tpu.matmul %409, %410, %cst_134 {dimension_numbers = #tpu.dot_dimension_numbers<[1], [0], [0], [1], [0, 0, 1, 1], [], []>} : vector<24x24xbf16>, vector<24x16xbf16>, vector<24x16xf32> -> vector<24x16xf32>
    %412 = tpu.concatenate %351, %371, %391, %411 in 1 : vector<24x16xf32>, vector<24x16xf32>, vector<24x16xf32>, vector<24x16xf32> -> vector<24x64xf32>
    %413 = vector.extract_strided_slice %331 {offsets = [24, 0], sizes = [24, 16], strides = [1, 1]} : vector<48x192xf32> to vector<24x16xf32>
    %414 = vector.extract_strided_slice %331 {offsets = [24, 64], sizes = [24, 16], strides = [1, 1]} : vector<48x192xf32> to vector<24x16xf32>
    %415 = vector.extract_strided_slice %331 {offsets = [24, 128], sizes = [24, 16], strides = [1, 1]} : vector<48x192xf32> to vector<24x16xf32>
    %416 = arith.truncf %413 : vector<24x16xf32> to vector<24x16xbf16>
    %417 = arith.truncf %414 : vector<24x16xf32> to vector<24x16xbf16>
    %cst_135 = arith.constant dense<0.000000e+00> : vector<24x24xf32>
    %418 = tpu.matmul %416, %417, %cst_135 {dimension_numbers = #tpu.dot_dimension_numbers<[1], [1], [0], [0], [0, 0, 1, 0], [], []>} : vector<24x16xbf16>, vector<24x16xbf16>, vector<24x24xf32> -> vector<24x24xf32>
    %419 = arith.addf %418, %35 : vector<24x24xf32>
    %cst_136 = arith.constant dense<0xFF800000> : vector<24xf32>
    %420 = vector.multi_reduction <maximumf>, %419, %cst_136 [1] : vector<24x24xf32> to vector<24xf32>
    %421 = vector.shape_cast %420 : vector<24xf32> to vector<24x1xf32>
    %422 = vector.broadcast %421 : vector<24x1xf32> to vector<24x24xf32>
    %423 = arith.subf %419, %422 : vector<24x24xf32>
    %424 = math.exp %423 : vector<24x24xf32>
    %cst_137 = arith.constant dense<0.000000e+00> : vector<24xf32>
    %425 = vector.multi_reduction <add>, %424, %cst_137 [1] : vector<24x24xf32> to vector<24xf32>
    %426 = vector.shape_cast %425 : vector<24xf32> to vector<24x1xf32>
    %427 = tpu.reciprocal %426 {approx = true} : vector<24x1xf32> -> vector<24x1xf32>
    %428 = vector.broadcast %427 : vector<24x1xf32> to vector<24x24xf32>
    %429 = arith.mulf %424, %428 : vector<24x24xf32>
    %430 = arith.truncf %429 : vector<24x24xf32> to vector<24x24xbf16>
    %431 = arith.truncf %415 : vector<24x16xf32> to vector<24x16xbf16>
    %cst_138 = arith.constant dense<0.000000e+00> : vector<24x16xf32>
    %432 = tpu.matmul %430, %431, %cst_138 {dimension_numbers = #tpu.dot_dimension_numbers<[1], [0], [0], [1], [0, 0, 1, 1], [], []>} : vector<24x24xbf16>, vector<24x16xbf16>, vector<24x16xf32> -> vector<24x16xf32>
    %433 = vector.extract_strided_slice %331 {offsets = [24, 16], sizes = [24, 16], strides = [1, 1]} : vector<48x192xf32> to vector<24x16xf32>
    %434 = vector.extract_strided_slice %331 {offsets = [24, 80], sizes = [24, 16], strides = [1, 1]} : vector<48x192xf32> to vector<24x16xf32>
    %435 = vector.extract_strided_slice %331 {offsets = [24, 144], sizes = [24, 16], strides = [1, 1]} : vector<48x192xf32> to vector<24x16xf32>
    %436 = arith.truncf %433 : vector<24x16xf32> to vector<24x16xbf16>
    %437 = arith.truncf %434 : vector<24x16xf32> to vector<24x16xbf16>
    %cst_139 = arith.constant dense<0.000000e+00> : vector<24x24xf32>
    %438 = tpu.matmul %436, %437, %cst_139 {dimension_numbers = #tpu.dot_dimension_numbers<[1], [1], [0], [0], [0, 0, 1, 0], [], []>} : vector<24x16xbf16>, vector<24x16xbf16>, vector<24x24xf32> -> vector<24x24xf32>
    %439 = arith.addf %438, %35 : vector<24x24xf32>
    %cst_140 = arith.constant dense<0xFF800000> : vector<24xf32>
    %440 = vector.multi_reduction <maximumf>, %439, %cst_140 [1] : vector<24x24xf32> to vector<24xf32>
    %441 = vector.shape_cast %440 : vector<24xf32> to vector<24x1xf32>
    %442 = vector.broadcast %441 : vector<24x1xf32> to vector<24x24xf32>
    %443 = arith.subf %439, %442 : vector<24x24xf32>
    %444 = math.exp %443 : vector<24x24xf32>
    %cst_141 = arith.constant dense<0.000000e+00> : vector<24xf32>
    %445 = vector.multi_reduction <add>, %444, %cst_141 [1] : vector<24x24xf32> to vector<24xf32>
    %446 = vector.shape_cast %445 : vector<24xf32> to vector<24x1xf32>
    %447 = tpu.reciprocal %446 {approx = true} : vector<24x1xf32> -> vector<24x1xf32>
    %448 = vector.broadcast %447 : vector<24x1xf32> to vector<24x24xf32>
    %449 = arith.mulf %444, %448 : vector<24x24xf32>
    %450 = arith.truncf %449 : vector<24x24xf32> to vector<24x24xbf16>
    %451 = arith.truncf %435 : vector<24x16xf32> to vector<24x16xbf16>
    %cst_142 = arith.constant dense<0.000000e+00> : vector<24x16xf32>
    %452 = tpu.matmul %450, %451, %cst_142 {dimension_numbers = #tpu.dot_dimension_numbers<[1], [0], [0], [1], [0, 0, 1, 1], [], []>} : vector<24x24xbf16>, vector<24x16xbf16>, vector<24x16xf32> -> vector<24x16xf32>
    %453 = vector.extract_strided_slice %331 {offsets = [24, 32], sizes = [24, 16], strides = [1, 1]} : vector<48x192xf32> to vector<24x16xf32>
    %454 = vector.extract_strided_slice %331 {offsets = [24, 96], sizes = [24, 16], strides = [1, 1]} : vector<48x192xf32> to vector<24x16xf32>
    %455 = vector.extract_strided_slice %331 {offsets = [24, 160], sizes = [24, 16], strides = [1, 1]} : vector<48x192xf32> to vector<24x16xf32>
    %456 = arith.truncf %453 : vector<24x16xf32> to vector<24x16xbf16>
    %457 = arith.truncf %454 : vector<24x16xf32> to vector<24x16xbf16>
    %cst_143 = arith.constant dense<0.000000e+00> : vector<24x24xf32>
    %458 = tpu.matmul %456, %457, %cst_143 {dimension_numbers = #tpu.dot_dimension_numbers<[1], [1], [0], [0], [0, 0, 1, 0], [], []>} : vector<24x16xbf16>, vector<24x16xbf16>, vector<24x24xf32> -> vector<24x24xf32>
    %459 = arith.addf %458, %35 : vector<24x24xf32>
    %cst_144 = arith.constant dense<0xFF800000> : vector<24xf32>
    %460 = vector.multi_reduction <maximumf>, %459, %cst_144 [1] : vector<24x24xf32> to vector<24xf32>
    %461 = vector.shape_cast %460 : vector<24xf32> to vector<24x1xf32>
    %462 = vector.broadcast %461 : vector<24x1xf32> to vector<24x24xf32>
    %463 = arith.subf %459, %462 : vector<24x24xf32>
    %464 = math.exp %463 : vector<24x24xf32>
    %cst_145 = arith.constant dense<0.000000e+00> : vector<24xf32>
    %465 = vector.multi_reduction <add>, %464, %cst_145 [1] : vector<24x24xf32> to vector<24xf32>
    %466 = vector.shape_cast %465 : vector<24xf32> to vector<24x1xf32>
    %467 = tpu.reciprocal %466 {approx = true} : vector<24x1xf32> -> vector<24x1xf32>
    %468 = vector.broadcast %467 : vector<24x1xf32> to vector<24x24xf32>
    %469 = arith.mulf %464, %468 : vector<24x24xf32>
    %470 = arith.truncf %469 : vector<24x24xf32> to vector<24x24xbf16>
    %471 = arith.truncf %455 : vector<24x16xf32> to vector<24x16xbf16>
    %cst_146 = arith.constant dense<0.000000e+00> : vector<24x16xf32>
    %472 = tpu.matmul %470, %471, %cst_146 {dimension_numbers = #tpu.dot_dimension_numbers<[1], [0], [0], [1], [0, 0, 1, 1], [], []>} : vector<24x24xbf16>, vector<24x16xbf16>, vector<24x16xf32> -> vector<24x16xf32>
    %473 = vector.extract_strided_slice %331 {offsets = [24, 48], sizes = [24, 16], strides = [1, 1]} : vector<48x192xf32> to vector<24x16xf32>
    %474 = vector.extract_strided_slice %331 {offsets = [24, 112], sizes = [24, 16], strides = [1, 1]} : vector<48x192xf32> to vector<24x16xf32>
    %475 = vector.extract_strided_slice %331 {offsets = [24, 176], sizes = [24, 16], strides = [1, 1]} : vector<48x192xf32> to vector<24x16xf32>
    %476 = arith.truncf %473 : vector<24x16xf32> to vector<24x16xbf16>
    %477 = arith.truncf %474 : vector<24x16xf32> to vector<24x16xbf16>
    %cst_147 = arith.constant dense<0.000000e+00> : vector<24x24xf32>
    %478 = tpu.matmul %476, %477, %cst_147 {dimension_numbers = #tpu.dot_dimension_numbers<[1], [1], [0], [0], [0, 0, 1, 0], [], []>} : vector<24x16xbf16>, vector<24x16xbf16>, vector<24x24xf32> -> vector<24x24xf32>
    %479 = arith.addf %478, %35 : vector<24x24xf32>
    %cst_148 = arith.constant dense<0xFF800000> : vector<24xf32>
    %480 = vector.multi_reduction <maximumf>, %479, %cst_148 [1] : vector<24x24xf32> to vector<24xf32>
    %481 = vector.shape_cast %480 : vector<24xf32> to vector<24x1xf32>
    %482 = vector.broadcast %481 : vector<24x1xf32> to vector<24x24xf32>
    %483 = arith.subf %479, %482 : vector<24x24xf32>
    %484 = math.exp %483 : vector<24x24xf32>
    %cst_149 = arith.constant dense<0.000000e+00> : vector<24xf32>
    %485 = vector.multi_reduction <add>, %484, %cst_149 [1] : vector<24x24xf32> to vector<24xf32>
    %486 = vector.shape_cast %485 : vector<24xf32> to vector<24x1xf32>
    %487 = tpu.reciprocal %486 {approx = true} : vector<24x1xf32> -> vector<24x1xf32>
    %488 = vector.broadcast %487 : vector<24x1xf32> to vector<24x24xf32>
    %489 = arith.mulf %484, %488 : vector<24x24xf32>
    %490 = arith.truncf %489 : vector<24x24xf32> to vector<24x24xbf16>
    %491 = arith.truncf %475 : vector<24x16xf32> to vector<24x16xbf16>
    %cst_150 = arith.constant dense<0.000000e+00> : vector<24x16xf32>
    %492 = tpu.matmul %490, %491, %cst_150 {dimension_numbers = #tpu.dot_dimension_numbers<[1], [0], [0], [1], [0, 0, 1, 1], [], []>} : vector<24x24xbf16>, vector<24x16xbf16>, vector<24x16xf32> -> vector<24x16xf32>
    %493 = tpu.concatenate %432, %452, %472, %492 in 1 : vector<24x16xf32>, vector<24x16xf32>, vector<24x16xf32>, vector<24x16xf32> -> vector<24x64xf32>
    %494 = tpu.concatenate %412, %493 in 0 : vector<24x64xf32>, vector<24x64xf32> -> vector<48x64xf32>
    %495 = arith.truncf %494 : vector<48x64xf32> to vector<48x64xbf16>
    %c1_151 = arith.constant 1 : index
    %c0_152 = arith.constant 0 : index
    %c0_153 = arith.constant 0 : index
    %496 = vector.load %arg10[%c1_151, %c0_152, %c0_153] : memref<2x64x64xbf16, #tpu.memory_space<vmem>>, vector<1x64x64xbf16>
    %497 = vector.shape_cast %496 : vector<1x64x64xbf16> to vector<64x64xbf16>
    %cst_154 = arith.constant dense<0.000000e+00> : vector<48x64xf32>
    %498 = tpu.matmul %495, %497, %cst_154 {dimension_numbers = #tpu.dot_dimension_numbers<[1], [0], [0], [1], [0, 0, 1, 1], [], []>} : vector<48x64xbf16>, vector<64x64xbf16>, vector<48x64xf32> -> vector<48x64xf32>
    %499 = arith.addf %297, %498 : vector<48x64xf32>
    %c1_155 = arith.constant 1 : index
    %c0_156 = arith.constant 0 : index
    %c0_157 = arith.constant 0 : index
    %500 = vector.load %arg11[%c1_155, %c0_156, %c0_157] : memref<2x1x64xf32, #tpu.memory_space<vmem>>, vector<1x1x64xf32>
    %501 = vector.shape_cast %500 : vector<1x1x64xf32> to vector<1x64xf32>
    %502 = vector.broadcast %501 : vector<1x64xf32> to vector<48x64xf32>
    %503 = arith.addf %499, %502 : vector<48x64xf32>
    %c1_158 = arith.constant 1 : index
    %c0_159 = arith.constant 0 : index
    %c0_160 = arith.constant 0 : index
    %504 = vector.load %arg12[%c1_158, %c0_159, %c0_160] : memref<2x1x64xf32, #tpu.memory_space<vmem>>, vector<1x1x64xf32>
    %505 = vector.shape_cast %504 : vector<1x1x64xf32> to vector<1x64xf32>
    %c1_161 = arith.constant 1 : index
    %c0_162 = arith.constant 0 : index
    %c0_163 = arith.constant 0 : index
    %506 = vector.load %arg13[%c1_161, %c0_162, %c0_163] : memref<2x1x64xf32, #tpu.memory_space<vmem>>, vector<1x1x64xf32>
    %507 = vector.shape_cast %506 : vector<1x1x64xf32> to vector<1x64xf32>
    %cst_164 = arith.constant dense<0.000000e+00> : vector<48xf32>
    %508 = vector.multi_reduction <add>, %503, %cst_164 [1] : vector<48x64xf32> to vector<48xf32>
    %509 = vector.shape_cast %508 : vector<48xf32> to vector<48x1xf32>
    %510 = arith.mulf %503, %503 : vector<48x64xf32>
    %cst_165 = arith.constant dense<0.000000e+00> : vector<48xf32>
    %511 = vector.multi_reduction <add>, %510, %cst_165 [1] : vector<48x64xf32> to vector<48xf32>
    %512 = vector.shape_cast %511 : vector<48xf32> to vector<48x1xf32>
    %cst_166 = arith.constant 1.562500e-02 : f32
    %513 = vector.broadcast %cst_166 : f32 to vector<48x1xf32>
    %514 = arith.mulf %509, %513 : vector<48x1xf32>
    %cst_167 = arith.constant 1.562500e-02 : f32
    %515 = vector.broadcast %cst_167 : f32 to vector<48x1xf32>
    %516 = arith.mulf %512, %515 : vector<48x1xf32>
    %517 = arith.mulf %514, %514 : vector<48x1xf32>
    %518 = arith.subf %516, %517 : vector<48x1xf32>
    %519 = vector.broadcast %514 : vector<48x1xf32> to vector<48x64xf32>
    %520 = arith.subf %503, %519 : vector<48x64xf32>
    %cst_168 = arith.constant 9.99999974E-6 : f32
    %521 = vector.broadcast %cst_168 : f32 to vector<48x1xf32>
    %522 = arith.addf %518, %521 : vector<48x1xf32>
    %523 = math.rsqrt %522 : vector<48x1xf32>
    %524 = vector.broadcast %523 : vector<48x1xf32> to vector<48x64xf32>
    %525 = arith.mulf %520, %524 : vector<48x64xf32>
    %526 = vector.broadcast %505 : vector<1x64xf32> to vector<48x64xf32>
    %527 = arith.mulf %525, %526 : vector<48x64xf32>
    %528 = vector.broadcast %507 : vector<1x64xf32> to vector<48x64xf32>
    %529 = arith.addf %527, %528 : vector<48x64xf32>
    %530 = arith.truncf %529 : vector<48x64xf32> to vector<48x64xbf16>
    %c1_169 = arith.constant 1 : index
    %c0_170 = arith.constant 0 : index
    %c0_171 = arith.constant 0 : index
    %531 = vector.load %arg14[%c1_169, %c0_170, %c0_171] : memref<2x64x256xbf16, #tpu.memory_space<vmem>>, vector<1x64x256xbf16>
    %532 = vector.shape_cast %531 : vector<1x64x256xbf16> to vector<64x256xbf16>
    %cst_172 = arith.constant dense<0.000000e+00> : vector<48x256xf32>
    %533 = tpu.matmul %530, %532, %cst_172 {dimension_numbers = #tpu.dot_dimension_numbers<[1], [0], [0], [1], [0, 0, 1, 1], [], []>} : vector<48x64xbf16>, vector<64x256xbf16>, vector<48x256xf32> -> vector<48x256xf32>
    %c1_173 = arith.constant 1 : index
    %c0_174 = arith.constant 0 : index
    %c0_175 = arith.constant 0 : index
    %534 = vector.load %arg15[%c1_173, %c0_174, %c0_175] : memref<2x1x256xf32, #tpu.memory_space<vmem>>, vector<1x1x256xf32>
    %535 = vector.shape_cast %534 : vector<1x1x256xf32> to vector<1x256xf32>
    %536 = vector.broadcast %535 : vector<1x256xf32> to vector<48x256xf32>
    %537 = arith.addf %533, %536 : vector<48x256xf32>
    %538 = arith.mulf %537, %537 : vector<48x256xf32>
    %539 = arith.mulf %537, %538 : vector<48x256xf32>
    %cst_176 = arith.constant 4.471500e-02 : f32
    %540 = vector.broadcast %cst_176 : f32 to vector<48x256xf32>
    %541 = arith.mulf %540, %539 : vector<48x256xf32>
    %542 = arith.addf %537, %541 : vector<48x256xf32>
    %cst_177 = arith.constant 0.797884583 : f32
    %543 = vector.broadcast %cst_177 : f32 to vector<48x256xf32>
    %544 = arith.mulf %543, %542 : vector<48x256xf32>
    %545 = math.tanh %544 : vector<48x256xf32>
    %cst_178 = arith.constant 1.000000e+00 : f32
    %546 = vector.broadcast %cst_178 : f32 to vector<48x256xf32>
    %547 = arith.addf %546, %545 : vector<48x256xf32>
    %cst_179 = arith.constant 5.000000e-01 : f32
    %548 = vector.broadcast %cst_179 : f32 to vector<48x256xf32>
    %549 = arith.mulf %548, %547 : vector<48x256xf32>
    %550 = arith.mulf %537, %549 : vector<48x256xf32>
    %551 = arith.truncf %550 : vector<48x256xf32> to vector<48x256xbf16>
    %c1_180 = arith.constant 1 : index
    %c0_181 = arith.constant 0 : index
    %c0_182 = arith.constant 0 : index
    %552 = vector.load %arg16[%c1_180, %c0_181, %c0_182] : memref<2x256x64xbf16, #tpu.memory_space<vmem>>, vector<1x256x64xbf16>
    %553 = vector.shape_cast %552 : vector<1x256x64xbf16> to vector<256x64xbf16>
    %cst_183 = arith.constant dense<0.000000e+00> : vector<48x64xf32>
    %554 = tpu.matmul %551, %553, %cst_183 {dimension_numbers = #tpu.dot_dimension_numbers<[1], [0], [0], [1], [0, 0, 1, 1], [], []>} : vector<48x256xbf16>, vector<256x64xbf16>, vector<48x64xf32> -> vector<48x64xf32>
    %c1_184 = arith.constant 1 : index
    %c0_185 = arith.constant 0 : index
    %c0_186 = arith.constant 0 : index
    %555 = vector.load %arg17[%c1_184, %c0_185, %c0_186] : memref<2x1x64xf32, #tpu.memory_space<vmem>>, vector<1x1x64xf32>
    %556 = vector.shape_cast %555 : vector<1x1x64xf32> to vector<1x64xf32>
    %557 = vector.broadcast %556 : vector<1x64xf32> to vector<48x64xf32>
    %558 = arith.addf %554, %557 : vector<48x64xf32>
    %559 = arith.addf %503, %558 : vector<48x64xf32>
    %560 = vector.extract_strided_slice %559 {offsets = [0, 0], sizes = [1, 64], strides = [1, 1]} : vector<48x64xf32> to vector<1x64xf32>
    %561 = vector.extract_strided_slice %559 {offsets = [24, 0], sizes = [1, 64], strides = [1, 1]} : vector<48x64xf32> to vector<1x64xf32>
    %562 = tpu.concatenate %560, %561 in 0 : vector<1x64xf32>, vector<1x64xf32> -> vector<2x64xf32>
    %c0_187 = arith.constant 0 : index
    %c0_188 = arith.constant 0 : index
    %563 = vector.load %arg18[%c0_187, %c0_188] : memref<1x64xf32, #tpu.memory_space<vmem>>, vector<1x64xf32>
    %c0_189 = arith.constant 0 : index
    %c0_190 = arith.constant 0 : index
    %564 = vector.load %arg19[%c0_189, %c0_190] : memref<1x64xf32, #tpu.memory_space<vmem>>, vector<1x64xf32>
    %cst_191 = arith.constant dense<0.000000e+00> : vector<2xf32>
    %565 = vector.multi_reduction <add>, %562, %cst_191 [1] : vector<2x64xf32> to vector<2xf32>
    %566 = vector.shape_cast %565 : vector<2xf32> to vector<2x1xf32>
    %567 = arith.mulf %562, %562 : vector<2x64xf32>
    %cst_192 = arith.constant dense<0.000000e+00> : vector<2xf32>
    %568 = vector.multi_reduction <add>, %567, %cst_192 [1] : vector<2x64xf32> to vector<2xf32>
    %569 = vector.shape_cast %568 : vector<2xf32> to vector<2x1xf32>
    %cst_193 = arith.constant 1.562500e-02 : f32
    %570 = vector.broadcast %cst_193 : f32 to vector<2x1xf32>
    %571 = arith.mulf %566, %570 : vector<2x1xf32>
    %cst_194 = arith.constant 1.562500e-02 : f32
    %572 = vector.broadcast %cst_194 : f32 to vector<2x1xf32>
    %573 = arith.mulf %569, %572 : vector<2x1xf32>
    %574 = arith.mulf %571, %571 : vector<2x1xf32>
    %575 = arith.subf %573, %574 : vector<2x1xf32>
    %576 = vector.broadcast %571 : vector<2x1xf32> to vector<2x64xf32>
    %577 = arith.subf %562, %576 : vector<2x64xf32>
    %cst_195 = arith.constant 9.99999974E-6 : f32
    %578 = vector.broadcast %cst_195 : f32 to vector<2x1xf32>
    %579 = arith.addf %575, %578 : vector<2x1xf32>
    %580 = math.rsqrt %579 : vector<2x1xf32>
    %581 = vector.broadcast %580 : vector<2x1xf32> to vector<2x64xf32>
    %582 = arith.mulf %577, %581 : vector<2x64xf32>
    %583 = vector.broadcast %563 : vector<1x64xf32> to vector<2x64xf32>
    %584 = arith.mulf %582, %583 : vector<2x64xf32>
    %585 = vector.broadcast %564 : vector<1x64xf32> to vector<2x64xf32>
    %586 = arith.addf %584, %585 : vector<2x64xf32>
    %587 = arith.truncf %586 : vector<2x64xf32> to vector<2x64xbf16>
    %c0_196 = arith.constant 0 : index
    %c0_197 = arith.constant 0 : index
    %588 = vector.load %arg20[%c0_196, %c0_197] : memref<64x32xbf16, #tpu.memory_space<vmem>>, vector<64x32xbf16>
    %cst_198 = arith.constant dense<0.000000e+00> : vector<2x32xf32>
    %589 = tpu.matmul %587, %588, %cst_198 {dimension_numbers = #tpu.dot_dimension_numbers<[1], [0], [0], [1], [0, 0, 1, 1], [], []>} : vector<2x64xbf16>, vector<64x32xbf16>, vector<2x32xf32> -> vector<2x32xf32>
    %c0_199 = arith.constant 0 : index
    %c0_200 = arith.constant 0 : index
    %590 = vector.load %arg21[%c0_199, %c0_200] : memref<2x32xf32, #tpu.memory_space<vmem>>, vector<2x32xf32>
    tpu.vector_store %arg21[%c0_199, %c0_200], %589 {strides = array<i32>} : memref<2x32xf32, #tpu.memory_space<vmem>>, vector<2x32xf32>,
    return
  }
  func.func @transform_0(%arg0: i32) -> (i32, i32) {
    %c0_i32 = arith.constant 0 : i32
    %c0_i32_0 = arith.constant 0 : i32
    %c0_i32_1 = arith.constant 0 : i32
    return %c0_i32, %c0_i32_0 : i32, i32
  }
  func.func @transform_1(%arg0: i32) -> (i32, i32) {
    %c0_i32 = arith.constant 0 : i32
    %c0_i32_0 = arith.constant 0 : i32
    %c0_i32_1 = arith.constant 0 : i32
    return %c0_i32, %c0_i32_0 : i32, i32
  }
  func.func @transform_2(%arg0: i32) -> (i32, i32) {
    %c0_i32 = arith.constant 0 : i32
    %c0_i32_0 = arith.constant 0 : i32
    %c0_i32_1 = arith.constant 0 : i32
    return %c0_i32, %c0_i32_0 : i32, i32
  }
  func.func @transform_3(%arg0: i32) -> (i32, i32) {
    %c0_i32 = arith.constant 0 : i32
    %c0_i32_0 = arith.constant 0 : i32
    %c0_i32_1 = arith.constant 0 : i32
    return %c0_i32, %c0_i32_0 : i32, i32
  }
  func.func @transform_4(%arg0: i32) -> (i32, i32) {
    %c0_i32 = arith.constant 0 : i32
    %c0_i32_0 = arith.constant 0 : i32
    %c0_i32_1 = arith.constant 0 : i32
    return %c0_i32, %c0_i32_0 : i32, i32
  }
  func.func @transform_5(%arg0: i32) -> (i32, i32, i32) {
    %c0_i32 = arith.constant 0 : i32
    %c0_i32_0 = arith.constant 0 : i32
    %c0_i32_1 = arith.constant 0 : i32
    %c0_i32_2 = arith.constant 0 : i32
    return %c0_i32, %c0_i32_0, %c0_i32_1 : i32, i32, i32
  }
  func.func @transform_6(%arg0: i32) -> (i32, i32, i32) {
    %c0_i32 = arith.constant 0 : i32
    %c0_i32_0 = arith.constant 0 : i32
    %c0_i32_1 = arith.constant 0 : i32
    %c0_i32_2 = arith.constant 0 : i32
    return %c0_i32, %c0_i32_0, %c0_i32_1 : i32, i32, i32
  }
  func.func @transform_7(%arg0: i32) -> (i32, i32, i32) {
    %c0_i32 = arith.constant 0 : i32
    %c0_i32_0 = arith.constant 0 : i32
    %c0_i32_1 = arith.constant 0 : i32
    %c0_i32_2 = arith.constant 0 : i32
    return %c0_i32, %c0_i32_0, %c0_i32_1 : i32, i32, i32
  }
  func.func @transform_8(%arg0: i32) -> (i32, i32, i32) {
    %c0_i32 = arith.constant 0 : i32
    %c0_i32_0 = arith.constant 0 : i32
    %c0_i32_1 = arith.constant 0 : i32
    %c0_i32_2 = arith.constant 0 : i32
    return %c0_i32, %c0_i32_0, %c0_i32_1 : i32, i32, i32
  }
  func.func @transform_9(%arg0: i32) -> (i32, i32, i32) {
    %c0_i32 = arith.constant 0 : i32
    %c0_i32_0 = arith.constant 0 : i32
    %c0_i32_1 = arith.constant 0 : i32
    %c0_i32_2 = arith.constant 0 : i32
    return %c0_i32, %c0_i32_0, %c0_i32_1 : i32, i32, i32
  }
  func.func @transform_10(%arg0: i32) -> (i32, i32, i32) {
    %c0_i32 = arith.constant 0 : i32
    %c0_i32_0 = arith.constant 0 : i32
    %c0_i32_1 = arith.constant 0 : i32
    %c0_i32_2 = arith.constant 0 : i32
    return %c0_i32, %c0_i32_0, %c0_i32_1 : i32, i32, i32
  }
  func.func @transform_11(%arg0: i32) -> (i32, i32, i32) {
    %c0_i32 = arith.constant 0 : i32
    %c0_i32_0 = arith.constant 0 : i32
    %c0_i32_1 = arith.constant 0 : i32
    %c0_i32_2 = arith.constant 0 : i32
    return %c0_i32, %c0_i32_0, %c0_i32_1 : i32, i32, i32
  }
  func.func @transform_12(%arg0: i32) -> (i32, i32, i32) {
    %c0_i32 = arith.constant 0 : i32
    %c0_i32_0 = arith.constant 0 : i32
    %c0_i32_1 = arith.constant 0 : i32
    %c0_i32_2 = arith.constant 0 : i32
    return %c0_i32, %c0_i32_0, %c0_i32_1 : i32, i32, i32
  }
  func.func @transform_13(%arg0: i32) -> (i32, i32, i32) {
    %c0_i32 = arith.constant 0 : i32
    %c0_i32_0 = arith.constant 0 : i32
    %c0_i32_1 = arith.constant 0 : i32
    %c0_i32_2 = arith.constant 0 : i32
    return %c0_i32, %c0_i32_0, %c0_i32_1 : i32, i32, i32
  }
  func.func @transform_14(%arg0: i32) -> (i32, i32, i32) {
    %c0_i32 = arith.constant 0 : i32
    %c0_i32_0 = arith.constant 0 : i32
    %c0_i32_1 = arith.constant 0 : i32
    %c0_i32_2 = arith.constant 0 : i32
    return %c0_i32, %c0_i32_0, %c0_i32_1 : i32, i32, i32
  }
  func.func @transform_15(%arg0: i32) -> (i32, i32, i32) {
    %c0_i32 = arith.constant 0 : i32
    %c0_i32_0 = arith.constant 0 : i32
    %c0_i32_1 = arith.constant 0 : i32
    %c0_i32_2 = arith.constant 0 : i32
    return %c0_i32, %c0_i32_0, %c0_i32_1 : i32, i32, i32
  }
  func.func @transform_16(%arg0: i32) -> (i32, i32, i32) {
    %c0_i32 = arith.constant 0 : i32
    %c0_i32_0 = arith.constant 0 : i32
    %c0_i32_1 = arith.constant 0 : i32
    %c0_i32_2 = arith.constant 0 : i32
    return %c0_i32, %c0_i32_0, %c0_i32_1 : i32, i32, i32
  }
  func.func @transform_17(%arg0: i32) -> (i32, i32) {
    %c0_i32 = arith.constant 0 : i32
    %c0_i32_0 = arith.constant 0 : i32
    %c0_i32_1 = arith.constant 0 : i32
    return %c0_i32, %c0_i32_0 : i32, i32
  }
  func.func @transform_18(%arg0: i32) -> (i32, i32) {
    %c0_i32 = arith.constant 0 : i32
    %c0_i32_0 = arith.constant 0 : i32
    %c0_i32_1 = arith.constant 0 : i32
    return %c0_i32, %c0_i32_0 : i32, i32
  }
  func.func @transform_19(%arg0: i32) -> (i32, i32) {
    %c0_i32 = arith.constant 0 : i32
    %c0_i32_0 = arith.constant 0 : i32
    %c0_i32_1 = arith.constant 0 : i32
    return %c0_i32, %c0_i32_0 : i32, i32
  }
  func.func @transform_20(%arg0: i32) -> (i32, i32) {
    %c0_i32 = arith.constant 0 : i32
    %c0_i32_0 = arith.constant 0 : i32
    %c0_i32_1 = arith.constant 0 : i32
    return %c0_i32, %c0_i32_0 : i32, i32
  }
}

</mosaic_0001>

<bundles_post_ra>
// kernel: encode_image.1
= control target key start
LH: loop header
LB: loop body
LE: loop exit
PB: predicated region body
PF: predicated region fallthrough
CT: control target
= control target key end

     0   :  { %s7191_s0 = inlined_call_operand.vmem [shape: f32[48,48], index: 0, kind: input, shape index: {}]   ;;  %s7192_s1 = inlined_call_operand.vmem [shape: bf16[48,64], index: 1, kind: input, shape index: {}]   ;;  %s7193_s2 = inlined_call_operand.vmem [shape: f32[48,64], index: 2, kind: input, shape index: {}]   ;;  %s7194_s3 = inlined_call_operand.vmem [shape: f32[1,64], index: 3, kind: input, shape index: {}]   ;;  %s7195_s4 = inlined_call_operand.vmem [shape: f32[1,64], index: 4, kind: input, shape index: {}]   ;;  %s7196_s5 = inlined_call_operand.vmem [shape: f32[2,1,64], index: 5, kind: input, shape index: {}]   ;;  %s7197_s6 = inlined_call_operand.vmem [shape: f32[2,1,64], index: 6, kind: input, shape index: {}]   ;;  %s7198_s7 = inlined_call_operand.vmem [shape: bf16[2,64,192], index: 7, kind: input, shape index: {}]   ;;  %s7199_s8 = inlined_call_operand.vmem [shape: f32[2,1,192], index: 8, kind: input, shape index: {}]   ;;  %s7200_s9 = inlined_call_operand.vmem [shape: bf16[2,64,64], index: 9, kind: input, shape index: {}]   ;;  %s7201_s10 = inlined_call_operand.vmem [shape: f32[2,1,64], index: 10, kind: input, shape index: {}]   ;;  %s7202_s11 = inlined_call_operand.vmem [shape: f32[2,1,64], index: 11, kind: input, shape index: {}]   ;;  %s7203_s12 = inlined_call_operand.vmem [shape: f32[2,1,64], index: 12, kind: input, shape index: {}]   ;;  %s7204_s13 = inlined_call_operand.vmem [shape: bf16[2,64,256], index: 13, kind: input, shape index: {}]   ;;  %s7205_s14 = inlined_call_operand.vmem [shape: f32[2,1,256], index: 14, kind: input, shape index: {}]   ;;  %s7206_s15 = inlined_call_operand.vmem [shape: bf16[2,256,64], index: 15, kind: input, shape index: {}]   ;;  %s7207_s16 = inlined_call_operand.vmem [shape: f32[2,1,64], index: 16, kind: input, shape index: {}]   ;;  %s7208_s17 = inlined_call_operand.vmem [shape: f32[1,64], index: 17, kind: input, shape index: {}]   ;;  %s7209_s18 = inlined_call_operand.vmem [shape: f32[1,64], index: 18, kind: input, shape index: {}]   ;;  %s7210_s19 = inlined_call_operand.vmem [shape: bf16[64,32], index: 19, kind: input, shape index: {}]   ;;  %s7211_s20 = inlined_call_operand.hbm [shape: f32[2,32], index: 20, kind: output, shape index: {}]  }
   0x1   :  { %7219 = sst [smem:[#allocation5_spill]] %s7191_s0 }
   0x2   :  { %7220 = sst [smem:[#allocation6_spill]] %s7192_s1 }
   0x3   :  { %7221 = sst [smem:[#allocation7_spill]] %s7193_s2 }
   0x4   :  { %7222 = sst [smem:[#allocation8_spill]] %s7194_s3 }
   0x5   :  { %7223 = sst [smem:[#allocation9_spill]] %s7195_s4 }
   0x6   :  { %s7224_s23 = sld [smem:[#allocation6_spill]] }
   0x7   :  { %s7225_s28 = sld [smem:[#allocation5_spill]] }
   0xc   :  { %v4636_v0 = vld [vmem:[%s7224_s23 + $0x10] sm:$0xff]  ;;  %v4635_v1 = vld [vmem:[%s7224_s23 + $0x8] sm:$0xff]  ;;  %v4634_v2 = vld [vmem:[%s7224_s23] sm:$0xff] }
   0xd   :  { %121 = vmatpush.bf16.msra.mxu0 %v4636_v0  ;;  %4713 = vmatpush.bf16.msra.mxu1 %v4636_v0  ;;  %v67_v3 = vld [vmem:[%s7225_s28] sm:$0xff]  ;;  %v68_v4 = vld [vmem:[%s7225_s28 + $0x8] sm:$0xff] }
   0xe   :  { %v71_v5 = vld [vmem:[%s7225_s28 + $0x20] sm:$0xff]  ;;  %v72_v6 = vld [vmem:[%s7225_s28 + $0x28] sm:$0xff] }
  0x11   :  { %122 = vmatpush.bf16.msra.mxu0 %v4635_v1  ;;  %4714 = vmatpush.bf16.msra.mxu1 %v4635_v1 }
  0x12   :  { %25 = vsyncpa [#allocation3], 0  ;;  %v73_v7 = vpack.c.bf16 %v68_v4, %v67_v3  ;;  %v75_v8 = vpack.c.bf16 %v72_v6, %v71_v5  ;;  %vm106_vm0 = vcmask 392192   ;;  %v69_v9 = vld [vmem:[%s7225_s28 + $0x10] sm:$0xff]  ;;  %v70_v10 = vld [vmem:[%s7225_s28 + $0x18] sm:$0xff]  ;;  %s7226_s26 = sld [smem:[#allocation7_spill]] }
  0x13   :  { %v74_v11 = vpack.c.bf16 %v70_v10, %v69_v9  ;;  %vm142_vm1 = vcmask 523264   ;;  %s7227_s25 = sld [smem:[#allocation8_spill]]  ;;  %s5159_s23 = smov 64  }
  0x14   :  { %s7228_s27 = sld [smem:[#allocation9_spill]]  ;;  %s5160_s24 = smov 32  }
  0x15   :  { %123 = vmatpush.bf16.msra.mxu0 %v4634_v2  ;;  %4715 = vmatpush.bf16.msra.mxu1 %v4634_v2  ;;  %s5161_s2 = smov 48   ;;  %s5163_s3 = smov 112  }
  0x18   :  { %4168 = vmatmul.msk.bf16.vlgmr.msra.gmra.mxu0 %vm106_vm0, %v73_v7  ;;  %4170 = vmatmul.msk.bf16.vlgmr.msra.gmra.mxu1 %vm106_vm0, %v75_v8  ;;  %v82_v12 = vld [vmem:[%s7226_s26] sm:$0xff]  ;;  %v83_v18 = vld [vmem:[%s7226_s26 + $0x8] sm:$0xff]  ;;  %v84_v25 = vld [vmem:[%s7226_s26 + $0x10] sm:$0xff] }
  0x19   :  { %v87_v30 = vld [vmem:[%s7226_s26 + $0x28] sm:$0xff]  ;;  %v85_v33 = vld [vmem:[%s7226_s26 + $0x18] sm:$0xff]  ;;  %v86_v35 = vld [vmem:[%s7226_s26 + $0x20] sm:$0xff]  ;;  %s7217_s26 = smov 80  }
  0x28   :  { %4169 = vmatmul.msk.bf16.gmra.mxu0 %vm106_vm0, %v74_v11 }
  0x95   :  { %v125_v13 = vpop.f32.mrf.mxu0  ;;  %v135_v21 = vpop.f32.mrf.mxu1 }
  0x96   :  { %v5306_v14 = vadd.f32 %v125_v13, %v82_v12  ;;  %v5346_v38 = vadd.f32 %v135_v21, %v86_v35 }
  0x98   :  { %v143_v15 = vsel %vm142_vm1, %v5306_v14, 0.0  ;;  %v161_v16 = vmul.f32 %v5306_v14, %v5306_v14  ;;  %v165_v43 = vmul.f32 %v5346_v38, %v5346_v38  ;;  %v155_v44 = vsel %vm142_vm1, %v5346_v38, 0.0 }
  0x99   :  { %144 = vadd.xlane.f32.xlu0 %v143_v15 }
  0x9a   :  { %v167_v17 = vsel %vm142_vm1, %v161_v16, 0.0  ;;  %v179_v45 = vsel %vm142_vm1, %v165_v43, 0.0 }
  0x9b   :  { %168 = vadd.xlane.f32.xlu1 %v167_v17 }
  0x9d   :  { %v127_v19 = vpop.f32.mrf.mxu0  ;;  %v137_v31 = vpop.f32.mrf.mxu1 }
  0x9e   :  { %v5316_v20 = vadd.f32 %v127_v19, %v83_v18  ;;  %v5339_v34 = vadd.f32 %v137_v31, %v87_v30  ;;  %v5372_v19 = vld [vmem:[%s7227_s25] ss:$0 sm:$0xff]  ;;  %s7215_s25 = smov 16  }
  0xa0   :  { %v146_v22 = vsel %vm142_vm1, %v5316_v20, 0.0  ;;  %v162_v23 = vmul.f32 %v5316_v20, %v5316_v20  ;;  %v158_v41 = vsel %vm142_vm1, %v5339_v34, 0.0 }
  0xa1   :  { %147 = vadd.xlane.f32.xlu0 %v146_v22 }
  0xa2   :  { %v170_v24 = vsel %vm142_vm1, %v162_v23, 0.0 }
  0xa3   :  { %171 = vadd.xlane.f32.xlu1 %v170_v24 }
  0xa5   :  { %v130_v26 = vpop.f32.mrf.mxu0 }
  0xa6   :  { %v5326_v27 = vadd.f32 %v130_v26, %v84_v25 }
  0xa8   :  { %v149_v28 = vsel %vm142_vm1, %v5326_v27, 0.0  ;;  %v163_v29 = vmul.f32 %v5326_v27, %v5326_v27 }
  0xa9   :  { %150 = vadd.xlane.f32.xlu2 %v149_v28 }
  0xaa   :  { %v173_v32 = vsel %vm142_vm1, %v163_v29, 0.0 }
  0xab   :  { %174 = vadd.xlane.f32.xlu0 %v173_v32 }
  0xad   :  { %v132_v36 = vpop.f32.mrf.mxu0 }
  0xae   :  { %v5344_v37 = vadd.f32 %v132_v36, %v85_v33 }
  0xb0   :  { %v152_v39 = vsel %vm142_vm1, %v5344_v37, 0.0  ;;  %v164_v40 = vmul.f32 %v5344_v37, %v5344_v37 }
  0xb1   :  { %153 = vadd.xlane.f32.xlu2 %v152_v39 }
  0xb2   :  { %v176_v42 = vsel %vm142_vm1, %v164_v40, 0.0 }
  0xb3   :  { %177 = vadd.xlane.f32.xlu1 %v176_v42  ;;  %159 = vadd.xlane.f32.xlu0 %v158_v41 }
  0xb9   :  { %156 = vadd.xlane.f32.xlu2 %v155_v44 }
  0xbb   :  { %180 = vadd.xlane.f32.xlu0 %v179_v45 }
 0x10c   :  { %v145_v46 = vpop.xlane.xlu0 %144 }
 0x10d   :  { %v185_v47 = vmul.f32 0.015625, %v145_v46 }
 0x10e   :  { %v169_v48 = vpop.xlane.xlu1 %168 }
 0x10f   :  { %v197_v49 = vmul.f32 %v185_v47, %v185_v47  ;;  %v191_v50 = vmul.f32 0.015625, %v169_v48  ;;  %v209_v13 = vsub.f32 %v5306_v14, %v185_v47  ;;  %v5379_v14 = vld [vmem:[%s7228_s27] ss:$0 sm:$0xff]  ;;  %s5165_s27 = smov 96  }
 0x111   :  { %v203_v51 = vsub.f32 %v191_v50, %v197_v49  ;;  %v166_v50 = vmul.f32 %v5339_v34, %v5339_v34 }
 0x113   :  { %v215_v52 = vadd.f32 1e-05, %v203_v51 }
 0x114   :  { %v148_v53 = vpop.xlane.xlu0 %147 }
 0x115   :  { %4831 = vrsqrt.f32 %v215_v52  ;;  %v186_v54 = vmul.f32 0.015625, %v148_v53  ;;  %vm227_vm3 = vweird.f32 %v215_v52 }
 0x116   :  { %v172_v55 = vpop.xlane.xlu1 %171 }
 0x117   :  { %v198_v56 = vmul.f32 %v186_v54, %v186_v54  ;;  %v192_v57 = vmul.f32 0.015625, %v172_v55  ;;  %v210_v36 = vsub.f32 %v5316_v20, %v186_v54 }
 0x119   :  { %v204_v58 = vsub.f32 %v192_v57, %v198_v56 }
 0x11b   :  { %v4832_v59 = vpop.eup %4831  ;;  %v216_v60 = vadd.f32 1e-05, %v204_v58 }
 0x11c   :  { %v222_v61 = vmul.f32 %v4832_v59, %v215_v52  ;;  %v151_v62 = vpop.xlane.xlu2 %150  ;;  %vm228_vm2 = vweird.f32 %v4832_v59 }
 0x11d   :  { %4833 = vrsqrt.f32 %v216_v60  ;;  %v5360_v63 = vmul.f32 0.015625, %v151_v62  ;;  %vm229_vm4 = vmor %vm227_vm3, %vm228_vm2  ;;  %vm237_vm6 = vweird.f32 %v216_v60 }
 0x11e   :  { %v223_v0 = vmul.f32 %v4832_v59, %v222_v61  ;;  %v175_v1 = vpop.xlane.xlu0 %174  ;;  %v182_v61 = vsel %vm142_vm1, %v166_v50, 0.0 }
 0x11f   :  { %v199_v2 = vmul.f32 %v5360_v63, %v5360_v63  ;;  %v193_v3 = vmul.f32 0.015625, %v175_v1  ;;  %v211_v56 = vsub.f32 %v5326_v27, %v5360_v63 }
 0x120   :  { %v224_v4 = vmul.f32 0.5, %v223_v0 }
 0x121   :  { %v205_v5 = vsub.f32 %v193_v3, %v199_v2 }
 0x122   :  { %v225_v6 = vsub.f32 1.5, %v224_v4 }
 0x123   :  { %v4834_v7 = vpop.eup %4833  ;;  %v217_v8 = vadd.f32 1e-05, %v205_v5 }
 0x124   :  { %v226_v9 = vmul.f32 %v4832_v59, %v225_v6  ;;  %v232_v10 = vmul.f32 %v4834_v7, %v216_v60  ;;  %v154_v11 = vpop.xlane.xlu2 %153  ;;  %vm238_vm5 = vweird.f32 %v4834_v7 }
 0x125   :  { %4835 = vrsqrt.f32 %v217_v8  ;;  %v5364_v12 = vmul.f32 0.015625, %v154_v11  ;;  %vm239_vm7 = vmor %vm237_vm6, %vm238_vm5  ;;  %vm247_vm8 = vweird.f32 %v217_v8 }
 0x126   :  { %v230_v15 = vsel %vm229_vm4, %v4832_v59, %v226_v9  ;;  %v233_v16 = vmul.f32 %v4834_v7, %v232_v10  ;;  %v178_v17 = vpop.xlane.xlu1 %177  ;;  %v5367_v18 = vpop.xlane.xlu0 %159 }
 0x127   :  { %v200_v21 = vmul.f32 %v5364_v12, %v5364_v12  ;;  %v194_v22 = vmul.f32 0.015625, %v178_v17  ;;  %v281_v24 = vmul.f32 %v230_v15, %v209_v13  ;;  %v5465_v50 = vmul.f32 0.015625, %v5367_v18 }
 0x128   :  { %v234_v23 = vmul.f32 0.5, %v233_v16 }
 0x129   :  { %v206_v25 = vsub.f32 %v194_v22, %v200_v21  ;;  %v290_v28 = vmul.f32 %v5372_v19, %v281_v24 }
 0x12a   :  { %v235_v26 = vsub.f32 1.5, %v234_v23 }
 0x12b   :  { %v4836_v29 = vpop.eup %4835  ;;  %v218_v30 = vadd.f32 1e-05, %v206_v25  ;;  %v5383_v35 = vadd.f32 %v5379_v14, %v290_v28 }
 0x12c   :  { %v236_v31 = vmul.f32 %v4834_v7, %v235_v26  ;;  %v242_v32 = vmul.f32 %v4836_v29, %v217_v8  ;;  %v157_v33 = vpop.xlane.xlu2 %156  ;;  %vm248_vm9 = vweird.f32 %v4836_v29 }
 0x12d   :  { %4837 = vrsqrt.f32 %v218_v30  ;;  %v5386_v39 = vmul.f32 0.015625, %v157_v33  ;;  %v311_v42 = vsel %vm142_vm1, %v5383_v35, 0.0  ;;  %vm249_vm10 = vmor %vm247_vm8, %vm248_vm9  ;;  %vm257_vm11 = vweird.f32 %v218_v30 }
 0x12e   :  { %v240_v40 = vsel %vm239_vm7, %v4834_v7, %v236_v31  ;;  %v243_v41 = vmul.f32 %v4836_v29, %v242_v32  ;;  %v181_v43 = vpop.xlane.xlu0 %180  ;;  %312 = vadd.xlane.f32.xlu1 %v311_v42  ;;  %v329_v27 = vmul.f32 %v5383_v35, %v5383_v35  ;;  %v212_v7 = vsub.f32 %v5344_v37, %v5364_v12 }
 0x12f   :  { %v201_v44 = vmul.f32 %v5386_v39, %v5386_v39  ;;  %v195_v45 = vmul.f32 0.015625, %v181_v43  ;;  %v282_v46 = vmul.f32 %v240_v40, %v210_v36  ;;  %v213_v23 = vsub.f32 %v5346_v38, %v5386_v39  ;;  %v4197_v36 = vld [vmem:[%s7198_s7 + $0x30] sm:$0xf]  ;;  %v4644_v39 = vld [vmem:[%s7198_s7 + $0x34] sm:$0xf0] }
 0x130   :  { %v244_v47 = vmul.f32 0.5, %v243_v41  ;;  %v335_v8 = vsel %vm142_vm1, %v329_v27, 0.0  ;;  %v4643_v40 = vld [vmem:[%s7198_s7 + $0x34] sm:$0xf]  ;;  %v4198_v42 = vor.u32 %v4644_v39, %v4197_v36  ;;  %v4199_v43 = vld [vmem:[%s7198_s7 + $0x38] sm:$0xf0] }
 0x131   :  { %v207_v20 = vsub.f32 %v195_v45, %v201_v44  ;;  %v291_v48 = vmul.f32 %v5372_v19, %v282_v46  ;;  %v4202_v44 = vor.u32 %v4643_v40, %v4199_v43  ;;  %v4189_v45 = vld [vmem:[%s7198_s7 + $0x20] sm:$0xf]  ;;  %v4642_v46 = vld [vmem:[%s7198_s7 + $0x24] sm:$0xf0] }
 0x132   :  { %v245_v49 = vsub.f32 1.5, %v244_v47  ;;  %543 = vmatpush.bf16.msrb.mxu1 %v4198_v42  ;;  %v4641_v47 = vld [vmem:[%s7198_s7 + $0x24] sm:$0xf] }
 0x133   :  { %v4838_v51 = vpop.eup %4837  ;;  %v219_v52 = vadd.f32 1e-05, %v207_v20  ;;  %v5396_v53 = vadd.f32 %v5379_v14, %v291_v48  ;;  %567 = vmatpush.bf16.msra.mxu2 %v4202_v44  ;;  %v4190_v20 = vor.u32 %v4642_v46, %v4189_v45  ;;  %v4191_v48 = vld [vmem:[%s7198_s7 + $0x28] sm:$0xf0] }
 0x134   :  { %v246_v54 = vmul.f32 %v4836_v29, %v245_v49  ;;  %v252_v55 = vmul.f32 %v4838_v51, %v218_v30  ;;  %vm258_vm12 = vweird.f32 %v4838_v51  ;;  %v4194_v49 = vor.u32 %v4641_v47, %v4191_v48 }
 0x135   :  { %4839 = vrsqrt.f32 %v219_v52  ;;  %v314_v57 = vsel %vm142_vm1, %v5396_v53, 0.0  ;;  %v330_v58 = vmul.f32 %v5396_v53, %v5396_v53  ;;  %vm259_vm13 = vmor %vm257_vm11, %vm258_vm12  ;;  %vm267_vm14 = vweird.f32 %v219_v52 }
 0x136   :  { %v250_v59 = vsel %vm249_vm10, %v4836_v29, %v246_v54  ;;  %v253_v60 = vmul.f32 %v4838_v51, %v252_v55  ;;  %315 = vadd.xlane.f32.xlu2 %v314_v57  ;;  %183 = vadd.xlane.f32.xlu1 %v182_v61  ;;  %v4181_v55 = vld [vmem:[%s7198_s7 + $0x10] sm:$0xf]  ;;  %v202_v57 = vmul.f32 %v5465_v50, %v5465_v50  ;;  %v4183_v61 = vld [vmem:[%s7198_s7 + $0x18] sm:$0xf0] }
 0x137   :  { %v338_v62 = vsel %vm142_vm1, %v330_v58, 0.0  ;;  %v283_v0 = vmul.f32 %v250_v59, %v211_v56  ;;  %544 = vmatpush.bf16.msrb.mxu1 %v4190_v20  ;;  %568 = vmatpush.bf16.msra.mxu2 %v4194_v49  ;;  %v4640_v56 = vld [vmem:[%s7198_s7 + $0x14] sm:$0xf0] }
 0x138   :  { %v254_v1 = vmul.f32 0.5, %v253_v60  ;;  %339 = vadd.xlane.f32.xlu0 %v338_v62  ;;  %v4182_v18 = vor.u32 %v4640_v56, %v4181_v55  ;;  %v4639_v60 = vld [vmem:[%s7198_s7 + $0x14] sm:$0xf] }
 0x139   :  { %v292_v63 = vmul.f32 %v5372_v19, %v283_v0 }
 0x13a   :  { %v255_v2 = vsub.f32 1.5, %v254_v1  ;;  %v4186_v1 = vor.u32 %v4639_v60, %v4183_v61 }
 0x13b   :  { %v4840_v3 = vpop.eup %4839  ;;  %v5410_v4 = vadd.f32 %v5379_v14, %v292_v63  ;;  %545 = vmatpush.bf16.msrb.mxu1 %v4182_v18 }
 0x13c   :  { %v256_v5 = vmul.f32 %v4838_v51, %v255_v2  ;;  %v262_v6 = vmul.f32 %v4840_v3, %v219_v52  ;;  %vm268_vm15 = vweird.f32 %v4840_v3  ;;  %569 = vmatpush.bf16.msra.mxu2 %v4186_v1 }
 0x13d   :  { %v317_v9 = vsel %vm142_vm1, %v5410_v4, 0.0  ;;  %v331_v10 = vmul.f32 %v5410_v4, %v5410_v4  ;;  %vm269_vm2 = vmor %vm267_vm14, %vm268_vm15 }
 0x13e   :  { %v260_v11 = vsel %vm259_vm13, %v4838_v51, %v256_v5  ;;  %v263_v13 = vmul.f32 %v4840_v3, %v262_v6  ;;  %336 = vadd.xlane.f32.xlu2 %v335_v8  ;;  %318 = vadd.xlane.f32.xlu1 %v317_v9  ;;  %v4638_v5 = vld [vmem:[%s7198_s7 + $0x4] sm:$0xf0]  ;;  %v4637_v6 = vld [vmem:[%s7198_s7 + $0x4] sm:$0xf]  ;;  %v4175_v9 = vld [vmem:[%s7198_s7 + $0x8] sm:$0xf0] }
 0x13f   :  { %v341_v15 = vsel %vm142_vm1, %v331_v10, 0.0  ;;  %v284_v16 = vmul.f32 %v260_v11, %v212_v7  ;;  %v4178_v11 = vor.u32 %v4637_v6, %v4175_v9 }
 0x140   :  { %v264_v17 = vmul.f32 0.5, %v263_v13  ;;  %342 = vadd.xlane.f32.xlu0 %v341_v15 }
 0x141   :  { %v293_v37 = vmul.f32 %v5372_v19, %v284_v16  ;;  %570 = vmatpush.bf16.msra.mxu2 %v4178_v11 }
 0x142   :  { %v265_v12 = vsub.f32 1.5, %v264_v17 }
 0x143   :  { %v5422_v21 = vadd.f32 %v5379_v14, %v293_v37 }
 0x144   :  { %v266_v22 = vmul.f32 %v4840_v3, %v265_v12 }
 0x145   :  { %v320_v24 = vsel %vm142_vm1, %v5422_v21, 0.0  ;;  %v332_v25 = vmul.f32 %v5422_v21, %v5422_v21 }
 0x146   :  { %v270_v26 = vsel %vm269_vm2, %v4840_v3, %v266_v22  ;;  %321 = vadd.xlane.f32.xlu2 %v320_v24  ;;  %v4173_v3 = vld [vmem:[%s7198_s7] sm:$0xf] }
 0x147   :  { %v344_v28 = vsel %vm142_vm1, %v332_v25, 0.0  ;;  %v285_v29 = vmul.f32 %v270_v26, %v213_v23  ;;  %v4174_v8 = vor.u32 %v4638_v5, %v4173_v3 }
 0x148   :  { %345 = vadd.xlane.f32.xlu1 %v344_v28 }
 0x149   :  { %v294_v30 = vmul.f32 %v5372_v19, %v285_v29  ;;  %546 = vmatpush.bf16.msrb.mxu1 %v4174_v8 }
 0x14b   :  { %v5433_v31 = vadd.f32 %v5379_v14, %v294_v30 }
 0x14d   :  { %v323_v38 = vsel %vm142_vm1, %v5433_v31, 0.0  ;;  %v333_v32 = vmul.f32 %v5433_v31, %v5433_v31 }
 0x14e   :  { %324 = vadd.xlane.f32.xlu2 %v323_v38 }
 0x14f   :  { %v347_v33 = vsel %vm142_vm1, %v333_v32, 0.0 }
 0x150   :  { %348 = vadd.xlane.f32.xlu1 %v347_v33 }
 0x1a1   :  { %v313_v41 = vpop.xlane.xlu1 %312 }
 0x1a2   :  { %v5485_v27 = vmul.f32 0.015625, %v313_v41 }
 0x1a4   :  { %v365_v15 = vmul.f32 %v5485_v27, %v5485_v27 }
 0x1a9   :  { %v316_v51 = vpop.xlane.xlu2 %315  ;;  %v184_v52 = vpop.xlane.xlu1 %183 }
 0x1aa   :  { %v5467_v54 = vmul.f32 0.015625, %v316_v51  ;;  %v196_v58 = vmul.f32 0.015625, %v184_v52 }
 0x1ab   :  { %v340_v59 = vpop.xlane.xlu0 %339 }
 0x1ac   :  { %v366_v62 = vmul.f32 %v5467_v54, %v5467_v54  ;;  %v360_v0 = vmul.f32 0.015625, %v340_v59  ;;  %v208_v63 = vsub.f32 %v196_v58, %v202_v57  ;;  %v214_v58 = vsub.f32 %v5339_v34, %v5465_v50  ;;  %v5521_v34 = vld [vmem:[%s7196_s5] ss:$0 sm:$0xff] }
 0x1ae   :  { %v372_v2 = vsub.f32 %v360_v0, %v366_v62  ;;  %v220_v7 = vadd.f32 1e-05, %v208_v63  ;;  %v378_v62 = vsub.f32 %v5396_v53, %v5467_v54 }
 0x1b0   :  { %v384_v10 = vadd.f32 1e-05, %v372_v2  ;;  %4841 = vrsqrt.f32 %v220_v7  ;;  %vm277_vm5 = vweird.f32 %v220_v7 }
 0x1b1   :  { %v337_v13 = vpop.xlane.xlu2 %336  ;;  %v319_v17 = vpop.xlane.xlu1 %318 }
 0x1b2   :  { %4843 = vrsqrt.f32 %v384_v10  ;;  %v359_v16 = vmul.f32 0.015625, %v337_v13  ;;  %v5501_v37 = vmul.f32 0.015625, %v319_v17  ;;  %vm405_vm7 = vweird.f32 %v384_v10 }
 0x1b3   :  { %v343_v12 = vpop.xlane.xlu0 %342 }
 0x1b4   :  { %v371_v22 = vsub.f32 %v359_v16, %v365_v15  ;;  %v361_v23 = vmul.f32 0.015625, %v343_v12  ;;  %v367_v24 = vmul.f32 %v5501_v37, %v5501_v37  ;;  %v5536_v15 = vld [vmem:[%s7197_s6] ss:$0 sm:$0xff] }
 0x1b6   :  { %v383_v25 = vadd.f32 1e-05, %v371_v22  ;;  %v4842_v26 = vpop.eup %4841  ;;  %v373_v28 = vsub.f32 %v361_v23, %v367_v24 }
 0x1b7   :  { %v272_v30 = vmul.f32 %v4842_v26, %v220_v7  ;;  %vm278_vm3 = vweird.f32 %v4842_v26  ;;  %v377_v7 = vsub.f32 %v5383_v35, %v5485_v27 }
 0x1b8   :  { %v4844_v29 = vpop.eup %4843  ;;  %4845 = vrsqrt.f32 %v383_v25  ;;  %v5505_v32 = vadd.f32 1e-05, %v373_v28  ;;  %vm279_vm6 = vmor %vm277_vm5, %vm278_vm3  ;;  %vm395_vm10 = vweird.f32 %v383_v25 }
 0x1b9   :  { %v400_v38 = vmul.f32 %v4844_v29, %v384_v10  ;;  %v322_v33 = vpop.xlane.xlu2 %321  ;;  %v273_v36 = vmul.f32 %v4842_v26, %v272_v30  ;;  %vm406_vm4 = vweird.f32 %v4844_v29 }
 0x1ba   :  { %v5507_v39 = vmul.f32 0.015625, %v322_v33  ;;  %4847 = vrsqrt.f32 %v5505_v32  ;;  %vm407_vm8 = vmor %vm405_vm7, %vm406_vm4  ;;  %vm415_vm14 = vweird.f32 %v5505_v32  ;;  %v379_v33 = vsub.f32 %v5410_v4, %v5501_v37 }
 0x1bb   :  { %v401_v40 = vmul.f32 %v4844_v29, %v400_v38  ;;  %v346_v41 = vpop.xlane.xlu1 %345  ;;  %v274_v42 = vmul.f32 0.5, %v273_v36 }
 0x1bc   :  { %v368_v43 = vmul.f32 %v5507_v39, %v5507_v39  ;;  %v362_v44 = vmul.f32 0.015625, %v346_v41 }
 0x1bd   :  { %v402_v45 = vmul.f32 0.5, %v401_v40  ;;  %v275_v47 = vsub.f32 1.5, %v274_v42 }
 0x1be   :  { %v4846_v46 = vpop.eup %4845  ;;  %v374_v20 = vsub.f32 %v362_v44, %v368_v43 }
 0x1bf   :  { %v403_v48 = vsub.f32 1.5, %v402_v45  ;;  %v390_v49 = vmul.f32 %v4846_v46, %v383_v25  ;;  %v276_v51 = vmul.f32 %v4842_v26, %v275_v47  ;;  %vm396_vm9 = vweird.f32 %v4846_v46 }
 0x1c0   :  { %v386_v52 = vadd.f32 1e-05, %v374_v20  ;;  %v4848_v55 = vpop.eup %4847  ;;  %vm397_vm11 = vmor %vm395_vm10, %vm396_vm9  ;;  %vm595_vm10 = vcmask 130048  }
 0x1c1   :  { %v404_v56 = vmul.f32 %v4844_v29, %v403_v48  ;;  %v391_v57 = vmul.f32 %v4846_v46, %v390_v49  ;;  %v280_v59 = vsel %vm279_vm6, %v4842_v26, %v276_v51  ;;  %v410_v18 = vmul.f32 %v4848_v55, %v5505_v32  ;;  %v325_v44 = vpop.xlane.xlu2 %324 }
 0x1c2   :  { %4849 = vrsqrt.f32 %v386_v52  ;;  %v286_v1 = vmul.f32 %v280_v59, %v214_v58  ;;  %vm416_vm12 = vweird.f32 %v4848_v55  ;;  %vm425_vm2 = vweird.f32 %v386_v52 }
 0x1c3   :  { %v408_v60 = vsel %vm407_vm8, %v4844_v29, %v404_v56  ;;  %v392_v61 = vmul.f32 0.5, %v391_v57  ;;  %v411_v0 = vmul.f32 %v4848_v55, %v410_v18  ;;  %vm417_vm15 = vmor %vm415_vm14, %vm416_vm12  ;;  %v380_v29 = vsub.f32 %v5422_v21, %v5507_v39 }
 0x1c4   :  { %v450_v2 = vmul.f32 %v408_v60, %v378_v62  ;;  %v295_v3 = vmul.f32 %v5372_v19, %v286_v1  ;;  %v357_v45 = vmul.f32 0.015625, %v325_v44  ;;  %vm1048_vm14 = vcmask 261120  }
 0x1c5   :  { %v393_v63 = vsub.f32 1.5, %v392_v61  ;;  %v412_v5 = vmul.f32 0.5, %v411_v0 }
 0x1c6   :  { %v5526_v54 = vadd.f32 %v5379_v14, %v295_v3  ;;  %v459_v13 = vmul.f32 %v5521_v34, %v450_v2  ;;  %v369_v47 = vmul.f32 %v357_v45, %v357_v45 }
 0x1c7   :  { %v394_v50 = vmul.f32 %v4846_v46, %v393_v63  ;;  %v413_v27 = vsub.f32 1.5, %v412_v5 }
 0x1c8   :  { %v4850_v6 = vpop.eup %4849  ;;  %v326_v19 = vsel %vm142_vm1, %v5526_v54, 0.0  ;;  %v334_v11 = vmul.f32 %v5526_v54, %v5526_v54  ;;  %v468_v23 = vadd.f32 %v5536_v15, %v459_v13 }
 0x1c9   :  { %v398_v8 = vsel %vm397_vm11, %v4846_v46, %v394_v50  ;;  %v420_v9 = vmul.f32 %v4850_v6, %v386_v52  ;;  %327 = vadd.xlane.f32.xlu0 %v326_v19  ;;  %v414_v24 = vmul.f32 %v4848_v55, %v413_v27  ;;  %vm426_vm13 = vweird.f32 %v4850_v6  ;;  %v349_v46 = vpop.xlane.xlu1 %348  ;;  %v484_v50 = vld [vmem:[%s7199_s8] sm:$0x3] }
 0x1ca   :  { %v449_v10 = vmul.f32 %v398_v8, %v377_v7  ;;  %v350_v14 = vsel %vm142_vm1, %v334_v11, 0.0  ;;  %vm427_vm3 = vmor %vm425_vm2, %vm426_vm13  ;;  %v363_v37 = vmul.f32 0.015625, %v349_v46  ;;  %v381_v7 = vsub.f32 %v5433_v31, %v357_v45 }
 0x1cb   :  { %v421_v16 = vmul.f32 %v4850_v6, %v420_v9  ;;  %351 = vadd.xlane.f32.xlu2 %v350_v14  ;;  %v418_v30 = vsel %vm417_vm15, %v4848_v55, %v414_v24  ;;  %v5559_v9 = vperm.slane %v484_v50, 0  ;;  %vm670_vm11 = vcmask 1043456  }
 0x1cc   :  { %v458_v17 = vmul.f32 %v5521_v34, %v449_v10  ;;  %v451_v40 = vmul.f32 %v418_v30, %v379_v33  ;;  %v375_v20 = vsub.f32 %v363_v37, %v369_v47  ;;  %v5601_v33 = vperm.slane %v484_v50, 1 }
 0x1cd   :  { %v422_v12 = vmul.f32 0.5, %v421_v16  ;;  %vm626_vm13 = vcmask 195584  }
 0x1ce   :  { %v467_v22 = vadd.f32 %v5536_v15, %v458_v17  ;;  %v460_v41 = vmul.f32 %v5521_v34, %v451_v40  ;;  %v387_v48 = vadd.f32 1e-05, %v375_v20 }
 0x1cf   :  { %v423_v25 = vsub.f32 1.5, %v422_v12 }
 0x1d0   :  { %v473_v26 = vpack.c.bf16 %v468_v23, %v467_v22  ;;  %v469_v39 = vadd.f32 %v5536_v15, %v460_v41  ;;  %4851 = vrsqrt.f32 %v387_v48  ;;  %vm435_vm5 = vweird.f32 %v387_v48 }
 0x1d1   :  { %v424_v28 = vmul.f32 %v4850_v6, %v423_v25 }
 0x1d2   :  { %4203 = vmatmul.msk.bf16.vlgmr.msrb.gmra.mxu1 %vm142_vm1, %v473_v26  ;;  %4206 = vmatmul.msk.bf16.vlgmr.msra.gmra.mxu2 %vm142_vm1, %v473_v26 }
 0x1d3   :  { %v428_v38 = vsel %vm427_vm3, %v4850_v6, %v424_v28 }
 0x1d4   :  { %v452_v36 = vmul.f32 %v428_v38, %v380_v29 }
 0x1d6   :  { %v461_v32 = vmul.f32 %v5521_v34, %v452_v36  ;;  %v4852_v49 = vpop.eup %4851 }
 0x1d7   :  { %v430_v51 = vmul.f32 %v4852_v49, %v387_v48  ;;  %vm436_vm4 = vweird.f32 %v4852_v49 }
 0x1d8   :  { %v470_v42 = vadd.f32 %v5536_v15, %v461_v32  ;;  %vm437_vm6 = vmor %vm435_vm5, %vm436_vm4 }
 0x1d9   :  { %v431_v59 = vmul.f32 %v4852_v49, %v430_v51 }
 0x1da   :  { %v474_v43 = vpack.c.bf16 %v470_v42, %v469_v39 }
 0x1db   :  { %v432_v61 = vmul.f32 0.5, %v431_v59 }
 0x1dd   :  { %v433_v62 = vsub.f32 1.5, %v432_v61 }
 0x1df   :  { %v434_v1 = vmul.f32 %v4852_v49, %v433_v62 }
 0x1e1   :  { %v438_v6 = vsel %vm437_vm6, %v4852_v49, %v434_v1 }
 0x1e2   :  { %4204 = vmatmul.msk.bf16.gmra.mxu1 %vm142_vm1, %v474_v43  ;;  %4207 = vmatmul.msk.bf16.gmra.mxu2 %vm142_vm1, %v474_v43  ;;  %v453_v10 = vmul.f32 %v438_v6, %v381_v7 }
 0x1e4   :  { %v462_v12 = vmul.f32 %v5521_v34, %v453_v10 }
 0x1e6   :  { %v471_v24 = vadd.f32 %v5536_v15, %v462_v12 }
 0x23c   :  { %v328_v52 = vpop.xlane.xlu0 %327 }
 0x23d   :  { %v358_v55 = vmul.f32 0.015625, %v328_v52 }
 0x23e   :  { %v352_v56 = vpop.xlane.xlu2 %351 }
 0x23f   :  { %v370_v57 = vmul.f32 %v358_v55, %v358_v55  ;;  %v364_v58 = vmul.f32 0.015625, %v352_v56  ;;  %v382_v11 = vsub.f32 %v5526_v54, %v358_v55 }
 0x241   :  { %v376_v18 = vsub.f32 %v364_v58, %v370_v57 }
 0x243   :  { %v388_v60 = vadd.f32 1e-05, %v376_v18 }
 0x245   :  { %4853 = vrsqrt.f32 %v388_v60  ;;  %vm445_vm8 = vweird.f32 %v388_v60 }
 0x24b   :  { %v4854_v0 = vpop.eup %4853 }
 0x24c   :  { %v440_v63 = vmul.f32 %v4854_v0, %v388_v60  ;;  %vm446_vm7 = vweird.f32 %v4854_v0 }
 0x24d   :  { %vm447_vm9 = vmor %vm445_vm8, %vm446_vm7 }
 0x24e   :  { %v441_v3 = vmul.f32 %v4854_v0, %v440_v63 }
 0x24f   :  { %v548_v2 = vpop.f32.mrf.mxu1 }
 0x250   :  { %v442_v5 = vmul.f32 0.5, %v441_v3  ;;  %v549_v27 = vadd.f32 %v548_v2, %v5559_v9 }
 0x252   :  { %v443_v8 = vsub.f32 1.5, %v442_v5 }
 0x254   :  { %v444_v19 = vmul.f32 %v4854_v0, %v443_v8 }
 0x256   :  { %v448_v14 = vsel %vm447_vm9, %v4854_v0, %v444_v19 }
 0x257   :  { %v550_v13 = vpop.f32.mrf.mxu1  ;;  %v454_v17 = vmul.f32 %v448_v14, %v382_v11 }
 0x258   :  { %v551_v16 = vadd.f32 %v550_v13, %v5559_v9 }
 0x259   :  { %v463_v23 = vmul.f32 %v5521_v34, %v454_v17  ;;  %v572_v34 = vpop.f32.mrf.mxu2 }
 0x25a   :  { %v5565_v22 = vpack.c.bf16 %v551_v16, %v549_v27  ;;  %v573_v60 = vadd.f32 %v572_v34, %v5601_v33 }
 0x25b   :  { %v472_v25 = vadd.f32 %v5536_v15, %v463_v23 }
 0x25c   :  { %591 = vrot.lane.b32.xlu1 %v5565_v22, %s5159_s23 }
 0x25d   :  { %v475_v28 = vpack.c.bf16 %v472_v25, %v471_v24  ;;  %v305_v24 = vlaneseq }
 0x25f   :  { %v553_v26 = vpop.f32.mrf.mxu1  ;;  %4205 = vmatmul.msk.bf16.gmra.mxu1 %vm142_vm1, %v475_v28  ;;  %4208 = vmatmul.msk.bf16.gmra.mxu2 %vm142_vm1, %v475_v28 }
 0x260   :  { %v554_v29 = vadd.f32 %v553_v26, %v5559_v9  ;;  %v306_v26 = vand.u32 127, %v305_v24 }
 0x261   :  { %v574_v15 = vpop.f32.mrf.mxu2 }
 0x262   :  { %v5575_v30 = vpack.c.bf16 %v554_v29, %v554_v29  ;;  %v575_v56 = vadd.f32 %v574_v15, %v5601_v33  ;;  %vm307_vm12 = vcmp.lt.s32.totalorder %v306_v26, 17 }
 0x264   :  { %805 = vrot.lane.b32.xlu1 %v5575_v30, %s5160_s24  ;;  %698 = vrot.lane.b32.xlu2 %v5575_v30, %s5161_s2  ;;  %v5628_v61 = vpack.c.bf16 %v575_v56, %v573_v60 }
 0x265   :  { %593 = vrot.lane.b32.xlu0 %v5575_v30, %s5159_s23 }
 0x267   :  { %v555_v43 = vpop.f32.mrf.mxu1 }
 0x268   :  { %v556_v49 = vadd.f32 %v555_v43, %v5559_v9 }
 0x269   :  { %v577_v38 = vpop.f32.mrf.mxu2 }
 0x26a   :  { %v578_v36 = vadd.f32 %v577_v38, %v5601_v33  ;;  %v5166_v38 = vmov -1e+30  }
 0x26c   :  { %910 = vrot.lane.b32.xlu1 %v5575_v30, %s7215_s25  ;;  %692 = vrot.lane.b32.xlu2 %v5565_v22, %s5163_s3  ;;  %v5606_v40 = vpack.c.bf16 %v578_v36, %v578_v36  ;;  %v5692_v36 = vsel %vm307_vm12, 0.0, %v5166_v38 }
 0x26d   :  { %696 = vrot.lane.b32.xlu0 %v5565_v22, %s5161_s2 }
 0x26e   :  { %v672_v18 = vsel %vm670_vm11, %v5606_v40, 0 }
 0x271   :  { %v5684_v23 = vpop.f32.mrf.mxu2 }
 0x274   :  { %904 = vrot.lane.b32.xlu1 %v5565_v22, %s7217_s26  ;;  %694 = vrot.lane.b32.xlu2 %v5575_v30, %s5163_s3 }
 0x275   :  { %803 = vrot.lane.b32.xlu0 %v5565_v22, %s5160_s24 }
 0x27c   :  { %908 = vrot.lane.b32.xlu2 %v5565_v22, %s7215_s25 }
 0x27d   :  { %799 = vrot.lane.b32.xlu0 %v5565_v22, %s5165_s27 }
 0x285   :  { %801 = vrot.lane.b32.xlu0 %v5575_v30, %s5165_s27 }
 0x28d   :  { %906 = vrot.lane.b32.xlu0 %v5575_v30, %s7217_s26 }
 0x295   :  { %769 = vrot.lane.b32.xlu0 %v5606_v40, %s5163_s3 }
 0x2be   :  { %v699_v32 = vpop.permute.xlu2 %698 }
 0x2bf   :  { %v710_v41 = vsel %vm595_vm10, %v699_v32, 0 }
 0x2c0   :  { %718 = vmatpush.bf16.xpose.msrb.mxu0 %v710_v41 }
 0x2c6   :  { %v693_v39 = vpop.permute.xlu2 %692 }
 0x2ce   :  { %v592_v42 = vpop.permute.xlu1 %591  ;;  %v695_v37 = vpop.permute.xlu2 %694 }
 0x2cf   :  { %v603_v57 = vsel %vm595_vm10, %v592_v42, 0 }
 0x2d6   :  { %v806_v44 = vpop.permute.xlu1 %805  ;;  %v909_v62 = vpop.permute.xlu2 %908 }
 0x2d7   :  { %v594_v45 = vpop.permute.xlu0 %593  ;;  %v817_v46 = vsel %vm595_vm10, %v806_v44, 0  ;;  %v919_v50 = vsel %vm595_vm10, %v909_v62, 0 }
 0x2d8   :  { %v606_v47 = vsel %vm595_vm10, %v594_v45, 0  ;;  %825 = vmatpush.bf16.xpose.msrb.mxu2 %v817_v46 }
 0x2d9   :  { %614 = vmatpush.bf16.xpose.msra.mxu3 %v606_v47 }
 0x2dc   :  { %v558_v20 = vpop.f32.mrf.mxu1 }
 0x2dd   :  { %v559_v51 = vadd.f32 %v558_v20, %v5559_v9 }
 0x2de   :  { %v911_v48 = vpop.permute.xlu1 %910 }
 0x2df   :  { %v922_v52 = vsel %vm595_vm10, %v911_v48, 0  ;;  %v697_v55 = vpop.permute.xlu0 %696  ;;  %v5619_v59 = vpack.c.bf16 %v559_v51, %v556_v49 }
 0x2e0   :  { %v707_v58 = vsel %vm595_vm10, %v697_v55, 0 }
 0x2e1   :  { %615 = vmatpush.bf16.xpose.msra.mxu3 %v603_v57  ;;  %719 = vmatpush.bf16.xpose.msrb.mxu0 %v707_v58 }
 0x2e2   :  { %1369 = vrot.lane.b32.xlu2 %v5619_v59, %s7217_s26  ;;  %1157 = vrot.lane.b32.xlu0 %v5619_v59, %s5163_s3  ;;  %v5690_v34 = vpop.f32.mrf.mxu2 }
 0x2e3   :  { %1059 = vrot.lane.b32.xlu1 %v5619_v59, %s5159_s23 }
 0x2e4   :  { %v560_v0 = vpop.f32.mrf.mxu1 }
 0x2e5   :  { %v561_v1 = vadd.f32 %v560_v0, %v5559_v9 }
 0x2e6   :  { %v905_v8 = vpop.permute.xlu1 %904 }
 0x2e7   :  { %v804_v63 = vpop.permute.xlu0 %803  ;;  %v5638_v3 = vpack.c.bf16 %v561_v1, %v561_v1 }
 0x2e8   :  { %4209 = vmatmul.msk.bf16.vlgmr.msra.gmra.mxu3 %vm595_vm10, %v5565_v22  ;;  %4213 = vmatmul.msk.bf16.vlgmr.msrb.gmra.mxu0 %vm595_vm10, %v693_v39  ;;  %v814_v2 = vsel %vm595_vm10, %v804_v63, 0 }
 0x2e9   :  { %680 = vmatpush.bf16.msrb.mxu3 %v672_v18  ;;  %930 = vmatpush.bf16.xpose.msra.mxu0 %v922_v52 }
 0x2ea   :  { %826 = vmatpush.bf16.xpose.msrb.mxu2 %v814_v2  ;;  %1061 = vrot.lane.b32.xlu2 %v5638_v3, %s5159_s23  ;;  %v5701_v44 = vpop.f32.mrf.mxu2 }
 0x2eb   :  { %1373 = vrot.lane.b32.xlu0 %v5619_v59, %s7215_s25  ;;  %1161 = vrot.lane.b32.xlu1 %v5619_v59, %s5161_s2 }
 0x2ed   :  { %681 = vmatpush.bf16.msrb.mxu3 %v5628_v61 }
 0x2ef   :  { %v800_v5 = vpop.permute.xlu0 %799 }
 0x2f1   :  { %931 = vmatpush.bf16.xpose.msra.mxu0 %v919_v50  ;;  %4217 = vmatmul.msk.bf16.vlgmr.msrb.gmra.mxu2 %vm595_vm10, %v800_v5 }
 0x2f2   :  { %767 = vrot.lane.b32.xlu2 %v5628_v61, %s5163_s3 }
 0x2f3   :  { %872 = vrot.lane.b32.xlu0 %v5628_v61, %s5165_s27  ;;  %1268 = vrot.lane.b32.xlu1 %v5619_v59, %s5160_s24 }
 0x2f7   :  { %v802_v6 = vpop.permute.xlu0 %801 }
 0x2f8   :  { %4210 = vmatmul.msk.bf16.gmra.mxu3 %vm595_vm10, %v5575_v30  ;;  %4214 = vmatmul.msk.bf16.gmra.mxu0 %vm595_vm10, %v695_v37 }
 0x2fa   :  { %1163 = vrot.lane.b32.xlu2 %v5638_v3, %s5161_s2 }
 0x2fb   :  { %1159 = vrot.lane.b32.xlu0 %v5638_v3, %s5163_s3  ;;  %1264 = vrot.lane.b32.xlu1 %v5619_v59, %s5165_s27 }
 0x2ff   :  { %v907_v7 = vpop.permute.xlu0 %906 }
 0x301   :  { %4218 = vmatmul.msk.bf16.gmra.mxu2 %vm595_vm10, %v802_v6 }
 0x302   :  { %979 = vrot.lane.b32.xlu2 %v5606_v40, %s7217_s26 }
 0x303   :  { %1266 = vrot.lane.b32.xlu0 %v5638_v3, %s5165_s27  ;;  %874 = vrot.lane.b32.xlu1 %v5606_v40, %s5165_s27 }
 0x307   :  { %v770_v9 = vpop.permute.xlu0 %769 }
 0x308   :  { %v779_v10 = vsel %vm670_vm11, %v770_v9, 0  ;;  %4221 = vmatmul.msk.bf16.vlgmr.msra.gmra.mxu0 %vm595_vm10, %v905_v8 }
 0x309   :  { %787 = vmatpush.bf16.msra.mxu1 %v779_v10 }
 0x30a   :  { %1270 = vrot.lane.b32.xlu2 %v5638_v3, %s5160_s24 }
 0x30b   :  { %1371 = vrot.lane.b32.xlu1 %v5638_v3, %s7217_s26 }
 0x312   :  { %1375 = vrot.lane.b32.xlu2 %v5638_v3, %s7215_s25 }
 0x318   :  { %4222 = vmatmul.msk.bf16.gmra.mxu0 %vm595_vm10, %v907_v7 }
 0x33c   :  { %v5679_v19 = vpop.permute.xlu2 %1369 }
 0x344   :  { %v1062_v11 = vpop.permute.xlu2 %1061 }
 0x345   :  { %v1073_v13 = vsel %vm595_vm10, %v1062_v11, 0 }
 0x346   :  { %1081 = vmatpush.bf16.xpose.msra.mxu2 %v1073_v13 }
 0x34c   :  { %v768_v27 = vpop.permute.xlu2 %767 }
 0x34d   :  { %788 = vmatpush.bf16.msra.mxu1 %v768_v27 }
 0x354   :  { %v1164_v16 = vpop.permute.xlu2 %1163  ;;  %v1158_v12 = vpop.permute.xlu0 %1157 }
 0x355   :  { %v1175_v14 = vsel %vm595_vm10, %v1164_v16, 0  ;;  %v1060_v17 = vpop.permute.xlu1 %1059 }
 0x356   :  { %v1070_v22 = vsel %vm595_vm10, %v1060_v17, 0  ;;  %1183 = vmatpush.bf16.xpose.msrb.mxu0 %v1175_v14 }
 0x357   :  { %1082 = vmatpush.bf16.xpose.msra.mxu2 %v1070_v22 }
 0x35c   :  { %v980_v25 = vpop.permute.xlu2 %979 }
 0x35d   :  { %v989_v28 = vsel %vm670_vm11, %v980_v25, 0  ;;  %v1162_v29 = vpop.permute.xlu1 %1161  ;;  %v1374_v15 = vpop.permute.xlu0 %1373 }
 0x35e   :  { %4225 = vmatmul.msk.bf16.vlgmr.msra.gmra.mxu2 %vm595_vm10, %v5619_v59  ;;  %997 = vmatpush.bf16.msrb.mxu1 %v989_v28  ;;  %v1172_v30 = vsel %vm595_vm10, %v1162_v29, 0  ;;  %v1384_v2 = vsel %vm595_vm10, %v1374_v15, 0 }
 0x35f   :  { %1184 = vmatpush.bf16.xpose.msrb.mxu0 %v1172_v30 }
 0x364   :  { %v1271_v40 = vpop.permute.xlu2 %1270 }
 0x365   :  { %v1282_v32 = vsel %vm595_vm10, %v1271_v40, 0  ;;  %v1269_v41 = vpop.permute.xlu1 %1268  ;;  %v721_v42 = vpop.f32.mrf.mxu0 }
 0x366   :  { %v5696_v39 = vadd.f32 %v721_v42, %v5692_v36  ;;  %4229 = vmatmul.msk.bf16.vlgmr.msrb.gmra.mxu0 %vm595_vm10, %v1158_v12  ;;  %1290 = vmatpush.bf16.xpose.msrb.mxu2 %v1282_v32  ;;  %v873_v45 = vpop.permute.xlu0 %872  ;;  %v1279_v52 = vsel %vm595_vm10, %v1269_v41, 0 }
 0x368   :  { %v730_v43 = vsel %vm626_vm13, %v5696_v39, -inf }
 0x369   :  { %731 = vmax.xlane.f32.xlu2 %v730_v43 }
 0x36b   :  { %v617_v46 = vpop.f32.mrf.mxu3 }
 0x36c   :  { %v5704_v47 = vadd.f32 %v617_v46, %v5692_v36  ;;  %v1376_v37 = vpop.permute.xlu2 %1375 }
 0x36d   :  { %v1387_v20 = vsel %vm595_vm10, %v1376_v37, 0  ;;  %v1265_v48 = vpop.permute.xlu1 %1264  ;;  %v723_v49 = vpop.f32.mrf.mxu0 }
 0x36e   :  { %v627_v51 = vsel %vm626_vm13, %v5704_v47, -inf  ;;  %4226 = vmatmul.msk.bf16.gmra.mxu2 %vm595_vm10, %v5638_v3  ;;  %1395 = vmatpush.bf16.xpose.msra.mxu0 %v1387_v20  ;;  %v5713_v57 = vadd.f32 %v723_v49, %v5692_v36  ;;  %v1160_v18 = vpop.permute.xlu0 %1159 }
 0x36f   :  { %1291 = vmatpush.bf16.xpose.msrb.mxu2 %v1279_v52  ;;  %628 = vmax.xlane.f32.xlu1 %v627_v51 }
 0x370   :  { %v733_v3 = vsel %vm626_vm13, %v5713_v57, -inf }
 0x373   :  { %v619_v55 = vpop.f32.mrf.mxu3 }
 0x374   :  { %v828_v56 = vpop.f32.mrf.mxu2  ;;  %v5716_v58 = vadd.f32 %v619_v55, %v5692_v36 }
 0x375   :  { %v5719_v59 = vadd.f32 %v828_v56, %v5692_v36  ;;  %v875_v60 = vpop.permute.xlu1 %874  ;;  %v726_v62 = vpop.f32.mrf.mxu0 }
 0x376   :  { %v630_v0 = vsel %vm626_vm13, %v5716_v58, -inf  ;;  %v884_v63 = vsel %vm670_vm11, %v875_v60, 0  ;;  %4230 = vmatmul.msk.bf16.gmra.mxu0 %vm595_vm10, %v1160_v18  ;;  %v5731_v6 = vadd.f32 %v726_v62, %v5692_v36  ;;  %v1267_v22 = vpop.permute.xlu0 %1266 }
 0x377   :  { %v837_v1 = vsel %vm626_vm13, %v5719_v59, -inf  ;;  %631 = vmax.xlane.f32.xlu0 %v630_v0  ;;  %892 = vmatpush.bf16.msra.mxu3 %v884_v63 }
 0x378   :  { %1396 = vmatpush.bf16.xpose.msra.mxu0 %v1384_v2  ;;  %734 = vmax.xlane.f32.xlu1 %v733_v3  ;;  %v736_v10 = vsel %vm626_vm13, %v5731_v6, -inf }
 0x379   :  { %838 = vmax.xlane.f32.xlu2 %v837_v1 }
 0x37b   :  { %v622_v50 = vpop.f32.mrf.mxu3  ;;  %893 = vmatpush.bf16.msra.mxu3 %v873_v45 }
 0x37c   :  { %v830_v5 = vpop.f32.mrf.mxu2  ;;  %v5742_v27 = vadd.f32 %v622_v50, %v5692_v36 }
 0x37d   :  { %v5734_v7 = vadd.f32 %v830_v5, %v5692_v36  ;;  %v728_v8 = vpop.f32.mrf.mxu0 }
 0x37e   :  { %4233 = vmatmul.msk.bf16.vlgmr.msrb.gmra.mxu2 %vm595_vm10, %v1265_v48  ;;  %v633_v14 = vsel %vm626_vm13, %v5742_v27, -inf }
 0x37f   :  { %v840_v9 = vsel %vm626_vm13, %v5734_v7, -inf }
 0x380   :  { %841 = vmax.xlane.f32.xlu0 %v840_v9 }
 0x381   :  { %737 = vmax.xlane.f32.xlu2 %v736_v10 }
 0x383   :  { %v624_v11 = vpop.f32.mrf.mxu3 }
 0x384   :  { %v833_v13 = vpop.f32.mrf.mxu2 }
 0x385   :  { %v933_v16 = vpop.f32.mrf.mxu0  ;;  %v5749_v12 = vadd.f32 %v833_v13, %v5692_v36 }
 0x386   :  { %4237 = vmatmul.msk.bf16.vlgmr.msra.gmra.mxu0 %vm595_vm10, %v5679_v19  ;;  %v5755_v26 = vadd.f32 %v933_v16, %v5692_v36  ;;  %v1372_v19 = vpop.permute.xlu1 %1371 }
 0x387   :  { %v843_v25 = vsel %vm626_vm13, %v5749_v12, -inf }
 0x388   :  { %v942_v29 = vsel %vm626_vm13, %v5755_v26, -inf }
 0x389   :  { %634 = vmax.xlane.f32.xlu2 %v633_v14 }
 0x38c   :  { %v835_v17 = vpop.f32.mrf.mxu2 }
 0x38d   :  { %v935_v24 = vpop.f32.mrf.mxu0 }
 0x38e   :  { %4234 = vmatmul.msk.bf16.gmra.mxu2 %vm595_vm10, %v1267_v22  ;;  %v5766_v41 = vadd.f32 %v935_v24, %v5692_v36 }
 0x390   :  { %v945_v48 = vsel %vm626_vm13, %v5766_v41, -inf }
 0x391   :  { %844 = vmax.xlane.f32.xlu2 %v843_v25 }
 0x395   :  { %v938_v28 = vpop.f32.mrf.mxu0 }
 0x396   :  { %4238 = vmatmul.msk.bf16.gmra.mxu0 %vm595_vm10, %v1372_v19  ;;  %v5782_v56 = vadd.f32 %v938_v28, %v5692_v36 }
 0x398   :  { %v948_v63 = vsel %vm626_vm13, %v5782_v56, -inf }
 0x399   :  { %943 = vmax.xlane.f32.xlu2 %v942_v29 }
 0x39d   :  { %v940_v30 = vpop.f32.mrf.mxu0 }
 0x3dc   :  { %v732_v42 = vpop.xlane.xlu2 %731 }
 0x3dd   :  { %v739_v24 = vsub.f32 %v5696_v39, %v732_v42 }
 0x3e1   :  { %v1084_v15 = vpop.f32.mrf.mxu2 }
 0x3e2   :  { %v5761_v38 = vadd.f32 %v1084_v15, %v5692_v36  ;;  %v629_v43 = vpop.xlane.xlu1 %628  ;;  %v742_v15 = vmul.f32 1.442695, %v739_v24 }
 0x3e3   :  { %v1186_v40 = vpop.f32.mrf.mxu0  ;;  %v636_v37 = vsub.f32 %v5704_v47, %v629_v43 }
 0x3e4   :  { %v1093_v32 = vsel %vm626_vm13, %v5761_v38, -inf  ;;  %v5793_v50 = vadd.f32 %v1186_v40, %v5692_v36 }
 0x3e5   :  { %1094 = vmax.xlane.f32.xlu1 %v1093_v32  ;;  %v639_v52 = vmul.f32 1.442695, %v636_v37 }
 0x3e6   :  { %v1195_v13 = vsel %vm626_vm13, %v5793_v50, -inf }
 0x3e7   :  { %4855 = vpow2.f32 %v639_v52 }
 0x3e9   :  { %v1086_v45 = vpop.f32.mrf.mxu2 }
 0x3ea   :  { %v5769_v46 = vadd.f32 %v1086_v45, %v5692_v36  ;;  %v632_v3 = vpop.xlane.xlu0 %631 }
 0x3eb   :  { %v1188_v20 = vpop.f32.mrf.mxu0  ;;  %v735_v5 = vpop.xlane.xlu1 %734 }
 0x3ec   :  { %v1096_v49 = vsel %vm626_vm13, %v5769_v46, -inf  ;;  %v5777_v51 = vadd.f32 %v1188_v20, %v5692_v36  ;;  %v839_v47 = vpop.xlane.xlu2 %838 }
 0x3ed   :  { %946 = vmax.xlane.f32.xlu1 %v945_v48  ;;  %1097 = vmax.xlane.f32.xlu2 %v1096_v49  ;;  %v846_v62 = vsub.f32 %v5719_v59, %v839_v47  ;;  %v5795_v8 = vpop.eup %4855  ;;  %v740_v59 = vsub.f32 %v5713_v57, %v735_v5  ;;  %v637_v57 = vsub.f32 %v5716_v58, %v632_v3 }
 0x3ee   :  { %v1198_v55 = vsel %vm626_vm13, %v5777_v51, -inf  ;;  %v645_v11 = vsel %vm626_vm13, %v5795_v8, 0.0 }
 0x3ef   :  { %1199 = vmax.xlane.f32.xlu0 %v1198_v55  ;;  %v849_v2 = vmul.f32 1.442695, %v846_v62  ;;  %v744_v16 = vmul.f32 1.442695, %v740_v59  ;;  %v641_v40 = vmul.f32 1.442695, %v637_v57  ;;  %v585_v57 = vadd.f32 %v5701_v44, %v5601_v33 }
 0x3f1   :  { %v1089_v18 = vpop.f32.mrf.mxu2  ;;  %4857 = vpow2.f32 %v849_v2 }
 0x3f2   :  { %v5785_v60 = vadd.f32 %v1089_v18, %v5692_v36  ;;  %4859 = vpow2.f32 %v744_v16 }
 0x3f3   :  { %v1191_v0 = vpop.f32.mrf.mxu0  ;;  %v842_v17 = vpop.xlane.xlu0 %841  ;;  %4861 = vpow2.f32 %v742_v15 }
 0x3f4   :  { %v1099_v1 = vsel %vm626_vm13, %v5785_v60, -inf  ;;  %v847_v19 = vsub.f32 %v5734_v7, %v842_v17  ;;  %v738_v39 = vpop.xlane.xlu2 %737  ;;  %v5817_v43 = vadd.f32 %v1191_v0, %v5692_v36  ;;  %4863 = vpow2.f32 %v641_v40 }
 0x3f5   :  { %1100 = vmax.xlane.f32.xlu1 %v1099_v1  ;;  %949 = vmax.xlane.f32.xlu2 %v948_v63  ;;  %v741_v45 = vsub.f32 %v5731_v6, %v738_v39 }
 0x3f6   :  { %v851_v32 = vmul.f32 1.442695, %v847_v19  ;;  %v1201_v49 = vsel %vm626_vm13, %v5817_v43, -inf  ;;  %v583_v19 = vadd.f32 %v5690_v34, %v5601_v33 }
 0x3f7   :  { %v5802_v14 = vpop.eup %4857  ;;  %v746_v55 = vmul.f32 1.442695, %v741_v45 }
 0x3f8   :  { %v855_v29 = vsel %vm626_vm13, %v5802_v14, 0.0  ;;  %v5814_v42 = vpop.eup %4859  ;;  %4865 = vpow2.f32 %v851_v32 }
 0x3f9   :  { %v1091_v9 = vpop.f32.mrf.mxu2  ;;  %v751_v20 = vsel %vm626_vm13, %v5814_v42, 0.0  ;;  %v5829_v52 = vpop.eup %4861  ;;  %4867 = vpow2.f32 %v746_v55 }
 0x3fa   :  { %v5831_v47 = vpop.eup %4863  ;;  %v748_v63 = vsel %vm626_vm13, %v5829_v52, 0.0 }
 0x3fb   :  { %v1193_v10 = vpop.f32.mrf.mxu0  ;;  %v648_v2 = vsel %vm626_vm13, %v5831_v47, 0.0 }
 0x3fc   :  { %v635_v6 = vpop.xlane.xlu2 %634 }
 0x3fd   :  { %646 = vadd.xlane.f32.xlu2 %v645_v11  ;;  %1196 = vmax.xlane.f32.xlu1 %v1195_v13  ;;  %v638_v0 = vsub.f32 %v5742_v27, %v635_v6 }
 0x3fe   :  { %v5835_v62 = vpop.eup %4865 }
 0x3ff   :  { %v858_v3 = vsel %vm626_vm13, %v5835_v62, 0.0  ;;  %v643_v5 = vmul.f32 1.442695, %v638_v0  ;;  %v5852_v10 = vpop.eup %4867 }
 0x400   :  { %v754_v17 = vsel %vm626_vm13, %v5852_v10, 0.0 }
 0x401   :  { %v1293_v22 = vpop.f32.mrf.mxu2  ;;  %4869 = vpow2.f32 %v643_v5 }
 0x402   :  { %v5806_v25 = vadd.f32 %v1293_v22, %v5692_v36 }
 0x403   :  { %v1398_v28 = vpop.f32.mrf.mxu0 }
 0x404   :  { %v1302_v30 = vsel %vm626_vm13, %v5806_v25, -inf  ;;  %v5847_v9 = vadd.f32 %v1398_v28, %v5692_v36  ;;  %v5868_v28 = vpack.c.bf16 %v585_v57, %v585_v57  ;;  %v845_v15 = vpop.xlane.xlu2 %844 }
 0x405   :  { %856 = vadd.xlane.f32.xlu2 %v855_v29  ;;  %1303 = vmax.xlane.f32.xlu1 %v1302_v30  ;;  %v580_v29 = vadd.f32 %v5684_v23, %v5601_v33  ;;  %v848_v40 = vsub.f32 %v5749_v12, %v845_v15 }
 0x406   :  { %v1407_v13 = vsel %vm626_vm13, %v5847_v9, -inf }
 0x407   :  { %v5860_v22 = vpop.eup %4869  ;;  %v5874_v30 = vpack.c.bf16 %v583_v19, %v580_v29  ;;  %v853_v32 = vmul.f32 1.442695, %v848_v40 }
 0x408   :  { %v651_v24 = vsel %vm626_vm13, %v5860_v22, 0.0 }
 0x409   :  { %v1295_v58 = vpop.f32.mrf.mxu2 }
 0x40a   :  { %v5820_v7 = vadd.f32 %v1295_v58, %v5692_v36 }
 0x40b   :  { %v1400_v37 = vpop.f32.mrf.mxu0 }
 0x40c   :  { %v1305_v48 = vsel %vm626_vm13, %v5820_v7, -inf  ;;  %v5850_v27 = vadd.f32 %v1400_v37, %v5692_v36  ;;  %v944_v44 = vpop.xlane.xlu2 %943 }
 0x40d   :  { %752 = vadd.xlane.f32.xlu2 %v751_v20  ;;  %1306 = vmax.xlane.f32.xlu0 %v1305_v48  ;;  %v951_v34 = vsub.f32 %v5755_v26, %v944_v44 }
 0x40e   :  { %1202 = vmax.xlane.f32.xlu1 %v1201_v49  ;;  %v1410_v16 = vsel %vm626_vm13, %v5850_v27, -inf }
 0x40f   :  { %v954_v39 = vmul.f32 1.442695, %v951_v34 }
 0x411   :  { %v5833_v18 = vpop.f32.mrf.mxu2  ;;  %4871 = vpow2.f32 %v954_v39 }
 0x412   :  { %4873 = vpow2.f32 %v853_v32 }
 0x413   :  { %v5838_v1 = vpop.f32.mrf.mxu0 }
 0x415   :  { %749 = vadd.xlane.f32.xlu0 %v748_v63  ;;  %649 = vadd.xlane.f32.xlu2 %v648_v2 }
 0x416   :  { %859 = vadd.xlane.f32.xlu1 %v858_v3 }
 0x417   :  { %v5882_v33 = vpop.eup %4871 }
 0x418   :  { %v5885_v45 = vpop.eup %4873  ;;  %v960_v37 = vsel %vm626_vm13, %v5882_v33, 0.0 }
 0x419   :  { %v1300_v59 = vpop.f32.mrf.mxu2  ;;  %v861_v26 = vsel %vm626_vm13, %v5885_v45, 0.0 }
 0x41b   :  { %v1405_v11 = vpop.f32.mrf.mxu0 }
 0x41d   :  { %1408 = vmax.xlane.f32.xlu0 %v1407_v13  ;;  %1411 = vmax.xlane.f32.xlu2 %v1410_v16 }
 0x41e   :  { %755 = vadd.xlane.f32.xlu1 %v754_v17 }
 0x426   :  { %652 = vadd.xlane.f32.xlu1 %v651_v24 }
 0x431   :  { %1234 = vrot.lane.b32.xlu0 %v5868_v28, %s5163_s3 }
 0x435   :  { %1232 = vrot.lane.b32.xlu2 %v5874_v30, %s5163_s3 }
 0x43f   :  { %977 = vrot.lane.b32.xlu1 %v5628_v61, %s7217_s26 }
 0x458   :  { %v1095_v23 = vpop.xlane.xlu1 %1094 }
 0x459   :  { %v1102_v58 = vsub.f32 %v5761_v38, %v1095_v23 }
 0x45b   :  { %v1105_v61 = vmul.f32 1.442695, %v1102_v58  ;;  %961 = vadd.xlane.f32.xlu0 %v960_v37 }
 0x45d   :  { %4875 = vpow2.f32 %v1105_v61 }
 0x45e   :  { %862 = vadd.xlane.f32.xlu2 %v861_v26 }
 0x460   :  { %v947_v12 = vpop.xlane.xlu1 %946  ;;  %v1098_v20 = vpop.xlane.xlu2 %1097 }
 0x461   :  { %v952_v48 = vsub.f32 %v5766_v41, %v947_v12  ;;  %v1103_v49 = vsub.f32 %v5769_v46, %v1098_v20 }
 0x462   :  { %v1200_v3 = vpop.xlane.xlu0 %1199 }
 0x463   :  { %v956_v55 = vmul.f32 1.442695, %v952_v48  ;;  %v1107_v38 = vmul.f32 1.442695, %v1103_v49  ;;  %v5893_v6 = vpop.eup %4875  ;;  %v1205_v16 = vsub.f32 %v5777_v51, %v1200_v3 }
 0x464   :  { %v1111_v2 = vsel %vm626_vm13, %v5893_v6, 0.0 }
 0x465   :  { %4877 = vpow2.f32 %v956_v55 }
 0x466   :  { %4879 = vpow2.f32 %v1107_v38 }
 0x468   :  { %v1101_v0 = vpop.xlane.xlu1 %1100  ;;  %v950_v63 = vpop.xlane.xlu2 %949 }
 0x469   :  { %v1104_v5 = vsub.f32 %v5785_v60, %v1101_v0  ;;  %v953_v59 = vsub.f32 %v5782_v56, %v950_v63  ;;  %1112 = vadd.xlane.f32.xlu1 %v1111_v2  ;;  %v1209_v56 = vmul.f32 1.442695, %v1205_v16 }
 0x46b   :  { %v5899_v41 = vpop.eup %4877  ;;  %v1109_v46 = vmul.f32 1.442695, %v1104_v5  ;;  %v958_v11 = vmul.f32 1.442695, %v953_v59 }
 0x46c   :  { %v5901_v13 = vpop.eup %4879  ;;  %v963_v17 = vsel %vm626_vm13, %v5899_v41, 0.0 }
 0x46d   :  { %4881 = vpow2.f32 %v1109_v46  ;;  %964 = vadd.xlane.f32.xlu0 %v963_v17  ;;  %v1114_v24 = vsel %vm626_vm13, %v5901_v13, 0.0 }
 0x46e   :  { %4883 = vpow2.f32 %v958_v11  ;;  %1115 = vadd.xlane.f32.xlu2 %v1114_v24 }
 0x46f   :  { %4885 = vpow2.f32 %v1209_v56 }
 0x470   :  { %v647_v60 = vpop.xlane.xlu2 %646  ;;  %v1197_v57 = vpop.xlane.xlu1 %1196 }
 0x471   :  { %v1204_v19 = vsub.f32 %v5793_v50, %v1197_v57 }
 0x473   :  { %v5909_v29 = vpop.eup %4881  ;;  %v1207_v15 = vmul.f32 1.442695, %v1204_v19  ;;  %v1137_v19 = vsel %vm670_vm11, %v5868_v28, 0 }
 0x474   :  { %v5911_v44 = vpop.eup %4883  ;;  %v1117_v51 = vsel %vm626_vm13, %v5909_v29, 0.0 }
 0x475   :  { %4887 = vpow2.f32 %v1207_v15  ;;  %v966_v34 = vsel %vm626_vm13, %v5911_v44, 0.0  ;;  %v5919_v32 = vpop.eup %4885 }
 0x476   :  { %967 = vadd.xlane.f32.xlu0 %v966_v34  ;;  %1118 = vadd.xlane.f32.xlu2 %v1117_v51  ;;  %v1216_v58 = vsel %vm626_vm13, %v5919_v32, 0.0 }
 0x478   :  { %v5917_v40 = vpop.xlane.xlu2 %856  ;;  %v1304_v39 = vpop.xlane.xlu1 %1303 }
 0x47b   :  { %v5921_v50 = vpop.eup %4887 }
 0x47c   :  { %v1213_v23 = vsel %vm626_vm13, %v5921_v50, 0.0 }
 0x47e   :  { %1214 = vadd.xlane.f32.xlu0 %v1213_v23  ;;  %1217 = vadd.xlane.f32.xlu2 %v1216_v58 }
 0x480   :  { %v753_v37 = vpop.xlane.xlu2 %752  ;;  %v1307_v61 = vpop.xlane.xlu0 %1306 }
 0x481   :  { %v1203_v26 = vpop.xlane.xlu1 %1202  ;;  %v1312_v12 = vsub.f32 %v5820_v7, %v1307_v61 }
 0x482   :  { %v1206_v20 = vsub.f32 %v5817_v43, %v1203_v26  ;;  %1339 = vrot.lane.b32.xlu1 %v5868_v28, %s5165_s27 }
 0x483   :  { %v1316_v48 = vmul.f32 1.442695, %v1312_v12 }
 0x484   :  { %v1211_v49 = vmul.f32 1.442695, %v1206_v20 }
 0x485   :  { %4889 = vpow2.f32 %v1316_v48 }
 0x486   :  { %4891 = vpow2.f32 %v1211_v49 }
 0x487   :  { %4893 = vrcp.f32 %v647_v60 }
 0x488   :  { %4895 = vrcp.f32 %v753_v37  ;;  %v650_v55 = vpop.xlane.xlu2 %649  ;;  %v750_v38 = vpop.xlane.xlu0 %749 }
 0x489   :  { %4897 = vrcp.f32 %v650_v55  ;;  %v860_v0 = vpop.xlane.xlu1 %859 }
 0x48a   :  { %4899 = vrcp.f32 %v750_v38 }
 0x48b   :  { %v5931_v63 = vpop.eup %4889 }
 0x48c   :  { %v5933_v2 = vpop.eup %4891  ;;  %v1323_v43 = vsel %vm626_vm13, %v5931_v63, 0.0 }
 0x48d   :  { %v4894_v7 = vpop.eup %4893  ;;  %v1219_v3 = vsel %vm626_vm13, %v5933_v2, 0.0  ;;  %1324 = vadd.xlane.f32.xlu2 %v1323_v43 }
 0x48e   :  { %v4896_v5 = vpop.eup %4895  ;;  %1220 = vadd.xlane.f32.xlu0 %v1219_v3  ;;  %v657_v46 = vmul.f32 %v4894_v7, %v5795_v8 }
 0x48f   :  { %v4898_v59 = vpop.eup %4897  ;;  %v761_v24 = vmul.f32 %v4896_v5, %v5814_v42 }
 0x490   :  { %v658_v11 = vmul.f32 %v4898_v59, %v5831_v47  ;;  %v4900_v16 = vpop.eup %4899  ;;  %v1311_v47 = vsub.f32 %v5806_v25, %v1304_v39  ;;  %v1412_v39 = vpop.xlane.xlu2 %1411 }
 0x491   :  { %v756_v17 = vpop.xlane.xlu1 %755  ;;  %v760_v56 = vmul.f32 %v4900_v16, %v5829_v52  ;;  %v1409_v52 = vpop.xlane.xlu0 %1408 }
 0x492   :  { %v660_v60 = vpack.c.bf16 %v658_v11, %v657_v46  ;;  %4901 = vrcp.f32 %v756_v17  ;;  %v1314_v15 = vmul.f32 1.442695, %v1311_v47  ;;  %v1416_v58 = vsub.f32 %v5847_v9, %v1409_v52 }
 0x493   :  { %v763_v57 = vpack.c.bf16 %v761_v24, %v760_v56 }
 0x494   :  { %4211 = vmatmul.msk.bf16.vlgmr.msrb.gmra.mxu3 %vm626_vm13, %v660_v60  ;;  %v1419_v25 = vmul.f32 1.442695, %v1416_v58 }
 0x495   :  { %1145 = vmatpush.bf16.msrb.mxu3 %v1137_v19  ;;  %4215 = vmatmul.msk.bf16.vlgmr.msra.gmra.mxu1 %vm626_vm13, %v763_v57 }
 0x498   :  { %v4902_v42 = vpop.eup %4901 }
 0x499   :  { %1146 = vmatpush.bf16.msrb.mxu3 %v5874_v30  ;;  %v653_v8 = vpop.xlane.xlu1 %652  ;;  %v762_v34 = vmul.f32 %v4902_v42, %v5852_v10 }
 0x49a   :  { %4903 = vrcp.f32 %v653_v8 }
 0x49b   :  { %4905 = vpow2.f32 %v1314_v15  ;;  %v764_v61 = vpack.c.bf16 %v762_v34, %v762_v34 }
 0x49c   :  { %4907 = vrcp.f32 %v860_v0  ;;  %v1233_v0 = vpop.permute.xlu2 %1232 }
 0x49d   :  { %4909 = vrcp.f32 %v5917_v40 }
 0x49e   :  { %4911 = vpow2.f32 %v1419_v25 }
 0x4a0   :  { %v4904_v51 = vpop.eup %4903 }
 0x4a1   :  { %v659_v23 = vmul.f32 %v4904_v51, %v5860_v22  ;;  %v5958_v10 = vpop.eup %4905 }
 0x4a2   :  { %1337 = vrot.lane.b32.xlu0 %v5874_v30, %s5165_s27  ;;  %v1320_v9 = vsel %vm626_vm13, %v5958_v10, 0.0  ;;  %v4908_v22 = vpop.eup %4907 }
 0x4a3   :  { %v661_v37 = vpack.c.bf16 %v659_v23, %v659_v23  ;;  %v4910_v26 = vpop.eup %4909  ;;  %v868_v12 = vmul.f32 %v4908_v22, %v5835_v62  ;;  %v1235_v20 = vpop.permute.xlu0 %1234  ;;  %v1417_v62 = vsub.f32 %v5850_v27, %v1412_v39 }
 0x4a4   :  { %v867_v48 = vmul.f32 %v4910_v26, %v5802_v14  ;;  %v1244_v55 = vsel %vm670_vm11, %v1235_v20, 0  ;;  %v5976_v14 = vadd.f32 %v5838_v1, %v5692_v36  ;;  %v5999_v26 = vadd.f32 %v5833_v18, %v5692_v36 }
 0x4a5   :  { %4212 = vmatmul.msk.bf16.gmra.mxu3 %vm626_vm13, %v661_v37  ;;  %1444 = vrot.lane.b32.xlu2 %v5868_v28, %s7217_s26  ;;  %v5964_v28 = vpop.eup %4911  ;;  %v1421_v43 = vmul.f32 1.442695, %v1417_v62 }
 0x4a6   :  { %4216 = vmatmul.msk.bf16.gmra.mxu1 %vm626_vm13, %v764_v61  ;;  %v870_v40 = vpack.c.bf16 %v868_v12, %v867_v48  ;;  %v1425_v38 = vsel %vm626_vm13, %v5964_v28, 0.0  ;;  %v1413_v5 = vsel %vm626_vm13, %v5976_v14, -inf  ;;  %v1308_v48 = vsel %vm626_vm13, %v5999_v26, -inf }
 0x4a7   :  { %4913 = vpow2.f32 %v1421_v43 }
 0x4ac   :  { %1321 = vadd.xlane.f32.xlu1 %v1320_v9 }
 0x4ad   :  { %v5972_v7 = vpop.eup %4913 }
 0x4ae   :  { %v1428_v3 = vsel %vm626_vm13, %v5972_v7, 0.0 }
 0x4b1   :  { %v978_v49 = vpop.permute.xlu1 %977 }
 0x4b2   :  { %998 = vmatpush.bf16.msrb.mxu1 %v978_v49 }
 0x4b4   :  { %1426 = vadd.xlane.f32.xlu1 %v1425_v38 }
 0x4b5   :  { %4219 = vmatmul.msk.bf16.vlgmr.msra.gmra.mxu3 %vm626_vm13, %v870_v40 }
 0x4b6   :  { %1252 = vmatpush.bf16.msra.mxu1 %v1244_v55 }
 0x4ba   :  { %1253 = vmatpush.bf16.msra.mxu1 %v1233_v0 }
 0x4cc   :  { %1429 = vadd.xlane.f32.xlu0 %v1428_v3 }
 0x4ce   :  { %1414 = vmax.xlane.f32.xlu2 %v1413_v5  ;;  %v962_v27 = vpop.xlane.xlu0 %961 }
 0x4d1   :  { %v863_v59 = vpop.xlane.xlu2 %862 }
 0x4d2   :  { %4915 = vrcp.f32 %v863_v59 }
 0x4d3   :  { %4917 = vrcp.f32 %v962_v27 }
 0x4d8   :  { %v4916_v46 = vpop.eup %4915 }
 0x4d9   :  { %v869_v11 = vmul.f32 %v4916_v46, %v5885_v45  ;;  %v4918_v56 = vpop.eup %4917 }
 0x4da   :  { %v972_v8 = vmul.f32 %v4918_v56, %v5882_v33 }
 0x4db   :  { %v871_v16 = vpack.c.bf16 %v869_v11, %v869_v11 }
 0x4dc   :  { %v1113_v17 = vpop.xlane.xlu1 %1112 }
 0x4dd   :  { %4220 = vmatmul.msk.bf16.gmra.mxu3 %vm626_vm13, %v871_v16  ;;  %4919 = vrcp.f32 %v1113_v17 }
 0x4e0   :  { %1442 = vrot.lane.b32.xlu0 %v5874_v30, %s7217_s26  ;;  %v965_v1 = vpop.xlane.xlu0 %964 }
 0x4e1   :  { %v1116_v24 = vpop.xlane.xlu2 %1115  ;;  %4921 = vrcp.f32 %v965_v1 }
 0x4e2   :  { %4923 = vrcp.f32 %v1116_v24 }
 0x4e3   :  { %v4920_v60 = vpop.eup %4919 }
 0x4e4   :  { %v1123_v47 = vmul.f32 %v4920_v60, %v5893_v6 }
 0x4e7   :  { %v4922_v57 = vpop.eup %4921 }
 0x4e8   :  { %v4924_v19 = vpop.eup %4923  ;;  %v973_v45 = vmul.f32 %v4922_v57, %v5899_v41 }
 0x4e9   :  { %v1124_v42 = vmul.f32 %v4924_v19, %v5901_v13  ;;  %v968_v52 = vpop.xlane.xlu0 %967  ;;  %v1119_v30 = vpop.xlane.xlu2 %1118 }
 0x4ea   :  { %v975_v15 = vpack.c.bf16 %v973_v45, %v972_v8  ;;  %4925 = vrcp.f32 %v968_v52 }
 0x4eb   :  { %v1126_v51 = vpack.c.bf16 %v1124_v42, %v1123_v47  ;;  %4927 = vrcp.f32 %v1119_v30 }
 0x4ec   :  { %4223 = vmatmul.msk.bf16.vlgmr.msrb.gmra.mxu1 %vm626_vm13, %v975_v15 }
 0x4ed   :  { %4227 = vmatmul.msk.bf16.vlgmr.msrb.gmra.mxu3 %vm626_vm13, %v1126_v51 }
 0x4f0   :  { %v4926_v34 = vpop.eup %4925 }
 0x4f1   :  { %v4928_v23 = vpop.eup %4927  ;;  %v974_v6 = vmul.f32 %v4926_v34, %v5911_v44  ;;  %v1218_v13 = vpop.xlane.xlu2 %1217 }
 0x4f2   :  { %v1125_v41 = vmul.f32 %v4928_v23, %v5909_v29  ;;  %v1215_v37 = vpop.xlane.xlu0 %1214  ;;  %4929 = vrcp.f32 %v1218_v13 }
 0x4f3   :  { %v976_v61 = vpack.c.bf16 %v974_v6, %v974_v6  ;;  %4931 = vrcp.f32 %v1215_v37 }
 0x4f4   :  { %v1340_v58 = vpop.permute.xlu1 %1339  ;;  %v1127_v25 = vpack.c.bf16 %v1125_v41, %v1125_v41 }
 0x4f5   :  { %v1349_v33 = vsel %vm670_vm11, %v1340_v58, 0 }
 0x4f6   :  { %1357 = vmatpush.bf16.msra.mxu3 %v1349_v33 }
 0x4f8   :  { %v4930_v22 = vpop.eup %4929 }
 0x4f9   :  { %v4932_v39 = vpop.eup %4931  ;;  %v1226_v44 = vmul.f32 %v4930_v22, %v5919_v32 }
 0x4fa   :  { %v1225_v29 = vmul.f32 %v4932_v39, %v5921_v50 }
 0x4fc   :  { %4224 = vmatmul.msk.bf16.gmra.mxu1 %vm626_vm13, %v976_v61  ;;  %v1228_v49 = vpack.c.bf16 %v1226_v44, %v1225_v29 }
 0x4fd   :  { %4228 = vmatmul.msk.bf16.gmra.mxu3 %vm626_vm13, %v1127_v25 }
 0x500   :  { %v1325_v9 = vpop.xlane.xlu2 %1324 }
 0x501   :  { %v1221_v55 = vpop.xlane.xlu0 %1220 }
 0x502   :  { %4933 = vrcp.f32 %v1221_v55 }
 0x503   :  { %4935 = vrcp.f32 %v1325_v9 }
 0x508   :  { %v1445_v12 = vpop.permute.xlu2 %1444  ;;  %v4934_v40 = vpop.eup %4933 }
 0x509   :  { %v1454_v20 = vsel %vm670_vm11, %v1445_v12, 0  ;;  %v1227_v32 = vmul.f32 %v4934_v40, %v5933_v2  ;;  %v4936_v59 = vpop.eup %4935 }
 0x50a   :  { %1309 = vmax.xlane.f32.xlu0 %v1308_v48  ;;  %1462 = vmatpush.bf16.msrb.mxu1 %v1454_v20  ;;  %v1333_v27 = vmul.f32 %v4936_v59, %v5931_v63  ;;  %v4645_v59 = vld [vmem:[%s7200_s9] sm:$0xff] }
 0x50b   :  { %v1229_v0 = vpack.c.bf16 %v1227_v32, %v1227_v32 }
 0x50c   :  { %4231 = vmatmul.msk.bf16.vlgmr.msra.gmra.mxu1 %vm626_vm13, %v1228_v49 }
 0x512   :  { %v6007_v18 = vpop.f32.mrf.mxu1 }
 0x514   :  { %v1338_v38 = vpop.permute.xlu0 %1337 }
 0x515   :  { %1358 = vmatpush.bf16.msra.mxu3 %v1338_v38 }
 0x517   :  { %v6010_v50 = vpop.f32.mrf.mxu3 }
 0x51a   :  { %v6012_v62 = vpop.f32.mrf.mxu1 }
 0x51b   :  { %v4725_v48 = vpack.i.bf16 %v6012_v62, %v6007_v18  ;;  %v4648_v18 = vld [vmem:[%s7200_s9 + $0x18] sm:$0xff]  ;;  %v4647_v62 = vld [vmem:[%s7200_s9 + $0x10] sm:$0xff] }
 0x51c   :  { %4232 = vmatmul.msk.bf16.gmra.mxu1 %vm626_vm13, %v1229_v0  ;;  %1567 = vmatpush.bf16.msra.mxu2 %v4648_v18 }
 0x51f   :  { %v1322_v43 = vpop.xlane.xlu1 %1321  ;;  %v6015_v3 = vpop.f32.mrf.mxu3 }
 0x520   :  { %4937 = vrcp.f32 %v1322_v43  ;;  %1568 = vmatpush.bf16.msra.mxu2 %v4647_v62 }
 0x523   :  { %v795_v5 = vpop.f32.mrf.mxu1 }
 0x526   :  { %v4938_v46 = vpop.eup %4937 }
 0x527   :  { %v1332_v11 = vmul.f32 %v4938_v46, %v5958_v10  ;;  %v1427_v19 = vpop.xlane.xlu1 %1426 }
 0x528   :  { %v6019_v2 = vpop.f32.mrf.mxu3 }
 0x529   :  { %v1335_v16 = vpack.c.bf16 %v1333_v27, %v1332_v11 }
 0x52b   :  { %v797_v17 = vpop.f32.mrf.mxu1  ;;  %4235 = vmatmul.msk.bf16.vlgmr.msra.gmra.mxu3 %vm626_vm13, %v1335_v16 }
 0x530   :  { %v690_v1 = vpop.f32.mrf.mxu3 }
 0x538   :  { %v895_v24 = vpop.f32.mrf.mxu3 }
 0x53f   :  { %v1430_v57 = vpop.xlane.xlu0 %1429 }
 0x540   :  { %v897_v56 = vpop.f32.mrf.mxu3  ;;  %4939 = vrcp.f32 %v1430_v57 }
 0x541   :  { %v4730_v60 = vpack.i.bf16 %v897_v56, %v895_v24  ;;  %4941 = vrcp.f32 %v1427_v19 }
 0x543   :  { %4731 = vrot.lane.b32.xlu0 %v4730_v60, %s5160_s24 }
 0x546   :  { %v4940_v8 = vpop.eup %4939 }
 0x547   :  { %v4942_v63 = vpop.eup %4941  ;;  %v1438_v10 = vmul.f32 %v4940_v8, %v5972_v7  ;;  %v1415_v7 = vpop.xlane.xlu2 %1414 }
 0x548   :  { %v1437_v45 = vmul.f32 %v4942_v63, %v5964_v28  ;;  %v1418_v41 = vsub.f32 %v5976_v14, %v1415_v7 }
 0x54a   :  { %v1440_v42 = vpack.c.bf16 %v1438_v10, %v1437_v45  ;;  %v1423_v25 = vmul.f32 1.442695, %v1418_v41 }
 0x552   :  { %v1443_v47 = vpop.permute.xlu0 %1442 }
 0x553   :  { %1463 = vmatpush.bf16.msrb.mxu1 %v1443_v47 }
 0x556   :  { %4239 = vmatmul.msk.bf16.vlgmr.msrb.gmra.mxu1 %vm626_vm13, %v1440_v42 }
 0x560   :  { %v900_v15 = vpop.f32.mrf.mxu3 }
 0x568   :  { %v902_v52 = vpop.f32.mrf.mxu3 }
 0x569   :  { %v1000_v51 = vpop.f32.mrf.mxu1 }
 0x570   :  { %v6026_v30 = vpop.f32.mrf.mxu3 }
 0x571   :  { %v1002_v34 = vpop.f32.mrf.mxu1 }
 0x572   :  { %v4735_v23 = vpack.i.bf16 %v1002_v34, %v1000_v51 }
 0x574   :  { %4736 = vrot.lane.b32.xlu2 %v4735_v23, %s5161_s2 }
 0x578   :  { %v6029_v58 = vpop.f32.mrf.mxu3 }
 0x579   :  { %v1005_v33 = vpop.f32.mrf.mxu1 }
 0x57d   :  { %v1310_v6 = vpop.xlane.xlu0 %1309 }
 0x57e   :  { %v1313_v28 = vsub.f32 %v5999_v26, %v1310_v6 }
 0x580   :  { %v1318_v13 = vmul.f32 1.442695, %v1313_v28  ;;  %v6033_v37 = vpop.f32.mrf.mxu3 }
 0x581   :  { %v1007_v61 = vpop.f32.mrf.mxu1 }
 0x582   :  { %4943 = vpow2.f32 %v1318_v13 }
 0x583   :  { %4945 = vpow2.f32 %v1423_v25 }
 0x588   :  { %v4944_v9 = vpop.eup %4943  ;;  %v1155_v22 = vpop.f32.mrf.mxu3 }
 0x589   :  { %v1255_v39 = vpop.f32.mrf.mxu1  ;;  %v1326_v44 = vsel %vm626_vm13, %v4944_v9, 0.0  ;;  %v4946_v29 = vpop.eup %4945 }
 0x58a   :  { %1327 = vadd.xlane.f32.xlu1 %v1326_v44  ;;  %v1431_v20 = vsel %vm626_vm13, %v4946_v29, 0.0  ;;  %v4740_v49 = vpack.i.bf16 %v1255_v39, %v795_v5  ;;  %v4646_v5 = vld [vmem:[%s7200_s9 + $0x8] sm:$0xff] }
 0x58b   :  { %1569 = vmatpush.bf16.msra.mxu2 %v4646_v5 }
 0x58f   :  { %1570 = vmatpush.bf16.msra.mxu2 %v4645_v59 }
 0x591   :  { %v1257_v12 = vpop.f32.mrf.mxu1 }
 0x592   :  { %1432 = vadd.xlane.f32.xlu1 %v1431_v20 }
 0x599   :  { %v1260_v26 = vpop.f32.mrf.mxu1 }
 0x59a   :  { %v4755_v38 = vpack.i.bf16 %v1260_v26, %v1257_v12 }
 0x5a1   :  { %v1262_v14 = vpop.f32.mrf.mxu1 }
 0x5ab   :  { %4726 = vrot.lane.b32.xlu1 %v4725_v48, %s7215_s25 }
 0x5ae   :  { %v1360_v55 = vpop.f32.mrf.mxu3 }
 0x5af   :  { %v4745_v40 = vpack.i.bf16 %v1360_v55, %v900_v15 }
 0x5b3   :  { %4741 = vrot.lane.b32.xlu1 %v4740_v49, %s7215_s25 }
 0x5b5   :  { %v4732_v56 = vpop.permute.xlu0 %4731 }
 0x5b6   :  { %v4734_v63 = vunpack.i.h.bf16 %v4732_v56  ;;  %v4733_v10 = vunpack.i.l.bf16 %v4732_v56  ;;  %v1362_v26 = vpop.f32.mrf.mxu3 }
 0x5bb   :  { %4746 = vrot.lane.b32.xlu1 %v4745_v40, %s5160_s24 }
 0x5c3   :  { %4756 = vrot.lane.b32.xlu1 %v4755_v38, %s7215_s25  ;;  %v6081_v38 = vld [vmem:[%s7201_s10] ss:$0 sm:$0xff]  ;;  %s7230_s25 = smov 16  }
 0x5ce   :  { %v4737_v60 = vpop.permute.xlu2 %4736 }
 0x5cf   :  { %v4739_v45 = vunpack.i.h.bf16 %v4737_v60  ;;  %v4738_v47 = vunpack.i.l.bf16 %v4737_v60 }
 0x5d3   :  { %v1465_v32 = vpop.f32.mrf.mxu1 }
 0x5d4   :  { %v4750_v0 = vpack.i.bf16 %v1465_v32, %v1005_v33 }
 0x5d6   :  { %4751 = vrot.lane.b32.xlu0 %v4750_v0, %s5161_s2 }
 0x5db   :  { %v1467_v14 = vpop.f32.mrf.mxu1 }
 0x5fd   :  { %v1328_v43 = vpop.xlane.xlu1 %1327 }
 0x5fe   :  { %4947 = vrcp.f32 %v1328_v43 }
 0x604   :  { %v4948_v46 = vpop.eup %4947 }
 0x605   :  { %v1433_v27 = vpop.xlane.xlu1 %1432  ;;  %v1334_v11 = vmul.f32 %v4948_v46, %v4944_v9 }
 0x606   :  { %4949 = vrcp.f32 %v1433_v27 }
 0x607   :  { %v1336_v16 = vpack.c.bf16 %v1334_v11, %v1334_v11 }
 0x609   :  { %4236 = vmatmul.msk.bf16.gmra.mxu3 %vm626_vm13, %v1336_v16 }
 0x60c   :  { %v4950_v17 = vpop.eup %4949 }
 0x60d   :  { %v1439_v1 = vmul.f32 %v4950_v17, %v4946_v29 }
 0x60f   :  { %v1441_v24 = vpack.c.bf16 %v1439_v1, %v1439_v1 }
 0x611   :  { %4240 = vmatmul.msk.bf16.gmra.mxu1 %vm626_vm13, %v1441_v24 }
 0x61d   :  { %v4727_v57 = vpop.permute.xlu1 %4726 }
 0x61e   :  { %v4729_v19 = vunpack.i.h.bf16 %v4727_v57  ;;  %v4728_v8 = vunpack.i.l.bf16 %v4727_v57 }
 0x620   :  { %v1046_v42 = vsel %vm595_vm10, %v6015_v3, %v4729_v19  ;;  %v1045_v15 = vsel %vm595_vm10, %v6010_v50, %v4728_v8 }
 0x621   :  { %v1049_v52 = vsel %vm1048_vm14, %v1045_v15, %v4733_v10  ;;  %v1050_v51 = vsel %vm1048_vm14, %v1046_v42, %v4734_v63 }
 0x622   :  { %v1052_v34 = vsel %vm106_vm0, %v1049_v52, %v4738_v47  ;;  %v1053_v23 = vsel %vm106_vm0, %v1050_v51, %v4739_v45 }
 0x623   :  { %v1519_v33 = vpack.c.bf16 %v1053_v23, %v1052_v34 }
 0x625   :  { %4257 = vmatmul.msk.bf16.vlgmr.msra.gmra.mxu2 %vm142_vm1, %v1519_v33  ;;  %v4742_v7 = vpop.permute.xlu1 %4741 }
 0x626   :  { %v4744_v28 = vunpack.i.h.bf16 %v4742_v7  ;;  %v4743_v41 = vunpack.i.l.bf16 %v4742_v7 }
 0x628   :  { %v1510_v50 = vsel %vm595_vm10, %v6026_v30, %v4744_v28  ;;  %v1047_v25 = vsel %vm595_vm10, %v6019_v2, %v4743_v41 }
 0x62d   :  { %v4747_v6 = vpop.permute.xlu1 %4746 }
 0x62e   :  { %v4749_v13 = vunpack.i.h.bf16 %v4747_v6  ;;  %v4748_v3 = vunpack.i.l.bf16 %v4747_v6 }
 0x630   :  { %v1051_v39 = vsel %vm1048_vm14, %v1047_v25, %v4748_v3  ;;  %v1513_v44 = vsel %vm1048_vm14, %v1510_v50, %v4749_v13  ;;  %v4288_v25 = vld [vmem:[%s7204_s13 + $0x38] sm:$0xf0] }
 0x635   :  { %v4757_v45 = vpop.permute.xlu1 %4756 }
 0x636   :  { %v4759_v42 = vunpack.i.h.bf16 %v4757_v45  ;;  %v4758_v15 = vunpack.i.l.bf16 %v4757_v45 }
 0x638   :  { %v1512_v34 = vsel %vm595_vm10, %v6033_v37, %v4759_v42  ;;  %v1511_v23 = vsel %vm595_vm10, %v6029_v58, %v4758_v15  ;;  %v4286_v37 = vld [vmem:[%s7204_s13 + $0x30] sm:$0xf]  ;;  %v4656_v58 = vld [vmem:[%s7204_s13 + $0x34] sm:$0xf0] }
 0x639   :  { %v4287_v50 = vor.u32 %v4656_v58, %v4286_v37 }
 0x63b   :  { %1837 = vmatpush.bf16.msrb.mxu3 %v4287_v50 }
 0x648   :  { %v4752_v61 = vpop.permute.xlu0 %4751 }
 0x649   :  { %v4754_v9 = vunpack.i.h.bf16 %v4752_v61  ;;  %v4753_v22 = vunpack.i.l.bf16 %v4752_v61  ;;  %v4655_v61 = vld [vmem:[%s7204_s13 + $0x34] sm:$0xf] }
 0x64b   :  { %v1054_v29 = vsel %vm106_vm0, %v1051_v39, %v4753_v22  ;;  %v1516_v12 = vsel %vm106_vm0, %v1513_v44, %v4754_v9  ;;  %v4291_v9 = vor.u32 %v4655_v61, %v4288_v25  ;;  %v4278_v22 = vld [vmem:[%s7204_s13 + $0x20] sm:$0xf]  ;;  %v4654_v39 = vld [vmem:[%s7204_s13 + $0x24] sm:$0xf0] }
 0x64c   :  { %v1520_v20 = vpack.c.bf16 %v1516_v12, %v1054_v29  ;;  %v4279_v29 = vor.u32 %v4654_v39, %v4278_v22  ;;  %v4653_v12 = vld [vmem:[%s7204_s13 + $0x24] sm:$0xf] }
 0x64d   :  { %1861 = vmatpush.bf16.msrb.mxu0 %v4291_v9 }
 0x64e   :  { %4258 = vmatmul.msk.bf16.gmra.mxu2 %vm142_vm1, %v1520_v20  ;;  %v4280_v20 = vld [vmem:[%s7204_s13 + $0x28] sm:$0xf0]  ;;  %1838 = vmatpush.bf16.msrb.mxu3 %v4279_v29 }
 0x68c   :  { %v1365_v48 = vpop.f32.mrf.mxu3 }
 0x68d   :  { %v4760_v30 = vpack.i.bf16 %v1365_v48, %v1362_v26  ;;  %v4283_v26 = vor.u32 %v4653_v12, %v4280_v20  ;;  %v4652_v48 = vld [vmem:[%s7204_s13 + $0x14] sm:$0xf0] }
 0x68e   :  { %v1470_v49 = vpop.f32.mrf.mxu1 }
 0x68f   :  { %v4765_v55 = vpack.i.bf16 %v1470_v49, %v1467_v14  ;;  %4761 = vrot.lane.b32.xlu2 %v4760_v30, %s5160_s24  ;;  %1862 = vmatpush.bf16.msrb.mxu0 %v4283_v26  ;;  %v4270_v14 = vld [vmem:[%s7204_s13 + $0x10] sm:$0xf]  ;;  %v4651_v30 = vld [vmem:[%s7204_s13 + $0x14] sm:$0xf] }
 0x690   :  { %v4271_v49 = vor.u32 %v4652_v48, %v4270_v14 }
 0x691   :  { %4766 = vrot.lane.b32.xlu0 %v4765_v55, %s5161_s2  ;;  %v4272_v55 = vld [vmem:[%s7204_s13 + $0x18] sm:$0xf0] }
 0x692   :  { %1839 = vmatpush.bf16.msrb.mxu3 %v4271_v49 }
 0x694   :  { %v1367_v2 = vpop.f32.mrf.mxu3 }
 0x695   :  { %v4275_v2 = vor.u32 %v4651_v30, %v4272_v55 }
 0x696   :  { %v1472_v40 = vpop.f32.mrf.mxu1 }
 0x697   :  { %1863 = vmatpush.bf16.msrb.mxu0 %v4275_v2  ;;  %v4262_v40 = vld [vmem:[%s7204_s13] sm:$0xf] }
 0x6a8   :  { %v1572_v32 = vpop.f32.mrf.mxu2 }
 0x6a9   :  { %v1587_v0 = vadd.f32 %v1572_v32, %v5383_v35  ;;  %v4650_v32 = vld [vmem:[%s7204_s13 + $0x4] sm:$0xf0] }
 0x6ab   :  { %v6085_v18 = vadd.f32 %v6081_v38, %v1587_v0  ;;  %v4649_v0 = vld [vmem:[%s7204_s13 + $0x4] sm:$0xf] }
 0x6ad   :  { %v1605_v62 = vsel %vm142_vm1, %v6085_v18, 0.0  ;;  %v1623_v27 = vmul.f32 %v6085_v18, %v6085_v18 }
 0x6ae   :  { %1606 = vadd.xlane.f32.xlu1 %v1605_v62 }
 0x6af   :  { %v1629_v16 = vsel %vm142_vm1, %v1623_v27, 0.0  ;;  %v4264_v27 = vld [vmem:[%s7204_s13 + $0x8] sm:$0xf0] }
 0x6b0   :  { %v1574_v43 = vpop.f32.mrf.mxu2 }
 0x6b1   :  { %v1588_v5 = vadd.f32 %v1574_v43, %v5396_v53 }
 0x6b3   :  { %v6091_v59 = vadd.f32 %v6081_v38, %v1588_v5 }
 0x6b5   :  { %v1624_v46 = vmul.f32 %v6091_v59, %v6091_v59  ;;  %v1608_v11 = vsel %vm142_vm1, %v6091_v59, 0.0 }
 0x6b7   :  { %v1632_v35 = vsel %vm142_vm1, %v1624_v46, 0.0  ;;  %v4263_v46 = vor.u32 %v4650_v32, %v4262_v40 }
 0x6b8   :  { %1633 = vadd.xlane.f32.xlu1 %v1632_v35  ;;  %1609 = vadd.xlane.f32.xlu2 %v1608_v11  ;;  %v4267_v11 = vor.u32 %v4649_v0, %v4264_v27 }
 0x6b9   :  { %1840 = vmatpush.bf16.msrb.mxu3 %v4263_v46 }
 0x6ba   :  { %1864 = vmatpush.bf16.msrb.mxu0 %v4267_v11 }
 0x6bb   :  { %1630 = vadd.xlane.f32.xlu0 %v1629_v16 }
 0x6d1   :  { %v1577_v53 = vpop.f32.mrf.mxu2 }
 0x6d2   :  { %v1589_v17 = vadd.f32 %v1577_v53, %v5410_v4 }
 0x6d4   :  { %v6103_v1 = vadd.f32 %v6081_v38, %v1589_v17 }
 0x6d6   :  { %v1611_v24 = vsel %vm142_vm1, %v6103_v1, 0.0  ;;  %v1625_v56 = vmul.f32 %v6103_v1, %v6103_v1 }
 0x6d7   :  { %1612 = vadd.xlane.f32.xlu2 %v1611_v24 }
 0x6d8   :  { %v1635_v60 = vsel %vm142_vm1, %v1625_v56, 0.0 }
 0x6d9   :  { %1636 = vadd.xlane.f32.xlu1 %v1635_v60  ;;  %v1579_v57 = vpop.f32.mrf.mxu2 }
 0x6da   :  { %v1590_v19 = vadd.f32 %v1579_v57, %v5422_v21 }
 0x6dc   :  { %v6112_v8 = vadd.f32 %v6081_v38, %v1590_v19 }
 0x6de   :  { %v1614_v4 = vsel %vm142_vm1, %v6112_v8, 0.0  ;;  %v1626_v63 = vmul.f32 %v6112_v8, %v6112_v8 }
 0x6df   :  { %1615 = vadd.xlane.f32.xlu0 %v1614_v4 }
 0x6e0   :  { %v1638_v10 = vsel %vm142_vm1, %v1626_v63, 0.0 }
 0x6e1   :  { %1639 = vadd.xlane.f32.xlu2 %v1638_v10 }
 0x6e9   :  { %v4762_v47 = vpop.permute.xlu2 %4761 }
 0x6ea   :  { %v4764_v52 = vunpack.i.h.bf16 %v4762_v47  ;;  %v4763_v51 = vunpack.i.l.bf16 %v4762_v47 }
 0x6ec   :  { %v1514_v6 = vsel %vm1048_vm14, %v1511_v23, %v4763_v51  ;;  %v1515_v28 = vsel %vm1048_vm14, %v1512_v34, %v4764_v52 }
 0x703   :  { %v4767_v21 = vpop.permute.xlu0 %4766 }
 0x704   :  { %v4769_v33 = vunpack.i.h.bf16 %v4767_v21  ;;  %v4768_v7 = vunpack.i.l.bf16 %v4767_v21 }
 0x706   :  { %v1517_v41 = vsel %vm106_vm0, %v1514_v6, %v4768_v7  ;;  %v1518_v13 = vsel %vm106_vm0, %v1515_v28, %v4769_v33  ;;  %v6179_v33 = vld [vmem:[%s7202_s11] ss:$0 sm:$0xff] }
 0x707   :  { %v1521_v3 = vpack.c.bf16 %v1518_v13, %v1517_v41  ;;  %v6186_v13 = vld [vmem:[%s7203_s12] ss:$0 sm:$0xff] }
 0x709   :  { %4259 = vmatmul.msk.bf16.gmra.mxu2 %vm142_vm1, %v1521_v3 }
 0x721   :  { %v1607_v44 = vpop.xlane.xlu1 %1606 }
 0x722   :  { %v1647_v62 = vmul.f32 0.015625, %v1607_v44 }
 0x724   :  { %v1659_v24 = vmul.f32 %v1647_v62, %v1647_v62  ;;  %v1671_v28 = vsub.f32 %v6085_v18, %v1647_v62 }
 0x72b   :  { %v1634_v43 = vpop.xlane.xlu1 %1633  ;;  %v1610_v5 = vpop.xlane.xlu2 %1609 }
 0x72c   :  { %v1648_v35 = vmul.f32 0.015625, %v1610_v5  ;;  %v1654_v16 = vmul.f32 0.015625, %v1634_v43 }
 0x72e   :  { %v1660_v53 = vmul.f32 %v1648_v35, %v1648_v35  ;;  %v1631_v17 = vpop.xlane.xlu0 %1630  ;;  %v1672_v7 = vsub.f32 %v6091_v59, %v1648_v35 }
 0x72f   :  { %v1653_v56 = vmul.f32 0.015625, %v1631_v17 }
 0x730   :  { %v1666_v60 = vsub.f32 %v1654_v16, %v1660_v53 }
 0x731   :  { %v1665_v57 = vsub.f32 %v1653_v56, %v1659_v24 }
 0x732   :  { %v1678_v19 = vadd.f32 1e-05, %v1666_v60 }
 0x733   :  { %v1677_v4 = vadd.f32 1e-05, %v1665_v57 }
 0x734   :  { %4951 = vrsqrt.f32 %v1678_v19  ;;  %vm1699_vm3 = vweird.f32 %v1678_v19 }
 0x735   :  { %4953 = vrsqrt.f32 %v1677_v4  ;;  %vm1689_vm5 = vweird.f32 %v1677_v4 }
 0x73a   :  { %v4952_v63 = vpop.eup %4951 }
 0x73b   :  { %v4954_v10 = vpop.eup %4953  ;;  %v1694_v45 = vmul.f32 %v4952_v63, %v1678_v19  ;;  %vm1700_vm15 = vweird.f32 %v4952_v63 }
 0x73c   :  { %v1684_v47 = vmul.f32 %v4954_v10, %v1677_v4  ;;  %vm1690_vm2 = vweird.f32 %v4954_v10  ;;  %vm1701_vm4 = vmor %vm1699_vm3, %vm1700_vm15 }
 0x73d   :  { %v1695_v42 = vmul.f32 %v4952_v63, %v1694_v45  ;;  %vm1691_vm6 = vmor %vm1689_vm5, %vm1690_vm2 }
 0x73e   :  { %v1685_v15 = vmul.f32 %v4954_v10, %v1684_v47 }
 0x73f   :  { %v1696_v52 = vmul.f32 0.5, %v1695_v42 }
 0x740   :  { %v1686_v51 = vmul.f32 0.5, %v1685_v15 }
 0x741   :  { %v1697_v21 = vsub.f32 1.5, %v1696_v52 }
 0x742   :  { %v1687_v34 = vsub.f32 1.5, %v1686_v51 }
 0x743   :  { %v1698_v23 = vmul.f32 %v4952_v63, %v1697_v21 }
 0x744   :  { %v1688_v6 = vmul.f32 %v4954_v10, %v1687_v34 }
 0x745   :  { %v1702_v41 = vsel %vm1701_vm4, %v4952_v63, %v1698_v23 }
 0x746   :  { %v1744_v3 = vmul.f32 %v1702_v41, %v1672_v7  ;;  %v1692_v37 = vsel %vm1691_vm6, %v4954_v10, %v1688_v6 }
 0x747   :  { %v1743_v58 = vmul.f32 %v1692_v37, %v1671_v28 }
 0x748   :  { %v1753_v61 = vmul.f32 %v6179_v33, %v1744_v3 }
 0x749   :  { %v1752_v50 = vmul.f32 %v6179_v33, %v1743_v58  ;;  %v4672_v58 = vld [vmem:[%s7206_s15 + $0x78] sm:$0xff] }
 0x74a   :  { %v1762_v25 = vadd.f32 %v6186_v13, %v1753_v61  ;;  %v1613_v9 = vpop.xlane.xlu2 %1612  ;;  %2151 = vmatpush.bf16.msrb.mxu2 %v4672_v58  ;;  %v4670_v61 = vld [vmem:[%s7206_s15 + $0x68] sm:$0xff] }
 0x74b   :  { %v1649_v22 = vmul.f32 0.015625, %v1613_v9  ;;  %v1761_v39 = vadd.f32 %v6186_v13, %v1752_v50  ;;  %v4663_v50 = vld [vmem:[%s7206_s15 + $0x30] sm:$0xff]  ;;  %v4662_v9 = vld [vmem:[%s7206_s15 + $0x28] sm:$0xff] }
 0x74c   :  { %v1637_v44 = vpop.xlane.xlu1 %1636 }
 0x74d   :  { %v1661_v29 = vmul.f32 %v1649_v22, %v1649_v22  ;;  %v1655_v12 = vmul.f32 0.015625, %v1637_v44  ;;  %v1767_v20 = vpack.c.bf16 %v1762_v25, %v1761_v39  ;;  %v1673_v24 = vsub.f32 %v6103_v1, %v1649_v22  ;;  %v4669_v25 = vld [vmem:[%s7206_s15 + $0x60] sm:$0xff]  ;;  %v4668_v22 = vld [vmem:[%s7206_s15 + $0x58] sm:$0xff]  ;;  %v4667_v44 = vld [vmem:[%s7206_s15 + $0x50] sm:$0xff] }
 0x74e   :  { %v4661_v39 = vld [vmem:[%s7206_s15 + $0x20] sm:$0xff] }
 0x74f   :  { %v1667_v26 = vsub.f32 %v1655_v12, %v1661_v29  ;;  %4292 = vmatmul.msk.bf16.vlgmr.msrb.gmra.mxu3 %vm142_vm1, %v1767_v20  ;;  %4295 = vmatmul.msk.bf16.vlgmr.msrb.gmra.mxu0 %vm142_vm1, %v1767_v20  ;;  %v1778_v29 = vld [vmem:[%s7205_s14] sm:$0x3]  ;;  %v4660_v12 = vld [vmem:[%s7206_s15 + $0x18] sm:$0xff]  ;;  %v4666_v20 = vld [vmem:[%s7206_s15 + $0x48] sm:$0xff] }
 0x751   :  { %v1679_v14 = vadd.f32 1e-05, %v1667_v26  ;;  %v6259_v26 = vperm.slane %v1778_v29, 1 }
 0x752   :  { %v1616_v48 = vpop.xlane.xlu0 %1615 }
 0x753   :  { %4955 = vrsqrt.f32 %v1679_v14  ;;  %v1650_v30 = vmul.f32 0.015625, %v1616_v48  ;;  %vm1709_vm8 = vweird.f32 %v1679_v14 }
 0x754   :  { %v1640_v49 = vpop.xlane.xlu2 %1639 }
 0x755   :  { %v1662_v55 = vmul.f32 %v1650_v30, %v1650_v30  ;;  %v1656_v2 = vmul.f32 0.015625, %v1640_v49  ;;  %v1674_v19 = vsub.f32 %v6112_v8, %v1650_v30  ;;  %v4665_v30 = vld [vmem:[%s7206_s15 + $0x40] sm:$0xff] }
 0x757   :  { %v1668_v40 = vsub.f32 %v1656_v2, %v1662_v55  ;;  %v4658_v55 = vld [vmem:[%s7206_s15 + $0x8] sm:$0xff] }
 0x759   :  { %v4956_v32 = vpop.eup %4955  ;;  %v1680_v0 = vadd.f32 1e-05, %v1668_v40  ;;  %v6271_v40 = vperm.slane %v1778_v29, 0 }
 0x75a   :  { %v1704_v62 = vmul.f32 %v4956_v32, %v1679_v14  ;;  %vm1710_vm7 = vweird.f32 %v4956_v32  ;;  %v4659_v14 = vld [vmem:[%s7206_s15 + $0x10] sm:$0xff] }
 0x75b   :  { %4957 = vrsqrt.f32 %v1680_v0  ;;  %vm1711_vm9 = vmor %vm1709_vm8, %vm1710_vm7  ;;  %vm1719_vm15 = vweird.f32 %v1680_v0 }
 0x75c   :  { %v1705_v43 = vmul.f32 %v4956_v32, %v1704_v62  ;;  %v4657_v62 = vld [vmem:[%s7206_s15] sm:$0xff] }
 0x75e   :  { %v1706_v5 = vmul.f32 0.5, %v1705_v43 }
 0x760   :  { %v1707_v46 = vsub.f32 1.5, %v1706_v5 }
 0x761   :  { %v4958_v27 = vpop.eup %4957 }
 0x762   :  { %v1708_v35 = vmul.f32 %v4956_v32, %v1707_v46  ;;  %v1714_v11 = vmul.f32 %v4958_v27, %v1680_v0  ;;  %vm1720_vm12 = vweird.f32 %v4958_v27 }
 0x763   :  { %vm1721_vm2 = vmor %vm1719_vm15, %vm1720_vm12 }
 0x764   :  { %v1715_v16 = vmul.f32 %v4958_v27, %v1714_v11  ;;  %v1712_v53 = vsel %vm1711_vm9, %v4956_v32, %v1708_v35 }
 0x765   :  { %v1745_v60 = vmul.f32 %v1712_v53, %v1673_v24 }
 0x766   :  { %v1716_v17 = vmul.f32 0.5, %v1715_v16 }
 0x767   :  { %v1754_v10 = vmul.f32 %v6179_v33, %v1745_v60 }
 0x768   :  { %v1717_v56 = vsub.f32 1.5, %v1716_v17 }
 0x769   :  { %v1763_v47 = vadd.f32 %v6186_v13, %v1754_v10 }
 0x76a   :  { %v1718_v57 = vmul.f32 %v4958_v27, %v1717_v56 }
 0x76c   :  { %v1722_v4 = vsel %vm1721_vm2, %v4958_v27, %v1718_v57 }
 0x76d   :  { %v1746_v63 = vmul.f32 %v1722_v4, %v1674_v19 }
 0x76f   :  { %v1755_v45 = vmul.f32 %v6179_v33, %v1746_v63 }
 0x771   :  { %v1764_v42 = vadd.f32 %v6186_v13, %v1755_v45 }
 0x773   :  { %v1768_v15 = vpack.c.bf16 %v1764_v42, %v1763_v47 }
 0x775   :  { %4293 = vmatmul.msk.bf16.gmra.mxu3 %vm142_vm1, %v1768_v15  ;;  %4296 = vmatmul.msk.bf16.gmra.mxu0 %vm142_vm1, %v1768_v15 }
 0x78c   :  { %v1582_v52 = vpop.f32.mrf.mxu2 }
 0x78d   :  { %v1591_v51 = vadd.f32 %v1582_v52, %v5433_v31 }
 0x78f   :  { %v6204_v21 = vadd.f32 %v6081_v38, %v1591_v51 }
 0x791   :  { %v1617_v34 = vsel %vm142_vm1, %v6204_v21, 0.0  ;;  %v1627_v23 = vmul.f32 %v6204_v21, %v6204_v21 }
 0x792   :  { %1618 = vadd.xlane.f32.xlu0 %v1617_v34 }
 0x793   :  { %v1641_v7 = vsel %vm142_vm1, %v1627_v23, 0.0 }
 0x794   :  { %1642 = vadd.xlane.f32.xlu2 %v1641_v7  ;;  %v1584_v6 = vpop.f32.mrf.mxu2 }
 0x795   :  { %v1592_v28 = vadd.f32 %v1584_v6, %v5526_v54  ;;  %v4671_v54 = vld [vmem:[%s7206_s15 + $0x70] sm:$0xff] }
 0x796   :  { %2152 = vmatpush.bf16.msrb.mxu2 %v4671_v54 }
 0x797   :  { %v6213_v41 = vadd.f32 %v6081_v38, %v1592_v28  ;;  %v4664_v38 = vld [vmem:[%s7206_s15 + $0x38] sm:$0xff] }
 0x798   :  { %2127 = vmatpush.bf16.msra.mxu1 %v4664_v38 }
 0x799   :  { %v1620_v31 = vsel %vm142_vm1, %v6213_v41, 0.0  ;;  %v1628_v3 = vmul.f32 %v6213_v41, %v6213_v41 }
 0x79a   :  { %1621 = vadd.xlane.f32.xlu1 %v1620_v31  ;;  %2153 = vmatpush.bf16.msrb.mxu2 %v4670_v61 }
 0x79b   :  { %v1644_v37 = vsel %vm142_vm1, %v1628_v3, 0.0 }
 0x79c   :  { %1645 = vadd.xlane.f32.xlu0 %v1644_v37  ;;  %2128 = vmatpush.bf16.msra.mxu1 %v4663_v50 }
 0x79e   :  { %2154 = vmatpush.bf16.msrb.mxu2 %v4669_v25 }
 0x7a0   :  { %2129 = vmatpush.bf16.msra.mxu1 %v4662_v9 }
 0x7a2   :  { %2155 = vmatpush.bf16.msrb.mxu2 %v4668_v22 }
 0x7a4   :  { %2130 = vmatpush.bf16.msra.mxu1 %v4661_v39 }
 0x7a6   :  { %2156 = vmatpush.bf16.msrb.mxu2 %v4667_v44 }
 0x7a8   :  { %2131 = vmatpush.bf16.msra.mxu1 %v4660_v12 }
 0x7aa   :  { %2157 = vmatpush.bf16.msrb.mxu2 %v4666_v20 }
 0x7ac   :  { %2132 = vmatpush.bf16.msra.mxu1 %v4659_v14 }
 0x7ae   :  { %2158 = vmatpush.bf16.msrb.mxu2 %v4665_v30 }
 0x7b0   :  { %2133 = vmatpush.bf16.msra.mxu1 %v4658_v55 }
 0x7b4   :  { %2134 = vmatpush.bf16.msra.mxu1 %v4657_v62 }
 0x7cc   :  { %v1866_v48 = vpop.f32.mrf.mxu0 }
 0x7cd   :  { %v1867_v49 = vadd.f32 %v1866_v48, %v6259_v26 }
 0x7cf   :  { %v1882_v2 = vmul.f32 %v1867_v49, %v1867_v49 }
 0x7d1   :  { %v1894_v32 = vmul.f32 %v1882_v2, %v1867_v49 }
 0x7d2   :  { %v1842_v0 = vpop.f32.mrf.mxu3 }
 0x7d3   :  { %v1906_v43 = vmul.f32 0.044715, %v1894_v32  ;;  %v1843_v5 = vadd.f32 %v1842_v0, %v6271_v40 }
 0x7d4   :  { %v1868_v46 = vpop.f32.mrf.mxu0 }
 0x7d5   :  { %v1918_v27 = vadd.f32 %v1906_v43, %v1867_v49  ;;  %v1881_v35 = vmul.f32 %v1843_v5, %v1843_v5  ;;  %v1869_v11 = vadd.f32 %v1868_v46, %v6259_v26 }
 0x7d7   :  { %v1930_v16 = vmul.f32 0.7978846, %v1918_v27  ;;  %v1893_v53 = vmul.f32 %v1881_v35, %v1843_v5  ;;  %v1884_v17 = vmul.f32 %v1869_v11, %v1869_v11 }
 0x7d9   :  { %v1905_v24 = vmul.f32 0.044715, %v1893_v53  ;;  %v1896_v56 = vmul.f32 %v1884_v17, %v1869_v11  ;;  %4959 = vtanh.f32 %v1930_v16 }
 0x7da   :  { %v1844_v60 = vpop.f32.mrf.mxu3 }
 0x7db   :  { %v1917_v57 = vadd.f32 %v1905_v24, %v1843_v5  ;;  %v1908_v19 = vmul.f32 0.044715, %v1896_v56  ;;  %v1845_v4 = vadd.f32 %v1844_v60, %v6271_v40 }
 0x7dd   :  { %v1929_v63 = vmul.f32 0.7978846, %v1917_v57  ;;  %v1920_v10 = vadd.f32 %v1908_v19, %v1869_v11  ;;  %v1883_v45 = vmul.f32 %v1845_v4, %v1845_v4 }
 0x7df   :  { %v1932_v47 = vmul.f32 0.7978846, %v1920_v10  ;;  %v1895_v42 = vmul.f32 %v1883_v45, %v1845_v4  ;;  %4961 = vtanh.f32 %v1929_v63  ;;  %v4960_v15 = vpop.eup %4959 }
 0x7e0   :  { %v1954_v34 = vadd.f32 1.0, %v4960_v15 }
 0x7e1   :  { %4963 = vtanh.f32 %v1932_v47  ;;  %v1907_v52 = vmul.f32 0.044715, %v1895_v42 }
 0x7e2   :  { %v1966_v28 = vmul.f32 0.5, %v1954_v34 }
 0x7e3   :  { %v1919_v51 = vadd.f32 %v1907_v52, %v1845_v4 }
 0x7e4   :  { %v1978_v58 = vmul.f32 %v1966_v28, %v1867_v49 }
 0x7e5   :  { %v1931_v23 = vmul.f32 0.7978846, %v1919_v51  ;;  %v4962_v7 = vpop.eup %4961 }
 0x7e6   :  { %v1953_v3 = vadd.f32 1.0, %v4962_v7 }
 0x7e7   :  { %v4964_v6 = vpop.eup %4963  ;;  %4965 = vtanh.f32 %v1931_v23 }
 0x7e8   :  { %v1956_v31 = vadd.f32 1.0, %v4964_v6  ;;  %v1965_v61 = vmul.f32 0.5, %v1953_v3 }
 0x7ea   :  { %v1968_v37 = vmul.f32 0.5, %v1956_v31  ;;  %v1977_v22 = vmul.f32 %v1965_v61, %v1843_v5 }
 0x7ec   :  { %v1980_v54 = vmul.f32 %v1968_v37, %v1869_v11 }
 0x7ed   :  { %v4966_v38 = vpop.eup %4965 }
 0x7ee   :  { %v1990_v50 = vpack.c.bf16 %v1980_v54, %v1978_v58  ;;  %v1955_v25 = vadd.f32 1.0, %v4966_v38 }
 0x7f0   :  { %v1967_v9 = vmul.f32 0.5, %v1955_v25  ;;  %2159 = vmatmul.bf16.vlgmr.msrb.gmra.mxu2 %v1990_v50 }
 0x7f2   :  { %v1979_v39 = vmul.f32 %v1967_v9, %v1845_v4  ;;  %v1871_v44 = vpop.f32.mrf.mxu0 }
 0x7f3   :  { %v1872_v29 = vadd.f32 %v1871_v44, %v6259_v26 }
 0x7f4   :  { %v1989_v12 = vpack.c.bf16 %v1979_v39, %v1977_v22 }
 0x7f5   :  { %v1886_v20 = vmul.f32 %v1872_v29, %v1872_v29 }
 0x7f6   :  { %2135 = vmatmul.bf16.vlgmr.msra.gmra.mxu1 %v1989_v12 }
 0x7f7   :  { %v1898_v14 = vmul.f32 %v1886_v20, %v1872_v29 }
 0x7f8   :  { %v1847_v48 = vpop.f32.mrf.mxu3 }
 0x7f9   :  { %v1910_v30 = vmul.f32 0.044715, %v1898_v14  ;;  %v1848_v49 = vadd.f32 %v1847_v48, %v6271_v40 }
 0x7fa   :  { %v1873_v55 = vpop.f32.mrf.mxu0 }
 0x7fb   :  { %v1922_v2 = vadd.f32 %v1910_v30, %v1872_v29  ;;  %v1885_v32 = vmul.f32 %v1848_v49, %v1848_v49  ;;  %v1874_v0 = vadd.f32 %v1873_v55, %v6259_v26 }
 0x7fd   :  { %v1934_v62 = vmul.f32 0.7978846, %v1922_v2  ;;  %v1897_v43 = vmul.f32 %v1885_v32, %v1848_v49  ;;  %v1888_v5 = vmul.f32 %v1874_v0, %v1874_v0 }
 0x7ff   :  { %v1909_v46 = vmul.f32 0.044715, %v1897_v43  ;;  %v1900_v27 = vmul.f32 %v1888_v5, %v1874_v0  ;;  %4967 = vtanh.f32 %v1934_v62 }
 0x800   :  { %v1849_v35 = vpop.f32.mrf.mxu3 }
 0x801   :  { %v1921_v11 = vadd.f32 %v1909_v46, %v1848_v49  ;;  %v1912_v16 = vmul.f32 0.044715, %v1900_v27  ;;  %v1850_v53 = vadd.f32 %v1849_v35, %v6271_v40 }
 0x803   :  { %v1933_v17 = vmul.f32 0.7978846, %v1921_v11  ;;  %v1924_v24 = vadd.f32 %v1912_v16, %v1874_v0  ;;  %v1887_v56 = vmul.f32 %v1850_v53, %v1850_v53 }
 0x805   :  { %v1936_v60 = vmul.f32 0.7978846, %v1924_v24  ;;  %v1899_v57 = vmul.f32 %v1887_v56, %v1850_v53  ;;  %v1619_v19 = vpop.xlane.xlu0 %1618  ;;  %4969 = vtanh.f32 %v1933_v17  ;;  %v4968_v63 = vpop.eup %4967 }
 0x806   :  { %v1651_v4 = vmul.f32 0.015625, %v1619_v19  ;;  %v1958_v51 = vadd.f32 1.0, %v4968_v63 }
 0x807   :  { %v1911_v10 = vmul.f32 0.044715, %v1899_v57  ;;  %v1643_v45 = vpop.xlane.xlu2 %1642  ;;  %4971 = vtanh.f32 %v1936_v60 }
 0x808   :  { %v1663_v47 = vmul.f32 %v1651_v4, %v1651_v4  ;;  %v1657_v42 = vmul.f32 0.015625, %v1643_v45  ;;  %v1970_v37 = vmul.f32 0.5, %v1958_v51  ;;  %v1675_v17 = vsub.f32 %v6204_v21, %v1651_v4  ;;  %v6294_v4 = vld [vmem:[%s7207_s16] ss:$0 sm:$0xff] }
 0x809   :  { %v1923_v15 = vadd.f32 %v1911_v10, %v1850_v53 }
 0x80a   :  { %v1669_v52 = vsub.f32 %v1657_v42, %v1663_v47  ;;  %v1982_v9 = vmul.f32 %v1970_v37, %v1872_v29 }
 0x80b   :  { %v1935_v34 = vmul.f32 0.7978846, %v1923_v15  ;;  %v4970_v23 = vpop.eup %4969 }
 0x80c   :  { %v1681_v7 = vadd.f32 1e-05, %v1669_v52  ;;  %v1957_v50 = vadd.f32 1.0, %v4970_v23 }
 0x80d   :  { %v4972_v6 = vpop.eup %4971  ;;  %v1622_v28 = vpop.xlane.xlu1 %1621  ;;  %4973 = vtanh.f32 %v1935_v34 }
 0x80e   :  { %4975 = vrsqrt.f32 %v1681_v7  ;;  %v1652_v31 = vmul.f32 0.015625, %v1622_v28  ;;  %v1960_v3 = vadd.f32 1.0, %v4972_v6  ;;  %v1969_v48 = vmul.f32 0.5, %v1957_v50 }
 0x80f   :  { %v1646_v58 = vpop.xlane.xlu0 %1645  ;;  %vm1729_vm4 = vweird.f32 %v1681_v7 }
 0x810   :  { %v1664_v54 = vmul.f32 %v1652_v31, %v1652_v31  ;;  %v1658_v38 = vmul.f32 0.015625, %v1646_v58  ;;  %v1972_v61 = vmul.f32 0.5, %v1960_v3  ;;  %v1981_v32 = vmul.f32 %v1969_v48, %v1848_v49 }
 0x812   :  { %v1670_v25 = vsub.f32 %v1658_v38, %v1664_v54  ;;  %v1984_v22 = vmul.f32 %v1972_v61, %v1874_v0 }
 0x813   :  { %v4974_v39 = vpop.eup %4973 }
 0x814   :  { %v4976_v44 = vpop.eup %4975  ;;  %v1682_v12 = vadd.f32 1e-05, %v1670_v25  ;;  %v1992_v20 = vpack.c.bf16 %v1984_v22, %v1982_v9  ;;  %v1959_v14 = vadd.f32 1.0, %v4974_v39 }
 0x815   :  { %v1724_v30 = vmul.f32 %v4976_v44, %v1681_v7  ;;  %vm1730_vm3 = vweird.f32 %v4976_v44 }
 0x816   :  { %4977 = vrsqrt.f32 %v1682_v12  ;;  %2164 = vmatmul.bf16.gmra.mxu2 %v1992_v20  ;;  %v1971_v55 = vmul.f32 0.5, %v1959_v14  ;;  %vm1731_vm5 = vmor %vm1729_vm4, %vm1730_vm3  ;;  %vm1739_vm7 = vweird.f32 %v1682_v12 }
 0x817   :  { %v1725_v2 = vmul.f32 %v4976_v44, %v1724_v30 }
 0x818   :  { %v1983_v62 = vmul.f32 %v1971_v55, %v1850_v53  ;;  %v1676_v53 = vsub.f32 %v6213_v41, %v1652_v31 }
 0x819   :  { %v1726_v43 = vmul.f32 0.5, %v1725_v2 }
 0x81a   :  { %v1991_v5 = vpack.c.bf16 %v1983_v62, %v1981_v32 }
 0x81b   :  { %v1727_v46 = vsub.f32 1.5, %v1726_v43 }
 0x81c   :  { %v4978_v27 = vpop.eup %4977  ;;  %2140 = vmatmul.bf16.gmra.mxu1 %v1991_v5 }
 0x81d   :  { %v1728_v29 = vmul.f32 %v4976_v44, %v1727_v46  ;;  %v1734_v0 = vmul.f32 %v4978_v27, %v1682_v12  ;;  %vm1740_vm6 = vweird.f32 %v4978_v27 }
 0x81e   :  { %vm1741_vm8 = vmor %vm1739_vm7, %vm1740_vm6 }
 0x81f   :  { %v1735_v35 = vmul.f32 %v4978_v27, %v1734_v0  ;;  %v1732_v11 = vsel %vm1731_vm5, %v4976_v44, %v1728_v29 }
 0x820   :  { %v1747_v56 = vmul.f32 %v1732_v11, %v1675_v17 }
 0x821   :  { %v1736_v16 = vmul.f32 0.5, %v1735_v35 }
 0x822   :  { %v1756_v19 = vmul.f32 %v6179_v33, %v1747_v56 }
 0x823   :  { %v1737_v24 = vsub.f32 1.5, %v1736_v16 }
 0x824   :  { %v1765_v10 = vadd.f32 %v6186_v13, %v1756_v19 }
 0x825   :  { %v1738_v49 = vmul.f32 %v4978_v27, %v1737_v24 }
 0x827   :  { %v1742_v60 = vsel %vm1741_vm8, %v4978_v27, %v1738_v49 }
 0x828   :  { %v1748_v57 = vmul.f32 %v1742_v60, %v1676_v53 }
 0x82a   :  { %v1757_v63 = vmul.f32 %v6179_v33, %v1748_v57 }
 0x82c   :  { %v1766_v45 = vadd.f32 %v6186_v13, %v1757_v63 }
 0x82e   :  { %v1769_v47 = vpack.c.bf16 %v1766_v45, %v1765_v10 }
 0x830   :  { %4294 = vmatmul.msk.bf16.gmra.mxu3 %vm142_vm1, %v1769_v47  ;;  %4297 = vmatmul.msk.bf16.gmra.mxu0 %vm142_vm1, %v1769_v47 }
 0x873   :  { %v2136_v42 = vpop.f32.mrf.mxu1  ;;  %v2160_v15 = vpop.f32.mrf.mxu2 }
 0x874   :  { %v2137_v52 = vadd.f32 %v6294_v4, %v2136_v42 }
 0x876   :  { %v2161_v51 = vadd.f32 %v2160_v15, %v2137_v52 }
 0x878   :  { %v6298_v33 = vadd.f32 %v2161_v51, %v6085_v18 }
 0x87a   :  { %v2185_v13 = vsel %vm142_vm1, %v6298_v33, 0.0  ;;  %v2203_v34 = vmul.f32 %v6298_v33, %v6298_v33 }
 0x87b   :  { %v2138_v23 = vpop.f32.mrf.mxu1  ;;  %2186 = vadd.xlane.f32.xlu1 %v2185_v13  ;;  %v2162_v28 = vpop.f32.mrf.mxu2 }
 0x87c   :  { %v2139_v7 = vadd.f32 %v6294_v4, %v2138_v23  ;;  %v2209_v6 = vsel %vm142_vm1, %v2203_v34, 0.0 }
 0x87d   :  { %2210 = vadd.xlane.f32.xlu0 %v2209_v6 }
 0x87e   :  { %v2163_v31 = vadd.f32 %v2162_v28, %v2139_v7 }
 0x880   :  { %v6307_v3 = vadd.f32 %v2163_v31, %v6091_v59 }
 0x882   :  { %v2188_v18 = vsel %vm142_vm1, %v6307_v3, 0.0  ;;  %v2204_v37 = vmul.f32 %v6307_v3, %v6307_v3 }
 0x883   :  { %2189 = vadd.xlane.f32.xlu2 %v2188_v18 }
 0x884   :  { %v2212_v58 = vsel %vm142_vm1, %v2204_v37, 0.0 }
 0x885   :  { %2213 = vadd.xlane.f32.xlu1 %v2212_v58 }
 0x899   :  { %v2141_v54 = vpop.f32.mrf.mxu1  ;;  %v2165_v38 = vpop.f32.mrf.mxu2 }
 0x89a   :  { %v2142_v61 = vadd.f32 %v6294_v4, %v2141_v54 }
 0x89c   :  { %v2166_v50 = vadd.f32 %v2165_v38, %v2142_v61 }
 0x89e   :  { %v6316_v25 = vadd.f32 %v2166_v50, %v6103_v1 }
 0x8a0   :  { %v2191_v59 = vsel %vm142_vm1, %v6316_v25, 0.0  ;;  %v2205_v9 = vmul.f32 %v6316_v25, %v6316_v25 }
 0x8a1   :  { %v2143_v22 = vpop.f32.mrf.mxu1  ;;  %2192 = vadd.xlane.f32.xlu2 %v2191_v59  ;;  %v2167_v12 = vpop.f32.mrf.mxu2  ;;  %v4399_v59 = vld [vmem:[%s7198_s7 + $0x70] sm:$0xf] }
 0x8a2   :  { %v2144_v39 = vadd.f32 %v6294_v4, %v2143_v22  ;;  %v2215_v44 = vsel %vm142_vm1, %v2205_v9, 0.0  ;;  %v4680_v9 = vld [vmem:[%s7198_s7 + $0x74] sm:$0xf0]  ;;  %v4679_v22 = vld [vmem:[%s7198_s7 + $0x74] sm:$0xf] }
 0x8a3   :  { %2216 = vadd.xlane.f32.xlu1 %v2215_v44  ;;  %v4401_v44 = vld [vmem:[%s7198_s7 + $0x78] sm:$0xf0] }
 0x8a4   :  { %v2168_v20 = vadd.f32 %v2167_v12, %v2144_v39  ;;  %v4400_v39 = vor.u32 %v4680_v9, %v4399_v59  ;;  %v4404_v12 = vor.u32 %v4679_v22, %v4401_v44  ;;  %v6394_v59 = vld [vmem:[%s7197_s6 + $0x1] ss:$0 sm:$0xff] }
 0x8a6   :  { %v6325_v14 = vadd.f32 %v2168_v20, %v6112_v8  ;;  %2419 = vmatpush.bf16.msra.mxu3 %v4400_v39  ;;  %2443 = vmatpush.bf16.msra.mxu0 %v4404_v12  ;;  %v4391_v20 = vld [vmem:[%s7198_s7 + $0x60] sm:$0xf] }
 0x8a8   :  { %v2194_v1 = vsel %vm142_vm1, %v6325_v14, 0.0  ;;  %v2206_v48 = vmul.f32 %v6325_v14, %v6325_v14 }
 0x8a9   :  { %2195 = vadd.xlane.f32.xlu0 %v2194_v1  ;;  %v4678_v1 = vld [vmem:[%s7198_s7 + $0x64] sm:$0xf0] }
 0x8aa   :  { %v2218_v30 = vsel %vm142_vm1, %v2206_v48, 0.0  ;;  %v4677_v48 = vld [vmem:[%s7198_s7 + $0x64] sm:$0xf] }
 0x8ab   :  { %2219 = vadd.xlane.f32.xlu2 %v2218_v30  ;;  %v4392_v30 = vor.u32 %v4678_v1, %v4391_v20 }
 0x8ad   :  { %v1876_v55 = vpop.f32.mrf.mxu0  ;;  %2420 = vmatpush.bf16.msra.mxu3 %v4392_v30 }
 0x8ae   :  { %v1877_v2 = vadd.f32 %v1876_v55, %v6259_v26  ;;  %v4393_v55 = vld [vmem:[%s7198_s7 + $0x68] sm:$0xf0] }
 0x8b0   :  { %v1890_v32 = vmul.f32 %v1877_v2, %v1877_v2 }
 0x8b2   :  { %v1902_v62 = vmul.f32 %v1890_v32, %v1877_v2  ;;  %v4396_v32 = vor.u32 %v4677_v48, %v4393_v55 }
 0x8b3   :  { %v1852_v43 = vpop.f32.mrf.mxu3 }
 0x8b4   :  { %v1914_v5 = vmul.f32 0.044715, %v1902_v62  ;;  %v1853_v8 = vadd.f32 %v1852_v43, %v6271_v40  ;;  %2444 = vmatpush.bf16.msra.mxu0 %v4396_v32 }
 0x8b5   :  { %v1878_v46 = vpop.f32.mrf.mxu0 }
 0x8b6   :  { %v1926_v27 = vadd.f32 %v1914_v5, %v1877_v2  ;;  %v1889_v29 = vmul.f32 %v1853_v8, %v1853_v8  ;;  %v1879_v0 = vadd.f32 %v1878_v46, %v6259_v26  ;;  %v4383_v5 = vld [vmem:[%s7198_s7 + $0x50] sm:$0xf]  ;;  %v4675_v46 = vld [vmem:[%s7198_s7 + $0x54] sm:$0xf] }
 0x8b8   :  { %v1938_v35 = vmul.f32 0.7978846, %v1926_v27  ;;  %v1901_v11 = vmul.f32 %v1889_v29, %v1853_v8  ;;  %v1892_v16 = vmul.f32 %v1879_v0, %v1879_v0 }
 0x8ba   :  { %v1913_v17 = vmul.f32 0.044715, %v1901_v11  ;;  %v1904_v24 = vmul.f32 %v1892_v16, %v1879_v0  ;;  %4979 = vtanh.f32 %v1938_v35  ;;  %v4385_v35 = vld [vmem:[%s7198_s7 + $0x58] sm:$0xf0] }
 0x8bb   :  { %v1854_v56 = vpop.f32.mrf.mxu3  ;;  %v4388_v11 = vor.u32 %v4675_v46, %v4385_v35 }
 0x8bc   :  { %v1925_v49 = vadd.f32 %v1913_v17, %v1853_v8  ;;  %v1916_v53 = vmul.f32 0.044715, %v1904_v24  ;;  %v1855_v60 = vadd.f32 %v1854_v56, %v6271_v40  ;;  %v4375_v17 = vld [vmem:[%s7198_s7 + $0x40] sm:$0xf]  ;;  %v4674_v24 = vld [vmem:[%s7198_s7 + $0x44] sm:$0xf0] }
 0x8bd   :  { %2445 = vmatpush.bf16.msra.mxu0 %v4388_v11  ;;  %v4673_v56 = vld [vmem:[%s7198_s7 + $0x44] sm:$0xf] }
 0x8be   :  { %v1937_v57 = vmul.f32 0.7978846, %v1925_v49  ;;  %v1928_v19 = vadd.f32 %v1916_v53, %v1879_v0  ;;  %v1891_v63 = vmul.f32 %v1855_v60, %v1855_v60  ;;  %v4376_v53 = vor.u32 %v4674_v24, %v4375_v17 }
 0x8c0   :  { %v1940_v10 = vmul.f32 0.7978846, %v1928_v19  ;;  %v1903_v45 = vmul.f32 %v1891_v63, %v1855_v60  ;;  %4981 = vtanh.f32 %v1937_v57  ;;  %v4980_v47 = vpop.eup %4979 }
 0x8c1   :  { %v1962_v15 = vadd.f32 1.0, %v4980_v47 }
 0x8c2   :  { %v1915_v42 = vmul.f32 0.044715, %v1903_v45  ;;  %4983 = vtanh.f32 %v1940_v10 }
 0x8c3   :  { %v1974_v23 = vmul.f32 0.5, %v1962_v15 }
 0x8c4   :  { %v1927_v26 = vadd.f32 %v1915_v42, %v1855_v60 }
 0x8c5   :  { %v1986_v40 = vmul.f32 %v1974_v23, %v1877_v2 }
 0x8c6   :  { %v1939_v52 = vmul.f32 0.7978846, %v1927_v26  ;;  %v4982_v51 = vpop.eup %4981 }
 0x8c7   :  { %v1961_v6 = vadd.f32 1.0, %v4982_v51 }
 0x8c8   :  { %v4984_v13 = vpop.eup %4983  ;;  %4985 = vtanh.f32 %v1939_v52 }
 0x8c9   :  { %v1964_v34 = vadd.f32 1.0, %v4984_v13  ;;  %v1973_v58 = vmul.f32 0.5, %v1961_v6 }
 0x8cb   :  { %v1976_v7 = vmul.f32 0.5, %v1964_v34  ;;  %v1985_v38 = vmul.f32 %v1973_v58, %v1853_v8  ;;  %v4676_v8 = vld [vmem:[%s7198_s7 + $0x54] sm:$0xf0]  ;;  %v6388_v58 = vld [vmem:[%s7196_s5 + $0x1] ss:$0 sm:$0xff] }
 0x8cd   :  { %v1988_v28 = vmul.f32 %v1976_v7, %v1879_v0  ;;  %v4384_v0 = vor.u32 %v4676_v8, %v4383_v5 }
 0x8ce   :  { %v4986_v31 = vpop.eup %4985 }
 0x8cf   :  { %v1994_v18 = vpack.c.bf16 %v1988_v28, %v1986_v40  ;;  %v1963_v37 = vadd.f32 1.0, %v4986_v31  ;;  %2421 = vmatpush.bf16.msra.mxu3 %v4384_v0 }
 0x8d1   :  { %2169 = vmatmul.bf16.gmra.mxu2 %v1994_v18  ;;  %v1975_v54 = vmul.f32 0.5, %v1963_v37 }
 0x8d3   :  { %v1987_v61 = vmul.f32 %v1975_v54, %v1855_v60  ;;  %v4377_v60 = vld [vmem:[%s7198_s7 + $0x48] sm:$0xf0]  ;;  %2422 = vmatpush.bf16.msra.mxu3 %v4376_v53 }
 0x8d4   :  { %v4380_v19 = vor.u32 %v4673_v56, %v4377_v60 }
 0x8d5   :  { %v1993_v50 = vpack.c.bf16 %v1987_v61, %v1985_v38 }
 0x8d6   :  { %2446 = vmatpush.bf16.msra.mxu0 %v4380_v19 }
 0x8d7   :  { %2145 = vmatmul.bf16.gmra.mxu1 %v1993_v50 }
 0x8ee   :  { %v2187_v2 = vpop.xlane.xlu1 %2186 }
 0x8ef   :  { %v2227_v62 = vmul.f32 0.015625, %v2187_v2 }
 0x8f0   :  { %v2211_v43 = vpop.xlane.xlu0 %2210 }
 0x8f1   :  { %v2239_v27 = vmul.f32 %v2227_v62, %v2227_v62  ;;  %v2233_v29 = vmul.f32 0.015625, %v2211_v43  ;;  %v2251_v18 = vsub.f32 %v6298_v33, %v2227_v62 }
 0x8f3   :  { %v2245_v16 = vsub.f32 %v2233_v29, %v2239_v27 }
 0x8f5   :  { %v2257_v49 = vadd.f32 1e-05, %v2245_v16 }
 0x8f6   :  { %v2190_v57 = vpop.xlane.xlu2 %2189 }
 0x8f7   :  { %4987 = vrsqrt.f32 %v2257_v49  ;;  %v2228_v63 = vmul.f32 0.015625, %v2190_v57  ;;  %vm2269_vm12 = vweird.f32 %v2257_v49 }
 0x8f8   :  { %v2214_v10 = vpop.xlane.xlu1 %2213 }
 0x8f9   :  { %v2240_v45 = vmul.f32 %v2228_v63, %v2228_v63  ;;  %v2234_v47 = vmul.f32 0.015625, %v2214_v10  ;;  %v2252_v61 = vsub.f32 %v6307_v3, %v2228_v63 }
 0x8fb   :  { %v2246_v42 = vsub.f32 %v2234_v47, %v2240_v45 }
 0x8fd   :  { %v4988_v26 = vpop.eup %4987  ;;  %v2258_v15 = vadd.f32 1e-05, %v2246_v42 }
 0x8fe   :  { %v2264_v52 = vmul.f32 %v4988_v26, %v2257_v49  ;;  %vm2270_vm9 = vweird.f32 %v4988_v26 }
 0x8ff   :  { %4989 = vrsqrt.f32 %v2258_v15  ;;  %vm2271_vm15 = vmor %vm2269_vm12, %vm2270_vm9  ;;  %vm2279_vm3 = vweird.f32 %v2258_v15 }
 0x900   :  { %v2265_v51 = vmul.f32 %v4988_v26, %v2264_v52 }
 0x902   :  { %v2266_v13 = vmul.f32 0.5, %v2265_v51 }
 0x904   :  { %v2267_v34 = vsub.f32 1.5, %v2266_v13 }
 0x905   :  { %v4990_v23 = vpop.eup %4989 }
 0x906   :  { %v2268_v7 = vmul.f32 %v4988_v26, %v2267_v34  ;;  %v2274_v6 = vmul.f32 %v4990_v23, %v2258_v15  ;;  %vm2280_vm2 = vweird.f32 %v4990_v23 }
 0x907   :  { %vm2281_vm4 = vmor %vm2279_vm3, %vm2280_vm2 }
 0x908   :  { %v2275_v40 = vmul.f32 %v4990_v23, %v2274_v6  ;;  %v2272_v28 = vsel %vm2271_vm15, %v4988_v26, %v2268_v7 }
 0x909   :  { %v2323_v54 = vmul.f32 %v2272_v28, %v2251_v18 }
 0x90a   :  { %v2276_v31 = vmul.f32 0.5, %v2275_v40 }
 0x90b   :  { %v2332_v9 = vmul.f32 %v6388_v58, %v2323_v54 }
 0x90c   :  { %v2277_v37 = vsub.f32 1.5, %v2276_v31 }
 0x90d   :  { %v2341_v12 = vadd.f32 %v6394_v59, %v2332_v9 }
 0x90e   :  { %v2278_v38 = vmul.f32 %v4990_v23, %v2277_v37 }
 0x910   :  { %v2282_v50 = vsel %vm2281_vm4, %v4990_v23, %v2278_v38 }
 0x911   :  { %v2324_v22 = vmul.f32 %v2282_v50, %v2252_v61 }
 0x913   :  { %v2333_v39 = vmul.f32 %v6388_v58, %v2324_v22 }
 0x914   :  { %v2193_v44 = vpop.xlane.xlu2 %2192 }
 0x915   :  { %v2342_v20 = vadd.f32 %v6394_v59, %v2333_v39  ;;  %v2229_v1 = vmul.f32 0.015625, %v2193_v44 }
 0x916   :  { %v2217_v48 = vpop.xlane.xlu1 %2216 }
 0x917   :  { %v2241_v30 = vmul.f32 %v2229_v1, %v2229_v1  ;;  %v2235_v55 = vmul.f32 0.015625, %v2217_v48  ;;  %v2347_v2 = vpack.c.bf16 %v2342_v20, %v2341_v12  ;;  %v2253_v63 = vsub.f32 %v6316_v25, %v2229_v1 }
 0x919   :  { %v2247_v32 = vsub.f32 %v2235_v55, %v2241_v30  ;;  %4405 = vmatmul.msk.bf16.vlgmr.msra.gmra.mxu3 %vm142_vm1, %v2347_v2  ;;  %4408 = vmatmul.msk.bf16.vlgmr.msra.gmra.mxu0 %vm142_vm1, %v2347_v2 }
 0x91b   :  { %v2259_v62 = vadd.f32 1e-05, %v2247_v32 }
 0x91c   :  { %v2196_v43 = vpop.xlane.xlu0 %2195 }
 0x91d   :  { %4991 = vrsqrt.f32 %v2259_v62  ;;  %v2230_v5 = vmul.f32 0.015625, %v2196_v43  ;;  %vm2289_vm6 = vweird.f32 %v2259_v62 }
 0x91e   :  { %v2220_v8 = vpop.xlane.xlu2 %2219 }
 0x91f   :  { %v2242_v46 = vmul.f32 %v2230_v5, %v2230_v5  ;;  %v2236_v27 = vmul.f32 0.015625, %v2220_v8  ;;  %v2254_v42 = vsub.f32 %v6325_v14, %v2230_v5 }
 0x921   :  { %v2248_v29 = vsub.f32 %v2236_v27, %v2242_v46 }
 0x923   :  { %v4992_v0 = vpop.eup %4991  ;;  %v2260_v35 = vadd.f32 1e-05, %v2248_v29 }
 0x924   :  { %v2284_v11 = vmul.f32 %v4992_v0, %v2259_v62  ;;  %vm2290_vm5 = vweird.f32 %v4992_v0 }
 0x925   :  { %4993 = vrsqrt.f32 %v2260_v35  ;;  %vm2291_vm7 = vmor %vm2289_vm6, %vm2290_vm5  ;;  %vm2299_vm9 = vweird.f32 %v2260_v35 }
 0x926   :  { %v2285_v16 = vmul.f32 %v4992_v0, %v2284_v11 }
 0x928   :  { %v2286_v17 = vmul.f32 0.5, %v2285_v16 }
 0x92a   :  { %v2287_v24 = vsub.f32 1.5, %v2286_v17 }
 0x92b   :  { %v4994_v56 = vpop.eup %4993 }
 0x92c   :  { %v2288_v49 = vmul.f32 %v4992_v0, %v2287_v24  ;;  %v2294_v53 = vmul.f32 %v4994_v56, %v2260_v35  ;;  %vm2300_vm8 = vweird.f32 %v4994_v56 }
 0x92d   :  { %vm2301_vm12 = vmor %vm2299_vm9, %vm2300_vm8 }
 0x92e   :  { %v2295_v60 = vmul.f32 %v4994_v56, %v2294_v53  ;;  %v2292_v57 = vsel %vm2291_vm7, %v4992_v0, %v2288_v49 }
 0x92f   :  { %v2325_v45 = vmul.f32 %v2292_v57, %v2253_v63 }
 0x930   :  { %v2296_v19 = vmul.f32 0.5, %v2295_v60 }
 0x931   :  { %v2334_v52 = vmul.f32 %v6388_v58, %v2325_v45 }
 0x932   :  { %v2297_v10 = vsub.f32 1.5, %v2296_v19 }
 0x933   :  { %v2343_v13 = vadd.f32 %v6394_v59, %v2334_v52 }
 0x934   :  { %v2298_v47 = vmul.f32 %v4994_v56, %v2297_v10 }
 0x936   :  { %v2302_v26 = vsel %vm2301_vm12, %v4994_v56, %v2298_v47 }
 0x937   :  { %v2326_v15 = vmul.f32 %v2302_v26, %v2254_v42 }
 0x939   :  { %v2335_v51 = vmul.f32 %v6388_v58, %v2326_v15 }
 0x93b   :  { %v2344_v34 = vadd.f32 %v6394_v59, %v2335_v51 }
 0x93d   :  { %v2348_v23 = vpack.c.bf16 %v2344_v34, %v2343_v13 }
 0x93f   :  { %4406 = vmatmul.msk.bf16.gmra.mxu3 %vm142_vm1, %v2348_v23  ;;  %4409 = vmatmul.msk.bf16.gmra.mxu0 %vm142_vm1, %v2348_v23 }
 0x954   :  { %v2146_v7 = vpop.f32.mrf.mxu1  ;;  %v2170_v6 = vpop.f32.mrf.mxu2 }
 0x955   :  { %v2147_v40 = vadd.f32 %v6294_v4, %v2146_v7 }
 0x957   :  { %v2171_v28 = vadd.f32 %v2170_v6, %v2147_v40 }
 0x959   :  { %v6412_v31 = vadd.f32 %v2171_v28, %v6204_v21 }
 0x95b   :  { %v2197_v18 = vsel %vm142_vm1, %v6412_v31, 0.0  ;;  %v2207_v37 = vmul.f32 %v6412_v31, %v6412_v31 }
 0x95c   :  { %v2148_v54 = vpop.f32.mrf.mxu1  ;;  %2198 = vadd.xlane.f32.xlu0 %v2197_v18  ;;  %v2172_v50 = vpop.f32.mrf.mxu2 }
 0x95d   :  { %v2149_v38 = vadd.f32 %v6294_v4, %v2148_v54  ;;  %v2221_v61 = vsel %vm142_vm1, %v2207_v37, 0.0  ;;  %v4372_v4 = vld [vmem:[%s7199_s8 + $0x2] sm:$0x3]  ;;  %s7229_s8 = smov 80  }
 0x95e   :  { %2222 = vadd.xlane.f32.xlu2 %v2221_v61  ;;  %v6431_v20 = vperm.slane %v4372_v4, 0  ;;  %v6441_v32 = vperm.slane %v4372_v4, 1 }
 0x95f   :  { %v2173_v9 = vadd.f32 %v2172_v50, %v2149_v38 }
 0x961   :  { %v6421_v22 = vadd.f32 %v2173_v9, %v6213_v41 }
 0x963   :  { %v2200_v21 = vsel %vm142_vm1, %v6421_v22, 0.0  ;;  %v2208_v39 = vmul.f32 %v6421_v22, %v6421_v22 }
 0x964   :  { %2201 = vadd.xlane.f32.xlu1 %v2200_v21 }
 0x965   :  { %v2224_v44 = vsel %vm142_vm1, %v2208_v39, 0.0 }
 0x966   :  { %2225 = vadd.xlane.f32.xlu0 %v2224_v44 }
 0x996   :  { %v2448_v55 = vpop.f32.mrf.mxu0 }
 0x997   :  { %v2449_v27 = vadd.f32 %v2448_v55, %v6441_v32 }
 0x99c   :  { %v2424_v12 = vpop.f32.mrf.mxu3 }
 0x99d   :  { %v2425_v41 = vadd.f32 %v2424_v12, %v6431_v20 }
 0x99e   :  { %v2450_v2 = vpop.f32.mrf.mxu0 }
 0x99f   :  { %v2451_v8 = vadd.f32 %v2450_v2, %v6441_v32 }
 0x9a1   :  { %v6451_v35 = vpack.c.bf16 %v2451_v8, %v2449_v27 }
 0x9a4   :  { %v2426_v1 = vpop.f32.mrf.mxu3 }
 0x9a5   :  { %v2427_v48 = vadd.f32 %v2426_v1, %v6431_v20 }
 0x9a7   :  { %v6435_v30 = vpack.c.bf16 %v2427_v48, %v2425_v41 }
 0x9a9   :  { %2565 = vrot.lane.b32.xlu0 %v6435_v30, %s5163_s3  ;;  %2467 = vrot.lane.b32.xlu2 %v6435_v30, %s5159_s23 }
 0x9bc   :  { %v2453_v62 = vpop.f32.mrf.mxu0 }
 0x9bd   :  { %v2454_v43 = vadd.f32 %v2453_v62, %v6441_v32 }
 0x9bf   :  { %v6444_v5 = vpack.c.bf16 %v2454_v43, %v2454_v43 }
 0x9c1   :  { %v2545_v46 = vsel %vm670_vm11, %v6444_v5, 0 }
 0x9c2   :  { %v2429_v29 = vpop.f32.mrf.mxu3  ;;  %2553 = vmatpush.bf16.msra.mxu2 %v2545_v46 }
 0x9c3   :  { %v2430_v0 = vadd.f32 %v2429_v29, %v6431_v20 }
 0x9c5   :  { %v6453_v11 = vpack.c.bf16 %v2430_v0, %v2430_v0 }
 0x9c6   :  { %2554 = vmatpush.bf16.msra.mxu2 %v6451_v35 }
 0x9c7   :  { %2678 = vrot.lane.b32.xlu2 %v6453_v11, %s5160_s24  ;;  %2571 = vrot.lane.b32.xlu0 %v6453_v11, %s5161_s2 }
 0x9c8   :  { %2469 = vrot.lane.b32.xlu1 %v6453_v11, %s5159_s23 }
 0x9cf   :  { %v2199_v16 = vpop.xlane.xlu0 %2198  ;;  %2676 = vrot.lane.b32.xlu2 %v6435_v30, %s5160_s24  ;;  %2672 = vrot.lane.b32.xlu0 %v6435_v30, %s5165_s27 }
 0x9d0   :  { %v2231_v17 = vmul.f32 0.015625, %v2199_v16  ;;  %2569 = vrot.lane.b32.xlu1 %v6435_v30, %s5161_s2 }
 0x9d1   :  { %v2223_v24 = vpop.xlane.xlu2 %2222 }
 0x9d2   :  { %v2243_v56 = vmul.f32 %v2231_v17, %v2231_v17  ;;  %v2237_v49 = vmul.f32 0.015625, %v2223_v24  ;;  %v2255_v18 = vsub.f32 %v6412_v31, %v2231_v17 }
 0x9d4   :  { %v2249_v53 = vsub.f32 %v2237_v49, %v2243_v56 }
 0x9d6   :  { %v2261_v60 = vadd.f32 1e-05, %v2249_v53 }
 0x9d7   :  { %2777 = vrot.lane.b32.xlu2 %v6435_v30, %s7229_s8  ;;  %2783 = vrot.lane.b32.xlu0 %v6453_v11, %s7230_s25  ;;  %v2202_v57 = vpop.xlane.xlu1 %2201 }
 0x9d8   :  { %4995 = vrsqrt.f32 %v2261_v60  ;;  %2567 = vrot.lane.b32.xlu1 %v6453_v11, %s5163_s3  ;;  %v2232_v19 = vmul.f32 0.015625, %v2202_v57  ;;  %vm2309_vm2 = vweird.f32 %v2261_v60 }
 0x9d9   :  { %v2226_v63 = vpop.xlane.xlu0 %2225 }
 0x9da   :  { %v2244_v10 = vmul.f32 %v2232_v19, %v2232_v19  ;;  %v2238_v45 = vmul.f32 0.015625, %v2226_v63  ;;  %v2256_v61 = vsub.f32 %v6421_v22, %v2232_v19 }
 0x9dc   :  { %v2250_v47 = vsub.f32 %v2238_v45, %v2244_v10 }
 0x9de   :  { %v4996_v42 = vpop.eup %4995  ;;  %v2262_v26 = vadd.f32 1e-05, %v2250_v47 }
 0x9df   :  { %v2304_v15 = vmul.f32 %v4996_v42, %v2261_v60  ;;  %2779 = vrot.lane.b32.xlu2 %v6453_v11, %s7229_s8  ;;  %vm2310_vm15 = vweird.f32 %v4996_v42  ;;  %v2431_v60 = vpop.f32.mrf.mxu3 }
 0x9e0   :  { %4997 = vrsqrt.f32 %v2262_v26  ;;  %2781 = vrot.lane.b32.xlu1 %v6435_v30, %s7230_s25  ;;  %vm2311_vm3 = vmor %vm2309_vm2, %vm2310_vm15  ;;  %vm2319_vm5 = vweird.f32 %v2262_v26  ;;  %v2432_v57 = vadd.f32 %v2431_v60, %v6431_v20 }
 0x9e1   :  { %v2305_v52 = vmul.f32 %v4996_v42, %v2304_v15 }
 0x9e3   :  { %v2306_v51 = vmul.f32 0.5, %v2305_v52 }
 0x9e5   :  { %v2307_v13 = vsub.f32 1.5, %v2306_v51 }
 0x9e6   :  { %v4998_v34 = vpop.eup %4997 }
 0x9e7   :  { %v2308_v23 = vmul.f32 %v4996_v42, %v2307_v13  ;;  %v2314_v7 = vmul.f32 %v4998_v34, %v2262_v26  ;;  %vm2320_vm4 = vweird.f32 %v4998_v34 }
 0x9e8   :  { %2674 = vrot.lane.b32.xlu1 %v6453_v11, %s5165_s27  ;;  %vm2321_vm6 = vmor %vm2319_vm5, %vm2320_vm4 }
 0x9e9   :  { %v2315_v6 = vmul.f32 %v4998_v34, %v2314_v7  ;;  %v2312_v40 = vsel %vm2311_vm3, %v4996_v42, %v2308_v23  ;;  %v6545_v42 = vpop.f32.mrf.mxu0 }
 0x9ea   :  { %v2327_v54 = vmul.f32 %v2312_v40, %v2255_v18 }
 0x9eb   :  { %v2316_v28 = vmul.f32 0.5, %v2315_v6 }
 0x9ec   :  { %v2336_v21 = vmul.f32 %v6388_v58, %v2327_v54 }
 0x9ed   :  { %v2317_v37 = vsub.f32 1.5, %v2316_v28 }
 0x9ee   :  { %v2345_v44 = vadd.f32 %v6394_v59, %v2336_v21 }
 0x9ef   :  { %v2318_v38 = vmul.f32 %v4998_v34, %v2317_v37 }
 0x9f1   :  { %v2322_v50 = vsel %vm2321_vm6, %v4998_v34, %v2318_v38 }
 0x9f2   :  { %v2328_v9 = vmul.f32 %v2322_v50, %v2256_v61 }
 0x9f4   :  { %v2337_v39 = vmul.f32 %v6388_v58, %v2328_v9 }
 0x9f6   :  { %v2346_v12 = vadd.f32 %v6394_v59, %v2337_v39 }
 0x9f8   :  { %v2349_v4 = vpack.c.bf16 %v2346_v12, %v2345_v44 }
 0x9fa   :  { %4407 = vmatmul.msk.bf16.gmra.mxu3 %vm142_vm1, %v2349_v4  ;;  %4410 = vmatmul.msk.bf16.gmra.mxu0 %vm142_vm1, %v2349_v4 }
 0xa03   :  { %v2468_v1 = vpop.permute.xlu2 %2467 }
 0xa04   :  { %v2478_v27 = vsel %vm595_vm10, %v2468_v1, 0 }
 0xa1b   :  { %v2566_v62 = vpop.permute.xlu0 %2565 }
 0xa21   :  { %v2679_v41 = vpop.permute.xlu2 %2678 }
 0xa22   :  { %v2690_v48 = vsel %vm595_vm10, %v2679_v41, 0 }
 0xa23   :  { %2698 = vmatpush.bf16.xpose.msrb.mxu0 %v2690_v48 }
 0xa29   :  { %v2677_v55 = vpop.permute.xlu2 %2676 }
 0xa2a   :  { %v2687_v2 = vsel %vm595_vm10, %v2677_v55, 0 }
 0xa2b   :  { %2699 = vmatpush.bf16.xpose.msrb.mxu0 %v2687_v2 }
 0xa31   :  { %v2778_v47 = vpop.permute.xlu2 %2777 }
 0xa39   :  { %v2572_v58 = vpop.permute.xlu0 %2571 }
 0xa3a   :  { %v2470_v43 = vpop.permute.xlu1 %2469  ;;  %v2583_v29 = vsel %vm595_vm10, %v2572_v58, 0 }
 0xa3b   :  { %v2481_v8 = vsel %vm595_vm10, %v2470_v43, 0 }
 0xa3c   :  { %2489 = vmatpush.bf16.xpose.msrb.mxu1 %v2481_v8 }
 0xa41   :  { %v2673_v59 = vpop.permute.xlu0 %2672 }
 0xa42   :  { %v2570_v46 = vpop.permute.xlu1 %2569  ;;  %4419 = vmatmul.msk.bf16.vlgmr.msrb.gmra.mxu0 %vm595_vm10, %v2673_v59 }
 0xa43   :  { %v2580_v17 = vsel %vm595_vm10, %v2570_v46, 0 }
 0xa44   :  { %2490 = vmatpush.bf16.xpose.msrb.mxu1 %v2478_v27 }
 0xa49   :  { %v2784_v0 = vpop.permute.xlu0 %2783 }
 0xa4a   :  { %v2568_v16 = vpop.permute.xlu1 %2567  ;;  %v2795_v24 = vsel %vm595_vm10, %v2784_v0, 0 }
 0xa4b   :  { %4411 = vmatmul.msk.bf16.vlgmr.msrb.gmra.mxu1 %vm595_vm10, %v6435_v30 }
 0xa4c   :  { %2591 = vmatpush.bf16.xpose.msra.mxu1 %v2583_v29 }
 0xa52   :  { %v2782_v56 = vpop.permute.xlu1 %2781 }
 0xa53   :  { %v2792_v49 = vsel %vm595_vm10, %v2782_v56, 0 }
 0xa54   :  { %2592 = vmatpush.bf16.xpose.msra.mxu1 %v2580_v17 }
 0xa5a   :  { %v2675_v53 = vpop.permute.xlu1 %2674 }
 0xa5b   :  { %4412 = vmatmul.msk.bf16.gmra.mxu1 %vm595_vm10, %v6453_v11  ;;  %4420 = vmatmul.msk.bf16.gmra.mxu0 %vm595_vm10, %v2675_v53 }
 0xa5c   :  { %2803 = vmatpush.bf16.xpose.msrb.mxu1 %v2795_v24 }
 0xa64   :  { %2804 = vmatpush.bf16.xpose.msrb.mxu1 %v2792_v49 }
 0xa6b   :  { %4415 = vmatmul.msk.bf16.vlgmr.msra.gmra.mxu1 %vm595_vm10, %v2566_v62 }
 0xa77   :  { %v6551_v26 = vpop.f32.mrf.mxu0 }
 0xa7b   :  { %4416 = vmatmul.msk.bf16.gmra.mxu1 %vm595_vm10, %v2568_v16 }
 0xa7d   :  { %v2434_v30 = vpop.f32.mrf.mxu3 }
 0xa7e   :  { %v2435_v19 = vadd.f32 %v2434_v30, %v6431_v20 }
 0xa7f   :  { %v6553_v15 = vpop.f32.mrf.mxu0 }
 0xa80   :  { %v6506_v63 = vpack.c.bf16 %v2435_v19, %v2432_v57 }
 0xa82   :  { %3033 = vrot.lane.b32.xlu2 %v6506_v63, %s5161_s2 }
 0xa85   :  { %v2436_v10 = vpop.f32.mrf.mxu3 }
 0xa86   :  { %v2437_v11 = vadd.f32 %v2436_v10, %v6431_v20  ;;  %v2780_v20 = vpop.permute.xlu2 %2779 }
 0xa88   :  { %v6511_v45 = vpack.c.bf16 %v2437_v11, %v2437_v11 }
 0xa8a   :  { %3035 = vrot.lane.b32.xlu1 %v6511_v45, %s5161_s2  ;;  %2933 = vrot.lane.b32.xlu0 %v6511_v45, %s5159_s23 }
 0xa8b   :  { %3031 = vrot.lane.b32.xlu2 %v6511_v45, %s5163_s3  ;;  %4423 = vmatmul.msk.bf16.vlgmr.msrb.gmra.mxu1 %vm595_vm10, %v2778_v47 }
 0xa92   :  { %3029 = vrot.lane.b32.xlu1 %v6506_v63, %s5163_s3  ;;  %2931 = vrot.lane.b32.xlu0 %v6506_v63, %s5159_s23 }
 0xa93   :  { %3245 = vrot.lane.b32.xlu2 %v6506_v63, %s7230_s25 }
 0xa9a   :  { %3247 = vrot.lane.b32.xlu1 %v6511_v45, %s7230_s25  ;;  %3142 = vrot.lane.b32.xlu0 %v6511_v45, %s5160_s24 }
 0xa9b   :  { %2640 = vrot.lane.b32.xlu2 %v6451_v35, %s5163_s3  ;;  %4424 = vmatmul.msk.bf16.gmra.mxu1 %vm595_vm10, %v2780_v20 }
 0xaa2   :  { %3136 = vrot.lane.b32.xlu1 %v6506_v63, %s5165_s27  ;;  %3140 = vrot.lane.b32.xlu0 %v6506_v63, %s5160_s24 }
 0xaa3   :  { %2747 = vrot.lane.b32.xlu2 %v6444_v5, %s5165_s27 }
 0xaaa   :  { %2642 = vrot.lane.b32.xlu1 %v6444_v5, %s5163_s3  ;;  %3241 = vrot.lane.b32.xlu0 %v6506_v63, %s7229_s8 }
 0xaab   :  { %2850 = vrot.lane.b32.xlu2 %v6451_v35, %s7229_s8 }
 0xab2   :  { %2745 = vrot.lane.b32.xlu1 %v6451_v35, %s5165_s27  ;;  %2852 = vrot.lane.b32.xlu0 %v6444_v5, %s7229_s8 }
 0xabf   :  { %v2701_v52 = vpop.f32.mrf.mxu0 }
 0xac0   :  { %v6561_v35 = vadd.f32 %v2701_v52, %v5692_v36 }
 0xac2   :  { %v2710_v28 = vsel %vm626_vm13, %v6561_v35, -inf }
 0xac7   :  { %v2703_v34 = vpop.f32.mrf.mxu0 }
 0xac8   :  { %v2492_v51 = vpop.f32.mrf.mxu1  ;;  %v6571_v54 = vadd.f32 %v2703_v34, %v5692_v36 }
 0xac9   :  { %v6556_v13 = vadd.f32 %v2492_v51, %v5692_v36 }
 0xaca   :  { %v2713_v50 = vsel %vm626_vm13, %v6571_v54, -inf }
 0xacb   :  { %v2501_v7 = vsel %vm626_vm13, %v6556_v13, -inf }
 0xad0   :  { %v2494_v23 = vpop.f32.mrf.mxu1 }
 0xad1   :  { %v6564_v5 = vadd.f32 %v2494_v23, %v5692_v36 }
 0xad3   :  { %v2504_v18 = vsel %vm626_vm13, %v6564_v5, -inf }
 0xad4   :  { %2502 = vmax.xlane.f32.xlu2 %v2501_v7 }
 0xad8   :  { %v2497_v6 = vpop.f32.mrf.mxu1  ;;  %v2706_v40 = vpop.f32.mrf.mxu0 }
 0xad9   :  { %v6576_v21 = vadd.f32 %v2497_v6, %v5692_v36  ;;  %v6586_v41 = vadd.f32 %v2706_v40, %v5692_v36 }
 0xadb   :  { %v2507_v4 = vsel %vm626_vm13, %v6576_v21, -inf  ;;  %v2716_v62 = vsel %vm626_vm13, %v6586_v41, -inf }
 0xadc   :  { %v3034_v37 = vpop.permute.xlu2 %3033  ;;  %2711 = vmax.xlane.f32.xlu0 %v2710_v28  ;;  %2505 = vmax.xlane.f32.xlu1 %v2504_v18 }
 0xadd   :  { %v3044_v53 = vsel %vm595_vm10, %v3034_v37, 0 }
 0xae0   :  { %v2499_v38 = vpop.f32.mrf.mxu1  ;;  %v2708_v61 = vpop.f32.mrf.mxu0 }
 0xae4   :  { %2714 = vmax.xlane.f32.xlu1 %v2713_v50 }
 0xae5   :  { %v3032_v9 = vpop.permute.xlu2 %3031 }
 0xae8   :  { %v2594_v39 = vpop.f32.mrf.mxu1 }
 0xae9   :  { %v6579_v44 = vadd.f32 %v2594_v39, %v5692_v36 }
 0xaeb   :  { %v2603_v12 = vsel %vm626_vm13, %v6579_v44, -inf }
 0xaec   :  { %2604 = vmax.xlane.f32.xlu0 %v2603_v12  ;;  %2508 = vmax.xlane.f32.xlu1 %v2507_v4 }
 0xaed   :  { %v3246_v1 = vpop.permute.xlu2 %3245 }
 0xaee   :  { %v3256_v23 = vsel %vm595_vm10, %v3246_v1, 0 }
 0xaf0   :  { %v2596_v48 = vpop.f32.mrf.mxu1 }
 0xaf1   :  { %v6589_v55 = vadd.f32 %v2596_v48, %v5692_v36 }
 0xaf3   :  { %v2606_v2 = vsel %vm626_vm13, %v6589_v55, -inf }
 0xaf4   :  { %2607 = vmax.xlane.f32.xlu2 %v2606_v2  ;;  %2717 = vmax.xlane.f32.xlu1 %v2716_v62 }
 0xaf5   :  { %v2641_v58 = vpop.permute.xlu2 %2640 }
 0xaf8   :  { %v2599_v43 = vpop.f32.mrf.mxu1 }
 0xaf9   :  { %v6596_v8 = vadd.f32 %v2599_v43, %v5692_v36 }
 0xafb   :  { %v2609_v59 = vsel %vm626_vm13, %v6596_v8, -inf }
 0xafc   :  { %2610 = vmax.xlane.f32.xlu2 %v2609_v59  ;;  %v2934_v46 = vpop.permute.xlu0 %2933  ;;  %v3036_v27 = vpop.permute.xlu1 %3035 }
 0xafd   :  { %v2945_v29 = vsel %vm595_vm10, %v2934_v46, 0  ;;  %v2748_v0 = vpop.permute.xlu2 %2747  ;;  %v3047_v16 = vsel %vm595_vm10, %v3036_v27, 0 }
 0xafe   :  { %v2757_v17 = vsel %vm670_vm11, %v2748_v0, 0  ;;  %2953 = vmatpush.bf16.xpose.msra.mxu0 %v2945_v29  ;;  %3055 = vmatpush.bf16.xpose.msra.mxu1 %v3047_v16 }
 0xaff   :  { %2765 = vmatpush.bf16.msrb.mxu2 %v2757_v17 }
 0xb00   :  { %v2601_v24 = vpop.f32.mrf.mxu1 }
 0xb04   :  { %v2932_v56 = vpop.permute.xlu0 %2931  ;;  %v3030_v49 = vpop.permute.xlu1 %3029 }
 0xb05   :  { %v2942_v60 = vsel %vm595_vm10, %v2932_v56, 0  ;;  %v2851_v50 = vpop.permute.xlu2 %2850 }
 0xb06   :  { %2954 = vmatpush.bf16.xpose.msra.mxu0 %v2942_v60  ;;  %3056 = vmatpush.bf16.xpose.msra.mxu1 %v3044_v53 }
 0xb08   :  { %v2806_v30 = vpop.f32.mrf.mxu1 }
 0xb09   :  { %v6606_v57 = vadd.f32 %v2806_v30, %v5692_v36 }
 0xb0b   :  { %v2815_v19 = vsel %vm626_vm13, %v6606_v57, -inf }
 0xb0c   :  { %2816 = vmax.xlane.f32.xlu2 %v2815_v19  ;;  %v3143_v10 = vpop.permute.xlu0 %3142  ;;  %v3248_v11 = vpop.permute.xlu1 %3247 }
 0xb0d   :  { %v3154_v47 = vsel %vm595_vm10, %v3143_v10, 0  ;;  %v3259_v20 = vsel %vm595_vm10, %v3248_v11, 0  ;;  %4427 = vmatmul.msk.bf16.vlgmr.msra.gmra.mxu0 %vm595_vm10, %v6506_v63  ;;  %4431 = vmatmul.msk.bf16.vlgmr.msra.gmra.mxu1 %vm595_vm10, %v3030_v49 }
 0xb0e   :  { %3162 = vmatpush.bf16.xpose.msrb.mxu0 %v3154_v47  ;;  %3267 = vmatpush.bf16.xpose.msrb.mxu1 %v3259_v20 }
 0xb10   :  { %v2808_v52 = vpop.f32.mrf.mxu1 }
 0xb11   :  { %v6658_v47 = vadd.f32 %v2808_v52, %v5692_v36 }
 0xb14   :  { %v3141_v51 = vpop.permute.xlu0 %3140  ;;  %v3137_v34 = vpop.permute.xlu1 %3136 }
 0xb15   :  { %v3151_v7 = vsel %vm595_vm10, %v3141_v51, 0 }
 0xb16   :  { %3163 = vmatpush.bf16.xpose.msrb.mxu0 %v3151_v7  ;;  %3268 = vmatpush.bf16.xpose.msrb.mxu1 %v3256_v23 }
 0xb18   :  { %v6617_v6 = vpop.f32.mrf.mxu1 }
 0xb1c   :  { %v3242_v40 = vpop.permute.xlu0 %3241  ;;  %v2643_v28 = vpop.permute.xlu1 %2642 }
 0xb1d   :  { %v2652_v18 = vsel %vm670_vm11, %v2643_v28, 0  ;;  %4428 = vmatmul.msk.bf16.gmra.mxu0 %vm595_vm10, %v6511_v45  ;;  %4432 = vmatmul.msk.bf16.gmra.mxu1 %vm595_vm10, %v3032_v9 }
 0xb1e   :  { %2660 = vmatpush.bf16.msrb.mxu3 %v2652_v18 }
 0xb20   :  { %v2813_v63 = vpop.f32.mrf.mxu1 }
 0xb21   :  { %v6674_v63 = vadd.f32 %v6617_v6, %v5692_v36 }
 0xb22   :  { %2661 = vmatpush.bf16.msrb.mxu3 %v2641_v58 }
 0xb24   :  { %v2853_v37 = vpop.permute.xlu0 %2852  ;;  %v2746_v38 = vpop.permute.xlu1 %2745 }
 0xb25   :  { %v2862_v61 = vsel %vm670_vm11, %v2853_v37, 0  ;;  %2766 = vmatpush.bf16.msrb.mxu2 %v2746_v38 }
 0xb26   :  { %2870 = vmatpush.bf16.msra.mxu3 %v2862_v61 }
 0xb2a   :  { %2871 = vmatpush.bf16.msra.mxu3 %v2851_v50 }
 0xb2d   :  { %4435 = vmatmul.msk.bf16.vlgmr.msrb.gmra.mxu0 %vm595_vm10, %v3137_v34  ;;  %4439 = vmatmul.msk.bf16.vlgmr.msrb.gmra.mxu1 %vm595_vm10, %v3242_v40  ;;  %v2818_v40 = vsel %vm626_vm13, %v6658_v47, -inf }
 0xb47   :  { %v2503_v28 = vpop.xlane.xlu2 %2502 }
 0xb48   :  { %v2510_v61 = vsub.f32 %v6556_v13, %v2503_v28 }
 0xb4a   :  { %v2513_v6 = vmul.f32 1.442695, %v2510_v61 }
 0xb4f   :  { %v2506_v27 = vpop.xlane.xlu1 %2505  ;;  %v2712_v37 = vpop.xlane.xlu0 %2711 }
 0xb50   :  { %v2511_v24 = vsub.f32 %v6564_v5, %v2506_v27  ;;  %v2719_v13 = vsub.f32 %v6561_v35, %v2712_v37 }
 0xb52   :  { %v2515_v49 = vmul.f32 1.442695, %v2511_v24  ;;  %v2722_v27 = vmul.f32 1.442695, %v2719_v13 }
 0xb54   :  { %4999 = vpow2.f32 %v2515_v49 }
 0xb57   :  { %v2715_v56 = vpop.xlane.xlu1 %2714 }
 0xb58   :  { %v2720_v35 = vsub.f32 %v6571_v54, %v2715_v56 }
 0xb5a   :  { %v6660_v51 = vpop.eup %4999  ;;  %v2724_v24 = vmul.f32 1.442695, %v2720_v35 }
 0xb5b   :  { %v2522_v52 = vsel %vm626_vm13, %v6660_v51, 0.0 }
 0xb5f   :  { %v2509_v5 = vpop.xlane.xlu1 %2508 }
 0xb60   :  { %v2512_v23 = vsub.f32 %v6576_v21, %v2509_v5 }
 0xb62   :  { %v2517_v18 = vmul.f32 1.442695, %v2512_v23  ;;  %v2461_v23 = vadd.f32 %v6553_v15, %v6441_v32 }
 0xb64   :  { %5001 = vpow2.f32 %v2517_v18 }
 0xb65   :  { %5003 = vpow2.f32 %v2513_v6 }
 0xb67   :  { %v2718_v21 = vpop.xlane.xlu1 %2717 }
 0xb68   :  { %v2721_v50 = vsub.f32 %v6586_v41, %v2718_v21 }
 0xb8a   :  { %v2956_v39 = vpop.f32.mrf.mxu0  ;;  %v3058_v12 = vpop.f32.mrf.mxu1 }
 0xb8b   :  { %v6627_v4 = vadd.f32 %v2956_v39, %v5692_v36  ;;  %v6677_v38 = vadd.f32 %v3058_v12, %v5692_v36  ;;  %v2821_v39 = vsel %vm626_vm13, %v6674_v63, -inf  ;;  %v6688_v12 = vpop.eup %5001 }
 0xb8d   :  { %v2965_v9 = vsel %vm626_vm13, %v6627_v4, -inf }
 0xb8e   :  { %2966 = vmax.xlane.f32.xlu0 %v2965_v9  ;;  %v3067_v9 = vsel %vm626_vm13, %v6677_v38, -inf }
 0xb92   :  { %v2958_v1 = vpop.f32.mrf.mxu0  ;;  %v3060_v48 = vpop.f32.mrf.mxu1 }
 0xb93   :  { %v6632_v2 = vadd.f32 %v2958_v1, %v5692_v36  ;;  %v6635_v62 = vadd.f32 %v3060_v48, %v5692_v36  ;;  %v2726_v1 = vmul.f32 1.442695, %v2721_v50  ;;  %v2605_v48 = vpop.xlane.xlu0 %2604 }
 0xb94   :  { %v2612_v41 = vsub.f32 %v6579_v44, %v2605_v48 }
 0xb95   :  { %v2968_v58 = vsel %vm626_vm13, %v6632_v2, -inf  ;;  %v3070_v43 = vsel %vm626_vm13, %v6635_v62, -inf  ;;  %5005 = vpow2.f32 %v2726_v1 }
 0xb96   :  { %2969 = vmax.xlane.f32.xlu0 %v2968_v58  ;;  %3071 = vmax.xlane.f32.xlu1 %v3070_v43  ;;  %5007 = vpow2.f32 %v2722_v27 }
 0xb9a   :  { %v2961_v59 = vpop.f32.mrf.mxu0  ;;  %v3063_v46 = vpop.f32.mrf.mxu1 }
 0xb9b   :  { %v6642_v29 = vadd.f32 %v2961_v59, %v5692_v36  ;;  %v6686_v58 = vadd.f32 %v3063_v46, %v5692_v36  ;;  %v2525_v59 = vsel %vm626_vm13, %v6688_v12, 0.0  ;;  %v6696_v46 = vpop.eup %5003 }
 0xb9c   :  { %v2519_v44 = vsel %vm626_vm13, %v6696_v46, 0.0 }
 0xb9d   :  { %v2971_v0 = vsel %vm626_vm13, %v6642_v29, -inf  ;;  %v3073_v43 = vsel %vm626_vm13, %v6686_v58, -inf }
 0xb9e   :  { %2972 = vmax.xlane.f32.xlu0 %v2971_v0  ;;  %v2615_v0 = vmul.f32 1.442695, %v2612_v41 }
 0xba0   :  { %5009 = vpow2.f32 %v2615_v0 }
 0xba1   :  { %5011 = vpow2.f32 %v2724_v24 }
 0xba2   :  { %v2963_v16 = vpop.f32.mrf.mxu0  ;;  %v3065_v17 = vpop.f32.mrf.mxu1 }
 0xba3   :  { %v6698_v16 = vpop.eup %5005 }
 0xba4   :  { %v2734_v17 = vsel %vm626_vm13, %v6698_v16, 0.0  ;;  %v6705_v49 = vpop.eup %5007 }
 0xbaa   :  { %v3165_v53 = vpop.f32.mrf.mxu0  ;;  %v3270_v60 = vpop.f32.mrf.mxu1 }
 0xbab   :  { %v6648_v30 = vadd.f32 %v3165_v53, %v5692_v36  ;;  %v6651_v19 = vadd.f32 %v3270_v60, %v5692_v36  ;;  %v6707_v53 = vpop.eup %5009  ;;  %v2728_v60 = vsel %vm626_vm13, %v6705_v49, 0.0 }
 0xbac   :  { %v2621_v54 = vsel %vm626_vm13, %v6707_v53, 0.0  ;;  %v6713_v56 = vpop.eup %5011 }
 0xbad   :  { %v3279_v10 = vsel %vm626_vm13, %v6651_v19, -inf  ;;  %v3174_v11 = vsel %vm626_vm13, %v6648_v30, -inf }
 0xbae   :  { %3280 = vmax.xlane.f32.xlu1 %v3279_v10  ;;  %3175 = vmax.xlane.f32.xlu0 %v3174_v11  ;;  %v2731_v10 = vsel %vm626_vm13, %v6713_v56, 0.0 }
 0xbb2   :  { %v3167_v20 = vpop.f32.mrf.mxu0  ;;  %v3272_v11 = vpop.f32.mrf.mxu1 }
 0xbb3   :  { %v6663_v34 = vadd.f32 %v3167_v20, %v5692_v36  ;;  %v6718_v5 = vadd.f32 %v3272_v11, %v5692_v36 }
 0xbb5   :  { %v3177_v7 = vsel %vm626_vm13, %v6663_v34, -inf  ;;  %v3282_v20 = vsel %vm626_vm13, %v6718_v5, -inf }
 0xbb6   :  { %3178 = vmax.xlane.f32.xlu2 %v3177_v7  ;;  %2819 = vmax.xlane.f32.xlu0 %v2818_v40  ;;  %v6724_v7 = vpack.c.bf16 %v2461_v23, %v2461_v23  ;;  %v2608_v40 = vpop.xlane.xlu2 %2607 }
 0xbb7   :  { %2523 = vadd.xlane.f32.xlu1 %v2522_v52  ;;  %v2613_v18 = vsub.f32 %v6589_v55, %v2608_v40 }
 0xbb9   :  { %v2617_v21 = vmul.f32 1.442695, %v2613_v18 }
 0xbbe   :  { %2822 = vmax.xlane.f32.xlu2 %v2821_v39  ;;  %3068 = vmax.xlane.f32.xlu0 %v3067_v9  ;;  %v2611_v61 = vpop.xlane.xlu2 %2610 }
 0xbbf   :  { %v2614_v15 = vsub.f32 %v6596_v8, %v2611_v61 }
 0xbc6   :  { %3074 = vmax.xlane.f32.xlu0 %v3073_v43  ;;  %2526 = vadd.xlane.f32.xlu2 %v2525_v59  ;;  %v2817_v55 = vpop.xlane.xlu2 %2816 }
 0xbce   :  { %2520 = vadd.xlane.f32.xlu0 %v2519_v44  ;;  %2735 = vadd.xlane.f32.xlu2 %v2734_v17 }
 0xbd6   :  { %2729 = vadd.xlane.f32.xlu0 %v2728_v60  ;;  %2622 = vadd.xlane.f32.xlu2 %v2621_v54 }
 0xbde   :  { %2732 = vadd.xlane.f32.xlu0 %v2731_v10 }
 0xbe6   :  { %3283 = vmax.xlane.f32.xlu0 %v3282_v20 }
 0xbee   :  { %3106 = vrot.lane.b32.xlu2 %v6724_v7, %s5163_s3 }
 0xc01   :  { %v2967_v52 = vpop.xlane.xlu0 %2966 }
 0xc02   :  { %v2974_v28 = vsub.f32 %v6627_v4, %v2967_v52  ;;  %v2619_v4 = vmul.f32 1.442695, %v2614_v15 }
 0xc04   :  { %v2977_v37 = vmul.f32 1.442695, %v2974_v28 }
 0xc06   :  { %5013 = vpow2.f32 %v2977_v37 }
 0xc07   :  { %5015 = vpow2.f32 %v2617_v21 }
 0xc09   :  { %v2970_v50 = vpop.xlane.xlu0 %2969  ;;  %v6759_v40 = vpop.xlane.xlu1 %3071 }
 0xc0a   :  { %v2975_v39 = vsub.f32 %v6632_v2, %v2970_v50  ;;  %v2824_v2 = vsub.f32 %v6606_v57, %v2817_v55 }
 0xc0c   :  { %v6731_v9 = vpop.eup %5013  ;;  %v2979_v6 = vmul.f32 1.442695, %v2975_v39  ;;  %v2827_v43 = vmul.f32 1.442695, %v2824_v2 }
 0xc0d   :  { %v2983_v1 = vsel %vm626_vm13, %v6731_v9, 0.0  ;;  %v6736_v48 = vpop.eup %5015 }
 0xc0e   :  { %5017 = vpow2.f32 %v2979_v6  ;;  %2984 = vadd.xlane.f32.xlu0 %v2983_v1  ;;  %v2624_v41 = vsel %vm626_vm13, %v6736_v48, 0.0 }
 0xc0f   :  { %5019 = vpow2.f32 %v2619_v4 }
 0xc10   :  { %5021 = vpow2.f32 %v2827_v43  ;;  %v2459_v43 = vadd.f32 %v6551_v26, %v6441_v32 }
 0xc11   :  { %v2973_v59 = vpop.xlane.xlu0 %2972 }
 0xc12   :  { %v2976_v0 = vsub.f32 %v6642_v29, %v2973_v59 }
 0xc14   :  { %v6738_v13 = vpop.eup %5017  ;;  %v2981_v57 = vmul.f32 1.442695, %v2976_v0 }
 0xc15   :  { %v2986_v8 = vsel %vm626_vm13, %v6738_v13, 0.0  ;;  %v6745_v27 = vpop.eup %5019 }
 0xc16   :  { %2625 = vadd.xlane.f32.xlu0 %v2624_v41  ;;  %v2627_v35 = vsel %vm626_vm13, %v6745_v27, 0.0  ;;  %v6750_v17 = vpop.eup %5021  ;;  %5023 = vpow2.f32 %v2981_v57  ;;  %v3009_v57 = vsel %vm670_vm11, %v6724_v7, 0 }
 0xc17   :  { %2987 = vadd.xlane.f32.xlu2 %v2986_v8  ;;  %v2833_v60 = vsel %vm626_vm13, %v6750_v17, 0.0 }
 0xc1c   :  { %v6755_v20 = vpop.eup %5023 }
 0xc1e   :  { %2628 = vadd.xlane.f32.xlu0 %v2627_v35  ;;  %v2456_v35 = vadd.f32 %v6545_v42, %v6441_v32 }
 0xc21   :  { %v3176_v44 = vpop.xlane.xlu0 %3175  ;;  %v6765_v21 = vpop.xlane.xlu1 %3280 }
 0xc22   :  { %v3183_v24 = vsub.f32 %v6648_v30, %v3176_v44  ;;  %v2989_v30 = vsel %vm626_vm13, %v6755_v20, 0.0  ;;  %v6790_v44 = vpack.c.bf16 %v2459_v43, %v2456_v35 }
 0xc24   :  { %v3186_v54 = vmul.f32 1.442695, %v3183_v24 }
 0xc26   :  { %2834 = vadd.xlane.f32.xlu0 %v2833_v60  ;;  %5025 = vpow2.f32 %v3186_v54 }
 0xc29   :  { %v3179_v10 = vpop.xlane.xlu2 %3178  ;;  %v2820_v11 = vpop.xlane.xlu0 %2819 }
 0xc2a   :  { %v3184_v29 = vsub.f32 %v6663_v34, %v3179_v10  ;;  %v2825_v23 = vsub.f32 %v6658_v47, %v2820_v11  ;;  %v2524_v6 = vpop.xlane.xlu1 %2523 }
 0xc2c   :  { %v3188_v52 = vmul.f32 1.442695, %v3184_v29  ;;  %v2829_v28 = vmul.f32 1.442695, %v2825_v23  ;;  %v6763_v37 = vpop.eup %5025  ;;  %v3077_v23 = vsub.f32 %v6635_v62, %v6759_v40 }
 0xc2d   :  { %v3192_v47 = vsel %vm626_vm13, %v6763_v37, 0.0 }
 0xc2e   :  { %5027 = vpow2.f32 %v3188_v52  ;;  %2990 = vadd.xlane.f32.xlu0 %v2989_v30 }
 0xc2f   :  { %5029 = vpow2.f32 %v2829_v28 }
 0xc30   :  { %5031 = vrcp.f32 %v2524_v6 }
 0xc31   :  { %v3069_v18 = vpop.xlane.xlu0 %3068  ;;  %v2823_v1 = vpop.xlane.xlu2 %2822 }
 0xc32   :  { %v2826_v10 = vsub.f32 %v6674_v63, %v2823_v1 }
 0xc34   :  { %v6767_v61 = vpop.eup %5027 }
 0xc35   :  { %v6769_v34 = vpop.eup %5029  ;;  %v3195_v50 = vsel %vm626_vm13, %v6767_v61, 0.0 }
 0xc36   :  { %v2836_v39 = vsel %vm626_vm13, %v6769_v34, 0.0  ;;  %3193 = vadd.xlane.f32.xlu0 %v3192_v47  ;;  %3196 = vadd.xlane.f32.xlu2 %v3195_v50  ;;  %v5032_v55 = vpop.eup %5031 }
 0xc37   :  { %2837 = vadd.xlane.f32.xlu1 %v2836_v39  ;;  %v2532_v41 = vmul.f32 %v5032_v55, %v6660_v51 }
 0xc39   :  { %v6777_v15 = vpop.xlane.xlu0 %3074  ;;  %v2527_v59 = vpop.xlane.xlu2 %2526 }
 0xc3a   :  { %v3078_v62 = vsub.f32 %v6686_v58, %v6777_v15 }
 0xc41   :  { %v2521_v4 = vpop.xlane.xlu0 %2520  ;;  %v2736_v11 = vpop.xlane.xlu2 %2735 }
 0xc42   :  { %5033 = vrcp.f32 %v2521_v4 }
 0xc43   :  { %5035 = vrcp.f32 %v2527_v59 }
 0xc48   :  { %v5034_v2 = vpop.eup %5033 }
 0xc49   :  { %v2531_v8 = vmul.f32 %v5034_v2, %v6696_v46  ;;  %v2730_v26 = vpop.xlane.xlu0 %2729  ;;  %v5036_v32 = vpop.eup %5035 }
 0xc4a   :  { %3138 = vrot.lane.b32.xlu0 %v6511_v45, %s5165_s27  ;;  %v2533_v42 = vmul.f32 %v5036_v32, %v6688_v12  ;;  %v2831_v12 = vmul.f32 1.442695, %v2826_v10  ;;  %v2623_v47 = vpop.xlane.xlu2 %2622 }
 0xc4b   :  { %v2534_v0 = vpack.c.bf16 %v2532_v41, %v2531_v8 }
 0xc4c   :  { %v2535_v46 = vpack.c.bf16 %v2533_v42, %v2533_v42 }
 0xc4d   :  { %4413 = vmatmul.msk.bf16.vlgmr.msra.gmra.mxu2 %vm626_vm13, %v2534_v0 }
 0xc4e   :  { %3017 = vmatpush.bf16.msra.mxu2 %v3009_v57  ;;  %3316 = vrot.lane.b32.xlu2 %v6724_v7, %s7229_s8 }
 0xc50   :  { %3104 = vrot.lane.b32.xlu1 %v6790_v44, %s5163_s3 }
 0xc51   :  { %v2733_v51 = vpop.xlane.xlu0 %2732 }
 0xc52   :  { %3018 = vmatpush.bf16.msra.mxu2 %v6790_v44  ;;  %3211 = vrot.lane.b32.xlu0 %v6724_v7, %s5165_s27  ;;  %5037 = vrcp.f32 %v2733_v51  ;;  %v3107_v4 = vpop.permute.xlu2 %3106 }
 0xc53   :  { %5039 = vrcp.f32 %v2730_v26 }
 0xc54   :  { %5041 = vrcp.f32 %v2736_v11 }
 0xc55   :  { %5043 = vpow2.f32 %v2831_v12 }
 0xc58   :  { %v5038_v24 = vpop.eup %5037 }
 0xc59   :  { %v5040_v60 = vpop.eup %5039  ;;  %v2741_v54 = vmul.f32 %v5038_v24, %v6713_v56  ;;  %v3081_v56 = vmul.f32 1.442695, %v3077_v23  ;;  %v3284_v50 = vpop.xlane.xlu0 %3283 }
 0xc5a   :  { %3243 = vrot.lane.b32.xlu0 %v6511_v45, %s7229_s8  ;;  %v2740_v7 = vmul.f32 %v5040_v60, %v6705_v49  ;;  %v3076_v45 = vsub.f32 %v6677_v38, %v3069_v18  ;;  %v5042_v52 = vpop.eup %5041  ;;  %v3288_v49 = vsub.f32 %v6651_v19, %v6765_v21  ;;  %v3289_v19 = vsub.f32 %v6718_v5, %v3284_v50 }
 0xc5b   :  { %v6810_v30 = vpop.eup %5043  ;;  %v2742_v63 = vmul.f32 %v5042_v52, %v6698_v16  ;;  %v3083_v16 = vmul.f32 1.442695, %v3078_v62 }
 0xc5c   :  { %v2743_v29 = vpack.c.bf16 %v2741_v54, %v2740_v7  ;;  %v3079_v28 = vmul.f32 1.442695, %v3076_v45  ;;  %v2839_v39 = vsel %vm626_vm13, %v6810_v30, 0.0  ;;  %v3291_v40 = vmul.f32 1.442695, %v3288_v49 }
 0xc5d   :  { %4414 = vmatmul.msk.bf16.gmra.mxu2 %vm626_vm13, %v2535_v46  ;;  %v2744_v38 = vpack.c.bf16 %v2742_v63, %v2742_v63  ;;  %v3293_v15 = vmul.f32 1.442695, %v3289_v19  ;;  %v3116_v7 = vsel %vm670_vm11, %v3107_v4, 0 }
 0xc5e   :  { %5045 = vpow2.f32 %v3079_v28 }
 0xc5f   :  { %5047 = vpow2.f32 %v3081_v56 }
 0xc60   :  { %5049 = vpow2.f32 %v3291_v40 }
 0xc61   :  { %5051 = vpow2.f32 %v3083_v16 }
 0xc62   :  { %5053 = vrcp.f32 %v2623_v47 }
 0xc63   :  { %5055 = vpow2.f32 %v3293_v15 }
 0xc64   :  { %v6820_v18 = vpop.eup %5045 }
 0xc65   :  { %v6822_v6 = vpop.eup %5047  ;;  %v3085_v21 = vsel %vm626_vm13, %v6820_v18, 0.0 }
 0xc66   :  { %v3088_v58 = vsel %vm626_vm13, %v6822_v6, 0.0  ;;  %v6829_v55 = vpop.eup %5049 }
 0xc67   :  { %v6831_v2 = vpop.eup %5051  ;;  %v3297_v41 = vsel %vm626_vm13, %v6829_v55, 0.0 }
 0xc68   :  { %v3091_v43 = vsel %vm626_vm13, %v6831_v2, 0.0  ;;  %v5054_v59 = vpop.eup %5053 }
 0xc69   :  { %v6837_v0 = vpop.eup %5055  ;;  %v2633_v32 = vmul.f32 %v5054_v59, %v6707_v53 }
 0xc6a   :  { %v3300_v54 = vsel %vm626_vm13, %v6837_v0, 0.0 }
 0xc6d   :  { %4421 = vmatmul.msk.bf16.vlgmr.msrb.gmra.mxu2 %vm626_vm13, %v2743_v29 }
 0xc7a   :  { %2840 = vadd.xlane.f32.xlu1 %v2839_v39 }
 0xc7d   :  { %4422 = vmatmul.msk.bf16.gmra.mxu2 %vm626_vm13, %v2744_v38 }
 0xc81   :  { %v2985_v1 = vpop.xlane.xlu0 %2984 }
 0xc82   :  { %3086 = vadd.xlane.f32.xlu1 %v3085_v21  ;;  %5057 = vrcp.f32 %v2985_v1 }
 0xc84   :  { %3089 = vadd.xlane.f32.xlu0 %v3088_v58 }
 0xc88   :  { %v5058_v35 = vpop.eup %5057 }
 0xc89   :  { %v2626_v5 = vpop.xlane.xlu0 %2625  ;;  %v2995_v46 = vmul.f32 %v5058_v35, %v6731_v9 }
 0xc8a   :  { %5059 = vrcp.f32 %v2626_v5  ;;  %3298 = vadd.xlane.f32.xlu1 %v3297_v41  ;;  %v2988_v8 = vpop.xlane.xlu2 %2987 }
 0xc8b   :  { %5061 = vrcp.f32 %v2988_v8 }
 0xc8c   :  { %3092 = vadd.xlane.f32.xlu0 %v3091_v43 }
 0xc90   :  { %v5060_v57 = vpop.eup %5059 }
 0xc91   :  { %v5062_v26 = vpop.eup %5061  ;;  %v2634_v42 = vmul.f32 %v5060_v57, %v6736_v48  ;;  %v2629_v51 = vpop.xlane.xlu0 %2628 }
 0xc92   :  { %v2996_v24 = vmul.f32 %v5062_v26, %v6738_v13  ;;  %5063 = vrcp.f32 %v2629_v51 }
 0xc93   :  { %v2636_v60 = vpack.c.bf16 %v2634_v42, %v2633_v32 }
 0xc94   :  { %v2998_v10 = vpack.c.bf16 %v2996_v24, %v2995_v46  ;;  %3301 = vadd.xlane.f32.xlu0 %v3300_v54 }
 0xc95   :  { %4417 = vmatmul.msk.bf16.vlgmr.msrb.gmra.mxu3 %vm626_vm13, %v2636_v60 }
 0xc96   :  { %3124 = vmatpush.bf16.msrb.mxu3 %v3116_v7  ;;  %4429 = vmatmul.msk.bf16.vlgmr.msra.gmra.mxu2 %vm626_vm13, %v2998_v10 }
 0xc98   :  { %v5064_v48 = vpop.eup %5063 }
 0xc99   :  { %v2835_v53 = vpop.xlane.xlu0 %2834  ;;  %v2635_v9 = vmul.f32 %v5064_v48, %v6745_v27 }
 0xc9b   :  { %v2637_v13 = vpack.c.bf16 %v2635_v9, %v2635_v9 }
 0xca1   :  { %v2991_v11 = vpop.xlane.xlu0 %2990 }
 0xca2   :  { %5065 = vrcp.f32 %v2991_v11 }
 0xca3   :  { %3209 = vrot.lane.b32.xlu1 %v6790_v44, %s5165_s27  ;;  %5067 = vrcp.f32 %v2835_v53 }
 0xca5   :  { %4418 = vmatmul.msk.bf16.gmra.mxu3 %vm626_vm13, %v2637_v13 }
 0xca8   :  { %v5066_v29 = vpop.eup %5065  ;;  %3314 = vrot.lane.b32.xlu0 %v6790_v44, %s7229_s8 }
 0xca9   :  { %v2997_v12 = vmul.f32 %v5066_v29, %v6755_v20  ;;  %v3194_v45 = vpop.xlane.xlu0 %3193  ;;  %v3197_v23 = vpop.xlane.xlu2 %3196 }
 0xcaa   :  { %5069 = vrcp.f32 %v3194_v45  ;;  %v2838_v52 = vpop.xlane.xlu1 %2837  ;;  %v5068_v28 = vpop.eup %5067 }
 0xcab   :  { %5071 = vrcp.f32 %v3197_v23  ;;  %v2999_v27 = vpack.c.bf16 %v2997_v12, %v2997_v12  ;;  %v2845_v50 = vmul.f32 %v5068_v28, %v6750_v17 }
 0xcac   :  { %5073 = vrcp.f32 %v2838_v52 }
 0xcad   :  { %4430 = vmatmul.msk.bf16.gmra.mxu2 %vm626_vm13, %v2999_v27 }
 0xcb0   :  { %v5070_v56 = vpop.eup %5069 }
 0xcb1   :  { %v5072_v63 = vpop.eup %5071  ;;  %v3204_v49 = vmul.f32 %v5070_v56, %v6763_v37  ;;  %v3317_v40 = vpop.permute.xlu2 %3316 }
 0xcb2   :  { %v5074_v47 = vpop.eup %5073  ;;  %v3205_v44 = vmul.f32 %v5072_v63, %v6767_v61  ;;  %v3326_v19 = vsel %vm670_vm11, %v3317_v40, 0 }
 0xcb3   :  { %v2846_v20 = vmul.f32 %v5074_v47, %v6769_v34 }
 0xcb4   :  { %v3207_v39 = vpack.c.bf16 %v3205_v44, %v3204_v49 }
 0xcb5   :  { %v2848_v62 = vpack.c.bf16 %v2846_v20, %v2845_v50 }
 0xcb7   :  { %4425 = vmatmul.msk.bf16.vlgmr.msra.gmra.mxu3 %vm626_vm13, %v2848_v62 }
 0xcbc   :  { %v3139_v38 = vpop.permute.xlu0 %3138 }
 0xcbd   :  { %4436 = vmatmul.msk.bf16.gmra.mxu0 %vm595_vm10, %v3139_v38 }
 0xcc2   :  { %v3105_v16 = vpop.permute.xlu1 %3104 }
 0xcc3   :  { %3125 = vmatpush.bf16.msrb.mxu3 %v3105_v16 }
 0xcc4   :  { %v3212_v37 = vpop.permute.xlu0 %3211 }
 0xcc5   :  { %v3221_v61 = vsel %vm670_vm11, %v3212_v37, 0  ;;  %v4683_v37 = vld [vmem:[%s7200_s9 + $0x30] sm:$0xff] }
 0xcc6   :  { %3229 = vmatpush.bf16.msrb.mxu2 %v3221_v61 }
 0xcc7   :  { %3334 = vmatpush.bf16.msra.mxu3 %v3326_v19  ;;  %v4684_v19 = vld [vmem:[%s7200_s9 + $0x38] sm:$0xff] }
 0xcc8   :  { %3440 = vmatpush.bf16.msra.mxu0 %v4684_v19 }
 0xccc   :  { %v3244_v17 = vpop.permute.xlu0 %3243  ;;  %3441 = vmatpush.bf16.msra.mxu0 %v4683_v37 }
 0xccd   :  { %4440 = vmatmul.msk.bf16.gmra.mxu1 %vm595_vm10, %v3244_v17  ;;  %v4682_v17 = vld [vmem:[%s7200_s9 + $0x28] sm:$0xff] }
 0xcd0   :  { %v6865_v34 = vpop.f32.mrf.mxu2  ;;  %3442 = vmatpush.bf16.msra.mxu0 %v4682_v17 }
 0xcd8   :  { %v6867_v21 = vpop.f32.mrf.mxu2 }
 0xce0   :  { %v6869_v1 = vpop.f32.mrf.mxu2 }
 0xce8   :  { %v2563_v4 = vpop.f32.mrf.mxu2 }
 0xced   :  { %v2841_v58 = vpop.xlane.xlu1 %2840 }
 0xcee   :  { %5075 = vrcp.f32 %v2841_v58 }
 0xcf0   :  { %v2768_v15 = vpop.f32.mrf.mxu2 }
 0xcf4   :  { %v5076_v5 = vpop.eup %5075 }
 0xcf5   :  { %v2847_v41 = vmul.f32 %v5076_v5, %v6810_v30  ;;  %v3087_v35 = vpop.xlane.xlu1 %3086 }
 0xcf7   :  { %v3090_v8 = vpop.xlane.xlu0 %3089  ;;  %v2849_v43 = vpack.c.bf16 %v2847_v41, %v2847_v41 }
 0xcf8   :  { %v2770_v59 = vpop.f32.mrf.mxu2  ;;  %5077 = vrcp.f32 %v3090_v8 }
 0xcf9   :  { %4426 = vmatmul.msk.bf16.gmra.mxu3 %vm626_vm13, %v2849_v43  ;;  %5079 = vrcp.f32 %v3087_v35  ;;  %v4775_v28 = vpack.i.bf16 %v2770_v59, %v2768_v15 }
 0xcfd   :  { %v3299_v30 = vpop.xlane.xlu1 %3298 }
 0xcfe   :  { %v5078_v57 = vpop.eup %5077 }
 0xcff   :  { %v5080_v32 = vpop.eup %5079  ;;  %v3098_v42 = vmul.f32 %v5078_v57, %v6822_v6  ;;  %v3093_v24 = vpop.xlane.xlu0 %3092 }
 0xd00   :  { %v6873_v26 = vpop.f32.mrf.mxu2  ;;  %v3097_v51 = vmul.f32 %v5080_v32, %v6820_v18  ;;  %5081 = vrcp.f32 %v3093_v24 }
 0xd02   :  { %v3100_v46 = vpack.c.bf16 %v3098_v42, %v3097_v51 }
 0xd06   :  { %v5082_v54 = vpop.eup %5081 }
 0xd07   :  { %v3302_v10 = vpop.xlane.xlu0 %3301  ;;  %v3099_v7 = vmul.f32 %v5082_v54, %v6831_v2 }
 0xd08   :  { %v2775_v60 = vpop.f32.mrf.mxu2  ;;  %5083 = vrcp.f32 %v3302_v10 }
 0xd09   :  { %4433 = vmatmul.msk.bf16.vlgmr.msrb.gmra.mxu3 %vm626_vm13, %v3100_v46  ;;  %v3101_v48 = vpack.c.bf16 %v3099_v7, %v3099_v7  ;;  %5085 = vrcp.f32 %v3299_v30 }
 0xd0e   :  { %v5084_v11 = vpop.eup %5083 }
 0xd0f   :  { %v5086_v12 = vpop.eup %5085  ;;  %v3310_v2 = vmul.f32 %v5084_v11, %v6837_v0 }
 0xd10   :  { %v3309_v45 = vmul.f32 %v5086_v12, %v6829_v55 }
 0xd12   :  { %v3312_v23 = vpack.c.bf16 %v3310_v2, %v3309_v45 }
 0xd15   :  { %v3210_v53 = vpop.permute.xlu1 %3209 }
 0xd16   :  { %3230 = vmatpush.bf16.msrb.mxu2 %v3210_v53 }
 0xd18   :  { %v2663_v9 = vpop.f32.mrf.mxu3 }
 0xd19   :  { %4434 = vmatmul.msk.bf16.gmra.mxu3 %vm626_vm13, %v3101_v48  ;;  %4437 = vmatmul.msk.bf16.vlgmr.msrb.gmra.mxu2 %vm626_vm13, %v3207_v39  ;;  %v6881_v6 = vpop.f32.mrf.mxu2 }
 0xd1a   :  { %v3315_v18 = vpop.permute.xlu0 %3314 }
 0xd1b   :  { %3335 = vmatpush.bf16.msra.mxu3 %v3315_v18 }
 0xd20   :  { %v2665_v13 = vpop.f32.mrf.mxu3 }
 0xd21   :  { %v4770_v29 = vpack.i.bf16 %v2665_v13, %v2663_v9  ;;  %v6886_v52 = vpop.f32.mrf.mxu2 }
 0xd23   :  { %4771 = vrot.lane.b32.xlu0 %v4770_v29, %s7230_s25 }
 0xd28   :  { %v2668_v27 = vpop.f32.mrf.mxu3 }
 0xd29   :  { %4441 = vmatmul.msk.bf16.vlgmr.msra.gmra.mxu3 %vm626_vm13, %v3312_v23 }
 0xd2b   :  { %4776 = vrot.lane.b32.xlu0 %v4775_v28, %s5160_s24 }
 0xd30   :  { %v2670_v56 = vpop.f32.mrf.mxu3  ;;  %v6890_v63 = vpop.f32.mrf.mxu2 }
 0xd38   :  { %v3027_v49 = vpop.f32.mrf.mxu2 }
 0xd3a   :  { %v2873_v47 = vpop.f32.mrf.mxu3  ;;  %v3170_v44 = vpop.f32.mrf.mxu0 }
 0xd3b   :  { %v3171_v0 = vadd.f32 %v3170_v44, %v5692_v36 }
 0xd3d   :  { %v3180_v50 = vsel %vm626_vm13, %v3171_v0, -inf }
 0xd3e   :  { %3181 = vmax.xlane.f32.xlu1 %v3180_v50 }
 0xd42   :  { %v2875_v55 = vpop.f32.mrf.mxu3  ;;  %v3172_v20 = vpop.f32.mrf.mxu0 }
 0xd43   :  { %v4780_v39 = vpack.i.bf16 %v2875_v55, %v2873_v47 }
 0xd45   :  { %4781 = vrot.lane.b32.xlu2 %v4780_v39, %s5161_s2 }
 0xd4a   :  { %v3275_v62 = vpop.f32.mrf.mxu1 }
 0xd4b   :  { %v3276_v38 = vadd.f32 %v3275_v62, %v5692_v36  ;;  %v4681_v36 = vld [vmem:[%s7200_s9 + $0x20] sm:$0xff] }
 0xd4c   :  { %3443 = vmatpush.bf16.msra.mxu0 %v4681_v36 }
 0xd4d   :  { %v3285_v16 = vsel %vm626_vm13, %v3276_v38, -inf }
 0xd52   :  { %v3277_v40 = vpop.f32.mrf.mxu1 }
 0xd55   :  { %3286 = vmax.xlane.f32.xlu0 %v3285_v16 }
 0xd7c   :  { %v2878_v61 = vpop.f32.mrf.mxu3 }
 0xd84   :  { %v2880_v4 = vpop.f32.mrf.mxu3 }
 0xd8c   :  { %v3127_v58 = vpop.f32.mrf.mxu3 }
 0xd8d   :  { %v4785_v15 = vpack.i.bf16 %v3127_v58, %v2668_v27 }
 0xd8f   :  { %4786 = vrot.lane.b32.xlu2 %v4785_v15, %s7230_s25 }
 0xd94   :  { %v6910_v5 = vpop.f32.mrf.mxu3 }
 0xd95   :  { %v4772_v41 = vpop.permute.xlu0 %4771 }
 0xd96   :  { %v4774_v8 = vunpack.i.h.bf16 %v4772_v41  ;;  %v4773_v43 = vunpack.i.l.bf16 %v4772_v41 }
 0xd98   :  { %v2918_v24 = vsel %vm595_vm10, %v6865_v34, %v4773_v43  ;;  %v2919_v60 = vsel %vm595_vm10, %v6867_v21, %v4774_v8 }
 0xd9c   :  { %v6912_v59 = vpop.f32.mrf.mxu3  ;;  %v3232_v35 = vpop.f32.mrf.mxu2 }
 0xd9d   :  { %v4800_v57 = vpack.i.bf16 %v6912_v59, %v6910_v5  ;;  %v4790_v32 = vpack.i.bf16 %v3232_v35, %v6873_v26  ;;  %v4777_v42 = vpop.permute.xlu0 %4776  ;;  %v7038_v5 = vld [vmem:[%s7202_s11 + $0x1] ss:$0 sm:$0xff] }
 0xd9e   :  { %v4779_v51 = vunpack.i.h.bf16 %v4777_v42  ;;  %v4778_v46 = vunpack.i.l.bf16 %v4777_v42 }
 0xd9f   :  { %v4782_v30 = vpop.permute.xlu2 %4781  ;;  %4791 = vrot.lane.b32.xlu2 %v4790_v32, %s5160_s24 }
 0xda0   :  { %v2922_v54 = vsel %vm1048_vm14, %v2919_v60, %v4779_v51  ;;  %v2921_v10 = vsel %vm1048_vm14, %v2918_v24, %v4778_v46  ;;  %v4784_v7 = vunpack.i.h.bf16 %v4782_v30  ;;  %v4783_v53 = vunpack.i.l.bf16 %v4782_v30 }
 0xda2   :  { %v2925_v26 = vsel %vm106_vm0, %v2922_v54, %v4784_v7  ;;  %v2924_v48 = vsel %vm106_vm0, %v2921_v10, %v4783_v53 }
 0xda3   :  { %v3391_v9 = vpack.c.bf16 %v2925_v26, %v2924_v48 }
 0xda4   :  { %v3134_v18 = vpop.f32.mrf.mxu3 }
 0xda5   :  { %4467 = vmatmul.msk.bf16.vlgmr.msra.gmra.mxu0 %vm142_vm1, %v3391_v9 }
 0xdac   :  { %v3337_v34 = vpop.f32.mrf.mxu3 }
 0xdad   :  { %v4795_v11 = vpack.i.bf16 %v3337_v34, %v2878_v61 }
 0xdaf   :  { %4796 = vrot.lane.b32.xlu2 %v4795_v11, %s5161_s2 }
 0xdb1   :  { %v3182_v21 = vpop.xlane.xlu1 %3181 }
 0xdb2   :  { %v3185_v13 = vsub.f32 %v3171_v0, %v3182_v21 }
 0xdb4   :  { %v3190_v2 = vmul.f32 1.442695, %v3185_v13 }
 0xdc8   :  { %v3287_v29 = vpop.xlane.xlu0 %3286 }
 0xdc9   :  { %v3290_v12 = vsub.f32 %v3276_v38, %v3287_v29 }
 0xdcb   :  { %v3295_v45 = vmul.f32 1.442695, %v3290_v12 }
 0xdcd   :  { %5087 = vpow2.f32 %v3295_v45 }
 0xdce   :  { %5089 = vpow2.f32 %v3190_v2  ;;  %v4508_v2 = vld [vmem:[%s7204_s13 + $0x70] sm:$0xf] }
 0xdd3   :  { %v5088_v23 = vpop.eup %5087 }
 0xdd4   :  { %v5090_v27 = vpop.eup %5089  ;;  %v3303_v28 = vsel %vm626_vm13, %v5088_v23, 0.0 }
 0xdd5   :  { %3304 = vadd.xlane.f32.xlu1 %v3303_v28  ;;  %v3198_v56 = vsel %vm626_vm13, %v5090_v27, 0.0 }
 0xdd8   :  { %3199 = vadd.xlane.f32.xlu2 %v3198_v56  ;;  %v4500_v56 = vld [vmem:[%s7204_s13 + $0x60] sm:$0xf] }
 0xde9   :  { %v4787_v49 = vpop.permute.xlu2 %4786 }
 0xdea   :  { %v4789_v44 = vunpack.i.h.bf16 %v4787_v49  ;;  %v4788_v50 = vunpack.i.l.bf16 %v4787_v49  ;;  %v4690_v49 = vld [vmem:[%s7204_s13 + $0x64] sm:$0xf0] }
 0xdec   :  { %v3382_v39 = vsel %vm595_vm10, %v6881_v6, %v4789_v44  ;;  %v2920_v62 = vsel %vm595_vm10, %v6869_v1, %v4788_v50  ;;  %v6942_v6 = vld [vmem:[%s7201_s10 + $0x1] ss:$0 sm:$0xff]  ;;  %v4501_v50 = vor.u32 %v4690_v49, %v4500_v56  ;;  %v3234_v49 = vpop.f32.mrf.mxu2 }
 0xdf9   :  { %v4792_v47 = vpop.permute.xlu2 %4791 }
 0xdfa   :  { %v4794_v55 = vunpack.i.h.bf16 %v4792_v47  ;;  %v4793_v0 = vunpack.i.l.bf16 %v4792_v47  ;;  %v4689_v47 = vld [vmem:[%s7204_s13 + $0x64] sm:$0xf] }
 0xdfc   :  { %v3385_v16 = vsel %vm1048_vm14, %v3382_v39, %v4794_v55  ;;  %v2923_v19 = vsel %vm1048_vm14, %v2920_v62, %v4793_v0  ;;  %v4502_v55 = vld [vmem:[%s7204_s13 + $0x68] sm:$0xf0]  ;;  %v4492_v62 = vld [vmem:[%s7204_s13 + $0x50] sm:$0xf] }
 0xdfd   :  { %v4505_v0 = vor.u32 %v4689_v47, %v4502_v55 }
 0xe09   :  { %v4797_v20 = vpop.permute.xlu2 %4796 }
 0xe0a   :  { %v4799_v38 = vunpack.i.h.bf16 %v4797_v20  ;;  %v4798_v40 = vunpack.i.l.bf16 %v4797_v20 }
 0xe0c   :  { %v2926_v37 = vsel %vm106_vm0, %v2923_v19, %v4798_v40  ;;  %v3388_v61 = vsel %vm106_vm0, %v3385_v16, %v4799_v38  ;;  %v4688_v38 = vld [vmem:[%s7204_s13 + $0x54] sm:$0xf0]  ;;  %v4687_v40 = vld [vmem:[%s7204_s13 + $0x54] sm:$0xf] }
 0xe0d   :  { %v3392_v17 = vpack.c.bf16 %v3388_v61, %v2926_v37  ;;  %v4493_v37 = vor.u32 %v4688_v38, %v4492_v62  ;;  %v4494_v61 = vld [vmem:[%s7204_s13 + $0x58] sm:$0xf0] }
 0xe0f   :  { %4468 = vmatmul.msk.bf16.gmra.mxu0 %vm142_vm1, %v3392_v17  ;;  %v4497_v17 = vor.u32 %v4687_v40, %v4494_v61 }
 0xe22   :  { %v3445_v36 = vpop.f32.mrf.mxu0 }
 0xe23   :  { %v3460_v1 = vadd.f32 %v3445_v36, %v6298_v33 }
 0xe25   :  { %v6946_v4 = vadd.f32 %v6942_v6, %v3460_v1  ;;  %v4484_v1 = vld [vmem:[%s7204_s13 + $0x40] sm:$0xf] }
 0xe27   :  { %v3481_v58 = vsel %vm142_vm1, %v6946_v4, 0.0  ;;  %v3499_v8 = vmul.f32 %v6946_v4, %v6946_v4 }
 0xe28   :  { %3482 = vadd.xlane.f32.xlu0 %v3481_v58  ;;  %v4686_v58 = vld [vmem:[%s7204_s13 + $0x44] sm:$0xf0] }
 0xe29   :  { %v3505_v35 = vsel %vm142_vm1, %v3499_v8, 0.0 }
 0xe2a   :  { %v3447_v15 = vpop.f32.mrf.mxu0 }
 0xe2b   :  { %v3461_v41 = vadd.f32 %v3447_v15, %v6307_v3  ;;  %v4685_v15 = vld [vmem:[%s7204_s13 + $0x44] sm:$0xf] }
 0xe2d   :  { %v6954_v43 = vadd.f32 %v6942_v6, %v3461_v41 }
 0xe2f   :  { %v3484_v33 = vsel %vm142_vm1, %v6954_v43, 0.0  ;;  %v3500_v32 = vmul.f32 %v6954_v43, %v6954_v43 }
 0xe30   :  { %3506 = vadd.xlane.f32.xlu0 %v3505_v35  ;;  %3485 = vadd.xlane.f32.xlu1 %v3484_v33  ;;  %v4485_v35 = vor.u32 %v4686_v58, %v4484_v1  ;;  %v4486_v33 = vld [vmem:[%s7204_s13 + $0x48] sm:$0xf0] }
 0xe31   :  { %v3508_v42 = vsel %vm142_vm1, %v3500_v32, 0.0  ;;  %v4489_v32 = vor.u32 %v4685_v15, %v4486_v33 }
 0xe38   :  { %3509 = vadd.xlane.f32.xlu1 %v3508_v42 }
 0xe48   :  { %v3305_v3 = vpop.xlane.xlu1 %3304 }
 0xe49   :  { %5091 = vrcp.f32 %v3305_v3 }
 0xe4b   :  { %v3200_v51 = vpop.xlane.xlu2 %3199 }
 0xe4c   :  { %5093 = vrcp.f32 %v3200_v51 }
 0xe4f   :  { %v5092_v46 = vpop.eup %5091 }
 0xe50   :  { %v3311_v24 = vmul.f32 %v5092_v46, %v5088_v23  ;;  %v4691_v23 = vld [vmem:[%s7204_s13 + $0x74] sm:$0xf] }
 0xe52   :  { %v5094_v60 = vpop.eup %5093  ;;  %v3313_v30 = vpack.c.bf16 %v3311_v24, %v3311_v24 }
 0xe53   :  { %v3206_v54 = vmul.f32 %v5094_v60, %v5090_v27  ;;  %v4510_v27 = vld [vmem:[%s7204_s13 + $0x78] sm:$0xf0] }
 0xe54   :  { %4442 = vmatmul.msk.bf16.gmra.mxu3 %vm626_vm13, %v3313_v30  ;;  %v4513_v28 = vor.u32 %v4691_v23, %v4510_v27 }
 0xe55   :  { %v3208_v10 = vpack.c.bf16 %v3206_v54, %v3206_v54 }
 0xe56   :  { %3739 = vmatpush.bf16.msra.mxu1 %v4513_v28 }
 0xe57   :  { %4438 = vmatmul.msk.bf16.gmra.mxu2 %vm626_vm13, %v3208_v10 }
 0xe5a   :  { %3740 = vmatpush.bf16.msra.mxu1 %v4505_v0 }
 0xe5e   :  { %3741 = vmatpush.bf16.msra.mxu1 %v4497_v17 }
 0xe62   :  { %3742 = vmatpush.bf16.msra.mxu1 %v4489_v32 }
 0xe8c   :  { %v3450_v7 = vpop.f32.mrf.mxu0 }
 0xe8d   :  { %v3462_v53 = vadd.f32 %v3450_v7, %v6316_v25 }
 0xe8f   :  { %v6966_v26 = vadd.f32 %v6942_v6, %v3462_v53 }
 0xe91   :  { %v3487_v48 = vsel %vm142_vm1, %v6966_v26, 0.0  ;;  %v3501_v9 = vmul.f32 %v6966_v26, %v6966_v26 }
 0xe92   :  { %3488 = vadd.xlane.f32.xlu0 %v3487_v48 }
 0xe93   :  { %v3511_v18 = vsel %vm142_vm1, %v3501_v9, 0.0 }
 0xe94   :  { %v3452_v34 = vpop.f32.mrf.mxu0  ;;  %3512 = vadd.xlane.f32.xlu2 %v3511_v18 }
 0xe95   :  { %v3463_v11 = vadd.f32 %v3452_v34, %v6325_v14  ;;  %v4692_v14 = vld [vmem:[%s7204_s13 + $0x74] sm:$0xf0] }
 0xe96   :  { %v4509_v45 = vor.u32 %v4692_v14, %v4508_v2  ;;  %v7044_v2 = vld [vmem:[%s7203_s12 + $0x1] ss:$0 sm:$0xff] }
 0xe97   :  { %v6975_v21 = vadd.f32 %v6942_v6, %v3463_v11 }
 0xe98   :  { %3715 = vmatpush.bf16.msra.mxu2 %v4509_v45 }
 0xe99   :  { %v3490_v25 = vsel %vm142_vm1, %v6975_v21, 0.0  ;;  %v3502_v13 = vmul.f32 %v6975_v21, %v6975_v21 }
 0xe9a   :  { %3491 = vadd.xlane.f32.xlu1 %v3490_v25 }
 0xe9b   :  { %v3483_v29 = vpop.xlane.xlu0 %3482  ;;  %v3514_v12 = vsel %vm142_vm1, %v3502_v13, 0.0 }
 0xe9c   :  { %3515 = vadd.xlane.f32.xlu0 %v3514_v12  ;;  %v3523_v44 = vmul.f32 0.015625, %v3483_v29  ;;  %3716 = vmatpush.bf16.msra.mxu2 %v4501_v50 }
 0xe9e   :  { %v3535_v16 = vmul.f32 %v3523_v44, %v3523_v44  ;;  %v3547_v25 = vsub.f32 %v6946_v4, %v3523_v44 }
 0xea0   :  { %3717 = vmatpush.bf16.msra.mxu2 %v4493_v37 }
 0xea3   :  { %v3507_v20 = vpop.xlane.xlu0 %3506  ;;  %v3486_v39 = vpop.xlane.xlu1 %3485 }
 0xea4   :  { %v3529_v19 = vmul.f32 0.015625, %v3507_v20  ;;  %v3524_v8 = vmul.f32 0.015625, %v3486_v39  ;;  %3718 = vmatpush.bf16.msra.mxu2 %v4485_v35 }
 0xea6   :  { %v3541_v36 = vsub.f32 %v3529_v19, %v3535_v16  ;;  %v3536_v3 = vmul.f32 %v3524_v8, %v3524_v8  ;;  %v3548_v29 = vsub.f32 %v6954_v43, %v3524_v8  ;;  %v3339_v43 = vpop.f32.mrf.mxu3 }
 0xea8   :  { %v3553_v41 = vadd.f32 1e-05, %v3541_v36 }
 0xeaa   :  { %5095 = vrsqrt.f32 %v3553_v41  ;;  %vm3565_vm13 = vweird.f32 %v3553_v41 }
 0xeab   :  { %v3510_v42 = vpop.xlane.xlu1 %3509 }
 0xeac   :  { %v3530_v51 = vmul.f32 0.015625, %v3510_v42 }
 0xeae   :  { %v3542_v46 = vsub.f32 %v3530_v51, %v3536_v3 }
 0xeb0   :  { %v5096_v24 = vpop.eup %5095  ;;  %v3554_v60 = vadd.f32 1e-05, %v3542_v46 }
 0xeb1   :  { %v3560_v30 = vmul.f32 %v5096_v24, %v3553_v41  ;;  %vm3566_vm11 = vweird.f32 %v5096_v24 }
 0xeb2   :  { %5097 = vrsqrt.f32 %v3554_v60  ;;  %vm3567_vm7 = vmor %vm3565_vm13, %vm3566_vm11  ;;  %vm3575_vm9 = vweird.f32 %v3554_v60 }
 0xeb3   :  { %v3561_v54 = vmul.f32 %v5096_v24, %v3560_v30  ;;  %4801 = vrot.lane.b32.xlu1 %v4800_v57, %s7230_s25  ;;  %s4147_s25 = sshll.u32 %s7211_s20, 4  ;;  %s4148_s25 = int_to_ptr.hbm [resolvable:$true] %s4147_s25 }
 0xeb5   :  { %v3562_v10 = vmul.f32 0.5, %v3561_v54 }
 0xeb7   :  { %v3563_v7 = vsub.f32 1.5, %v3562_v10 }
 0xeb8   :  { %v5098_v53 = vpop.eup %5097 }
 0xeb9   :  { %v3564_v48 = vmul.f32 %v5096_v24, %v3563_v7  ;;  %v3570_v9 = vmul.f32 %v5098_v53, %v3554_v60  ;;  %vm3576_vm8 = vweird.f32 %v5098_v53 }
 0xeba   :  { %vm3577_vm12 = vmor %vm3575_vm9, %vm3576_vm8  ;;  %vm4056_vm9 = vcmask 517120  }
 0xebb   :  { %v3571_v18 = vmul.f32 %v5098_v53, %v3570_v9  ;;  %v3568_v34 = vsel %vm3567_vm7, %v5096_v24, %v3564_v48  ;;  %vm4052_vm7 = vcmask 1040384  }
 0xebc   :  { %v3619_v59 = vmul.f32 %v3568_v34, %v3547_v25 }
 0xebd   :  { %v3572_v11 = vmul.f32 0.5, %v3571_v18 }
 0xebe   :  { %v3628_v14 = vmul.f32 %v7038_v5, %v3619_v59 }
 0xebf   :  { %v3573_v13 = vsub.f32 1.5, %v3572_v11 }
 0xec0   :  { %v3637_v27 = vadd.f32 %v7044_v2, %v3628_v14  ;;  %v4699_v14 = vld [vmem:[%s7206_s15 + $0xb0] sm:$0xff] }
 0xec1   :  { %v3574_v57 = vmul.f32 %v5098_v53, %v3573_v13 }
 0xec3   :  { %v3578_v12 = vsel %vm3577_vm12, %v5098_v53, %v3574_v57  ;;  %v4707_v57 = vld [vmem:[%s7206_s15 + $0xf0] sm:$0xff] }
 0xec4   :  { %v3620_v45 = vmul.f32 %v3578_v12, %v3548_v29  ;;  %v4700_v29 = vld [vmem:[%s7206_s15 + $0xb8] sm:$0xff]  ;;  %v4706_v12 = vld [vmem:[%s7206_s15 + $0xe8] sm:$0xff] }
 0xec5   :  { %4007 = vmatpush.bf16.msrb.mxu3 %v4700_v29 }
 0xec6   :  { %v3629_v23 = vmul.f32 %v7038_v5, %v3620_v45  ;;  %v4705_v45 = vld [vmem:[%s7206_s15 + $0xe0] sm:$0xff] }
 0xec8   :  { %v3638_v28 = vadd.f32 %v7044_v2, %v3629_v23  ;;  %v4698_v23 = vld [vmem:[%s7206_s15 + $0xa8] sm:$0xff] }
 0xec9   :  { %4008 = vmatpush.bf16.msrb.mxu3 %v4699_v14 }
 0xeca   :  { %v3643_v56 = vpack.c.bf16 %v3638_v28, %v3637_v27  ;;  %v4704_v27 = vld [vmem:[%s7206_s15 + $0xd8] sm:$0xff]  ;;  %v4697_v28 = vld [vmem:[%s7206_s15 + $0xa0] sm:$0xff] }
 0xecc   :  { %4514 = vmatmul.msk.bf16.vlgmr.msra.gmra.mxu2 %vm142_vm1, %v3643_v56  ;;  %4517 = vmatmul.msk.bf16.vlgmr.msra.gmra.mxu1 %vm142_vm1, %v3643_v56  ;;  %v4703_v56 = vld [vmem:[%s7206_s15 + $0xd0] sm:$0xff] }
 0xecd   :  { %4009 = vmatpush.bf16.msrb.mxu3 %v4698_v23 }
 0xed1   :  { %4010 = vmatpush.bf16.msrb.mxu3 %v4697_v28 }
 0xed7   :  { %v3342_v47 = vpop.f32.mrf.mxu3 }
 0xed8   :  { %v4810_v44 = vpack.i.bf16 %v3342_v47, %v3339_v43  ;;  %v4481_v43 = vld [vmem:[%s7205_s14 + $0x2] sm:$0x3]  ;;  %v4702_v47 = vld [vmem:[%s7206_s15 + $0xc8] sm:$0xff] }
 0xeda   :  { %v3237_v50 = vpop.f32.mrf.mxu2  ;;  %4811 = vrot.lane.b32.xlu0 %v4810_v44, %s5161_s2 }
 0xedb   :  { %v4805_v55 = vpack.i.bf16 %v3237_v50, %v3234_v49  ;;  %v4696_v49 = vld [vmem:[%s7206_s15 + $0x98] sm:$0xff]  ;;  %v7101_v50 = vperm.slane %v4481_v43, 1 }
 0xedc   :  { %4011 = vmatpush.bf16.msrb.mxu3 %v4696_v49 }
 0xedd   :  { %4806 = vrot.lane.b32.xlu2 %v4805_v55, %s5160_s24 }
 0xedf   :  { %v3344_v0 = vpop.f32.mrf.mxu3 }
 0xee0   :  { %v4695_v0 = vld [vmem:[%s7206_s15 + $0x90] sm:$0xff] }
 0xee1   :  { %4012 = vmatpush.bf16.msrb.mxu3 %v4695_v0 }
 0xee2   :  { %v3239_v20 = vpop.f32.mrf.mxu2 }
 0xf05   :  { %v3489_v39 = vpop.xlane.xlu0 %3488 }
 0xf06   :  { %v3525_v62 = vmul.f32 0.015625, %v3489_v39 }
 0xf07   :  { %v3513_v38 = vpop.xlane.xlu2 %3512 }
 0xf08   :  { %v3537_v40 = vmul.f32 %v3525_v62, %v3525_v62  ;;  %v3531_v16 = vmul.f32 0.015625, %v3513_v38  ;;  %v3549_v54 = vsub.f32 %v6966_v26, %v3525_v62  ;;  %v4708_v26 = vld [vmem:[%s7206_s15 + $0xf8] sm:$0xff]  ;;  %v4701_v38 = vld [vmem:[%s7206_s15 + $0xc0] sm:$0xff] }
 0xf09   :  { %4027 = vmatpush.bf16.msrb.mxu0 %v4708_v26 }
 0xf0a   :  { %v3543_v19 = vsub.f32 %v3531_v16, %v3537_v40 }
 0xf0c   :  { %v3555_v37 = vadd.f32 1e-05, %v3543_v19 }
 0xf0d   :  { %v3492_v61 = vpop.xlane.xlu1 %3491  ;;  %4028 = vmatpush.bf16.msrb.mxu0 %v4707_v57 }
 0xf0e   :  { %5099 = vrsqrt.f32 %v3555_v37  ;;  %v3526_v17 = vmul.f32 0.015625, %v3492_v61  ;;  %vm3585_vm2 = vweird.f32 %v3555_v37 }
 0xf0f   :  { %v3516_v36 = vpop.xlane.xlu0 %3515 }
 0xf10   :  { %v3538_v1 = vmul.f32 %v3526_v17, %v3526_v17  ;;  %v3532_v58 = vmul.f32 0.015625, %v3516_v36  ;;  %v3550_v48 = vsub.f32 %v6975_v21, %v3526_v17  ;;  %v7113_v36 = vperm.slane %v4481_v43, 0 }
 0xf11   :  { %4029 = vmatpush.bf16.msrb.mxu0 %v4706_v12 }
 0xf12   :  { %v3544_v15 = vsub.f32 %v3532_v58, %v3538_v1 }
 0xf14   :  { %v5100_v41 = vpop.eup %5099  ;;  %v3556_v8 = vadd.f32 1e-05, %v3544_v15 }
 0xf15   :  { %v3580_v35 = vmul.f32 %v5100_v41, %v3555_v37  ;;  %vm3586_vm15 = vweird.f32 %v5100_v41  ;;  %4030 = vmatpush.bf16.msrb.mxu0 %v4705_v45  ;;  %v4694_v37 = vld [vmem:[%s7206_s15 + $0x88] sm:$0xff] }
 0xf16   :  { %5101 = vrsqrt.f32 %v3556_v8  ;;  %vm3587_vm3 = vmor %vm3585_vm2, %vm3586_vm15  ;;  %vm3595_vm5 = vweird.f32 %v3556_v8  ;;  %4013 = vmatpush.bf16.msrb.mxu3 %v4694_v37 }
 0xf17   :  { %v3581_v33 = vmul.f32 %v5100_v41, %v3580_v35 }
 0xf19   :  { %v3582_v32 = vmul.f32 0.5, %v3581_v33  ;;  %4031 = vmatpush.bf16.msrb.mxu0 %v4704_v27 }
 0xf1b   :  { %v3583_v42 = vsub.f32 1.5, %v3582_v32 }
 0xf1c   :  { %v5102_v3 = vpop.eup %5101 }
 0xf1d   :  { %v3584_v51 = vmul.f32 %v5100_v41, %v3583_v42  ;;  %v3590_v46 = vmul.f32 %v5102_v3, %v3556_v8  ;;  %vm3596_vm4 = vweird.f32 %v5102_v3  ;;  %4032 = vmatpush.bf16.msrb.mxu0 %v4703_v56 }
 0xf1e   :  { %vm3597_vm6 = vmor %vm3595_vm5, %vm3596_vm4 }
 0xf1f   :  { %v3591_v24 = vmul.f32 %v5102_v3, %v3590_v46  ;;  %v3588_v60 = vsel %vm3587_vm3, %v5100_v41, %v3584_v51 }
 0xf20   :  { %v3621_v7 = vmul.f32 %v3588_v60, %v3549_v54 }
 0xf21   :  { %v3592_v30 = vmul.f32 0.5, %v3591_v24  ;;  %4033 = vmatpush.bf16.msrb.mxu0 %v4702_v47 }
 0xf22   :  { %v3630_v34 = vmul.f32 %v7038_v5, %v3621_v7 }
 0xf23   :  { %v3593_v10 = vsub.f32 1.5, %v3592_v30 }
 0xf24   :  { %v3639_v25 = vadd.f32 %v7044_v2, %v3630_v34 }
 0xf25   :  { %v3594_v53 = vmul.f32 %v5102_v3, %v3593_v10  ;;  %v4802_v44 = vpop.permute.xlu1 %4801  ;;  %4034 = vmatpush.bf16.msrb.mxu0 %v4701_v38 }
 0xf26   :  { %v4804_v20 = vunpack.i.h.bf16 %v4802_v44  ;;  %v4803_v39 = vunpack.i.l.bf16 %v4802_v44 }
 0xf27   :  { %v3598_v9 = vsel %vm3597_vm6, %v5102_v3, %v3594_v53 }
 0xf28   :  { %v3622_v18 = vmul.f32 %v3598_v9, %v3550_v48  ;;  %v3384_v1 = vsel %vm595_vm10, %v6890_v63, %v4804_v20  ;;  %v3383_v58 = vsel %vm595_vm10, %v6886_v52, %v4803_v39  ;;  %v4693_v63 = vld [vmem:[%s7206_s15 + $0x80] sm:$0xff] }
 0xf29   :  { %4014 = vmatpush.bf16.msrb.mxu3 %v4693_v63 }
 0xf2a   :  { %v3631_v11 = vmul.f32 %v7038_v5, %v3622_v18 }
 0xf2c   :  { %v3640_v13 = vadd.f32 %v7044_v2, %v3631_v11 }
 0xf2e   :  { %v3644_v59 = vpack.c.bf16 %v3640_v13, %v3639_v25 }
 0xf30   :  { %4515 = vmatmul.msk.bf16.gmra.mxu2 %vm142_vm1, %v3644_v59  ;;  %4518 = vmatmul.msk.bf16.gmra.mxu1 %vm142_vm1, %v3644_v59 }
 0xf37   :  { %v4807_v55 = vpop.permute.xlu2 %4806 }
 0xf38   :  { %v4809_v40 = vunpack.i.h.bf16 %v4807_v55  ;;  %v4808_v16 = vunpack.i.l.bf16 %v4807_v55 }
 0xf3a   :  { %v3386_v8 = vsel %vm1048_vm14, %v3383_v58, %v4808_v16  ;;  %v3387_v35 = vsel %vm1048_vm14, %v3384_v1, %v4809_v40 }
 0xf49   :  { %v3744_v62 = vpop.f32.mrf.mxu1 }
 0xf4a   :  { %v3745_v19 = vadd.f32 %v3744_v62, %v7101_v50 }
 0xf4c   :  { %v3760_v61 = vmul.f32 %v3745_v19, %v3745_v19  ;;  %v4812_v17 = vpop.permute.xlu0 %4811 }
 0xf4d   :  { %v4814_v15 = vunpack.i.h.bf16 %v4812_v17  ;;  %v4813_v41 = vunpack.i.l.bf16 %v4812_v17 }
 0xf4e   :  { %v3772_v33 = vmul.f32 %v3760_v61, %v3745_v19 }
 0xf4f   :  { %v3389_v32 = vsel %vm106_vm0, %v3386_v8, %v4813_v41  ;;  %v3390_v42 = vsel %vm106_vm0, %v3387_v35, %v4814_v15  ;;  %v3720_v3 = vpop.f32.mrf.mxu2 }
 0xf50   :  { %v3784_v51 = vmul.f32 0.044715, %v3772_v33  ;;  %v3393_v46 = vpack.c.bf16 %v3390_v42, %v3389_v32  ;;  %v3721_v52 = vadd.f32 %v3720_v3, %v7113_v36 }
 0xf51   :  { %v3746_v24 = vpop.f32.mrf.mxu1 }
 0xf52   :  { %v3796_v60 = vadd.f32 %v3784_v51, %v3745_v19  ;;  %v3759_v30 = vmul.f32 %v3721_v52, %v3721_v52  ;;  %v3747_v54 = vadd.f32 %v3746_v24, %v7101_v50  ;;  %4469 = vmatmul.msk.bf16.gmra.mxu0 %vm142_vm1, %v3393_v46 }
 0xf54   :  { %v3808_v10 = vmul.f32 0.7978846, %v3796_v60  ;;  %v3771_v7 = vmul.f32 %v3759_v30, %v3721_v52  ;;  %v3762_v53 = vmul.f32 %v3747_v54, %v3747_v54 }
 0xf56   :  { %v3783_v48 = vmul.f32 0.044715, %v3771_v7  ;;  %v3774_v9 = vmul.f32 %v3762_v53, %v3747_v54  ;;  %5103 = vtanh.f32 %v3808_v10 }
 0xf57   :  { %v3722_v18 = vpop.f32.mrf.mxu2 }
 0xf58   :  { %v3795_v34 = vadd.f32 %v3783_v48, %v3721_v52  ;;  %v3786_v11 = vmul.f32 0.044715, %v3774_v9  ;;  %v3723_v25 = vadd.f32 %v3722_v18, %v7113_v36 }
 0xf5a   :  { %v3807_v13 = vmul.f32 0.7978846, %v3795_v34  ;;  %v3798_v26 = vadd.f32 %v3786_v11, %v3747_v54  ;;  %v3761_v59 = vmul.f32 %v3723_v25, %v3723_v25 }
 0xf5c   :  { %v3810_v57 = vmul.f32 0.7978846, %v3798_v26  ;;  %v3773_v29 = vmul.f32 %v3761_v59, %v3723_v25  ;;  %5105 = vtanh.f32 %v3807_v13  ;;  %v5104_v12 = vpop.eup %5103 }
 0xf5d   :  { %v3832_v23 = vadd.f32 1.0, %v5104_v12 }
 0xf5e   :  { %5107 = vtanh.f32 %v3810_v57  ;;  %v3785_v14 = vmul.f32 0.044715, %v3773_v29 }
 0xf5f   :  { %v3844_v43 = vmul.f32 0.5, %v3832_v23 }
 0xf60   :  { %v3797_v45 = vadd.f32 %v3785_v14, %v3723_v25 }
 0xf61   :  { %v3856_v55 = vmul.f32 %v3844_v43, %v3745_v19 }
 0xf62   :  { %v3809_v27 = vmul.f32 0.7978846, %v3797_v45  ;;  %v5106_v28 = vpop.eup %5105 }
 0xf63   :  { %v3831_v47 = vadd.f32 1.0, %v5106_v28 }
 0xf64   :  { %v5108_v56 = vpop.eup %5107  ;;  %5109 = vtanh.f32 %v3809_v27 }
 0xf65   :  { %v3834_v49 = vadd.f32 1.0, %v5108_v56  ;;  %v3843_v39 = vmul.f32 0.5, %v3831_v47 }
 0xf67   :  { %v3846_v44 = vmul.f32 0.5, %v3834_v49  ;;  %v3855_v16 = vmul.f32 %v3843_v39, %v3721_v52 }
 0xf69   :  { %v3858_v0 = vmul.f32 %v3846_v44, %v3747_v54 }
 0xf6a   :  { %v5110_v20 = vpop.eup %5109 }
 0xf6b   :  { %v3868_v62 = vpack.c.bf16 %v3858_v0, %v3856_v55  ;;  %v3833_v38 = vadd.f32 1.0, %v5110_v20 }
 0xf6d   :  { %v3845_v40 = vmul.f32 0.5, %v3833_v38  ;;  %4035 = vmatmul.bf16.vlgmr.msrb.gmra.mxu0 %v3868_v62 }
 0xf6f   :  { %v3857_v37 = vmul.f32 %v3845_v40, %v3723_v25 }
 0xf71   :  { %v3867_v61 = vpack.c.bf16 %v3857_v37, %v3855_v16 }
 0xf73   :  { %4015 = vmatmul.bf16.vlgmr.msrb.gmra.mxu3 %v3867_v61 }
 0xfad   :  { %v3749_v17 = vpop.f32.mrf.mxu1 }
 0xfae   :  { %v3750_v1 = vadd.f32 %v3749_v17, %v7101_v50 }
 0xfb0   :  { %v3764_v58 = vmul.f32 %v3750_v1, %v3750_v1 }
 0xfb2   :  { %v3776_v15 = vmul.f32 %v3764_v58, %v3750_v1 }
 0xfb3   :  { %v3725_v41 = vpop.f32.mrf.mxu2 }
 0xfb4   :  { %v3788_v8 = vmul.f32 0.044715, %v3776_v15  ;;  %v3726_v19 = vadd.f32 %v3725_v41, %v7113_v36  ;;  %v4828_v41 = vld [vmem:[%s7207_s16 + $0x1] ss:$0 sm:$0xff] }
 0xfb5   :  { %v3751_v35 = vpop.f32.mrf.mxu1 }
 0xfb6   :  { %v3800_v33 = vadd.f32 %v3788_v8, %v3750_v1  ;;  %v3763_v32 = vmul.f32 %v3726_v19, %v3726_v19  ;;  %v3752_v42 = vadd.f32 %v3751_v35, %v7101_v50 }
 0xfb8   :  { %v3812_v3 = vmul.f32 0.7978846, %v3800_v33  ;;  %v3775_v63 = vmul.f32 %v3763_v32, %v3726_v19  ;;  %v3766_v51 = vmul.f32 %v3752_v42, %v3752_v42 }
 0xfba   :  { %v3787_v46 = vmul.f32 0.044715, %v3775_v63  ;;  %v3778_v52 = vmul.f32 %v3766_v51, %v3752_v42  ;;  %5111 = vtanh.f32 %v3812_v3 }
 0xfbb   :  { %v3727_v24 = vpop.f32.mrf.mxu2 }
 0xfbc   :  { %v3799_v60 = vadd.f32 %v3787_v46, %v3726_v19  ;;  %v3790_v30 = vmul.f32 0.044715, %v3778_v52  ;;  %v3728_v54 = vadd.f32 %v3727_v24, %v7113_v36 }
 0xfbe   :  { %v3811_v10 = vmul.f32 0.7978846, %v3799_v60  ;;  %v3802_v7 = vadd.f32 %v3790_v30, %v3752_v42  ;;  %v3765_v53 = vmul.f32 %v3728_v54, %v3728_v54 }
 0xfc0   :  { %v3814_v48 = vmul.f32 0.7978846, %v3802_v7  ;;  %v3777_v9 = vmul.f32 %v3765_v53, %v3728_v54  ;;  %5113 = vtanh.f32 %v3811_v10  ;;  %v5112_v18 = vpop.eup %5111 }
 0xfc1   :  { %v3836_v25 = vadd.f32 1.0, %v5112_v18 }
 0xfc2   :  { %5115 = vtanh.f32 %v3814_v48  ;;  %v3789_v34 = vmul.f32 0.044715, %v3777_v9 }
 0xfc3   :  { %v3848_v29 = vmul.f32 0.5, %v3836_v25 }
 0xfc4   :  { %v3801_v11 = vadd.f32 %v3789_v34, %v3728_v54 }
 0xfc5   :  { %v3860_v45 = vmul.f32 %v3848_v29, %v3750_v1 }
 0xfc6   :  { %v3813_v13 = vmul.f32 0.7978846, %v3801_v11  ;;  %v5114_v26 = vpop.eup %5113 }
 0xfc7   :  { %v3835_v14 = vadd.f32 1.0, %v5114_v26 }
 0xfc8   :  { %v5116_v59 = vpop.eup %5115  ;;  %5117 = vtanh.f32 %v3813_v13 }
 0xfc9   :  { %v3838_v57 = vadd.f32 1.0, %v5116_v59  ;;  %v3847_v49 = vmul.f32 0.5, %v3835_v14 }
 0xfcb   :  { %v3850_v12 = vmul.f32 0.5, %v3838_v57  ;;  %v3859_v0 = vmul.f32 %v3847_v49, %v3726_v19 }
 0xfcd   :  { %v3862_v23 = vmul.f32 %v3850_v12, %v3752_v42 }
 0xfce   :  { %v5118_v27 = vpop.eup %5117 }
 0xfcf   :  { %v3455_v28 = vpop.f32.mrf.mxu0  ;;  %v3870_v56 = vpack.c.bf16 %v3862_v23, %v3860_v45  ;;  %v3837_v43 = vadd.f32 1.0, %v5118_v27 }
 0xfd0   :  { %v3464_v47 = vadd.f32 %v3455_v28, %v6412_v31 }
 0xfd1   :  { %4039 = vmatmul.bf16.gmra.mxu0 %v3870_v56  ;;  %v3849_v44 = vmul.f32 0.5, %v3837_v43 }
 0xfd2   :  { %v7136_v55 = vadd.f32 %v6942_v6, %v3464_v47 }
 0xfd3   :  { %v3861_v20 = vmul.f32 %v3849_v44, %v3728_v54 }
 0xfd4   :  { %v3493_v39 = vsel %vm142_vm1, %v7136_v55, 0.0  ;;  %v3503_v62 = vmul.f32 %v7136_v55, %v7136_v55 }
 0xfd5   :  { %3494 = vadd.xlane.f32.xlu0 %v3493_v39  ;;  %v3869_v38 = vpack.c.bf16 %v3861_v20, %v3859_v0 }
 0xfd6   :  { %v3517_v40 = vsel %vm142_vm1, %v3503_v62, 0.0 }
 0xfd7   :  { %4019 = vmatmul.bf16.gmra.mxu3 %v3869_v38  ;;  %3518 = vadd.xlane.f32.xlu2 %v3517_v40  ;;  %v3457_v31 = vpop.f32.mrf.mxu0 }
 0xfd8   :  { %v3465_v16 = vadd.f32 %v3457_v31, %v6421_v22 }
 0xfda   :  { %v7145_v37 = vadd.f32 %v6942_v6, %v3465_v16 }
 0xfdc   :  { %v3496_v61 = vsel %vm142_vm1, %v7145_v37, 0.0  ;;  %v3504_v17 = vmul.f32 %v7145_v37, %v7145_v37 }
 0xfdd   :  { %3497 = vadd.xlane.f32.xlu1 %v3496_v61  ;;  %v4712_v61 = vld [vmem:[%s7210_s19 + $0x18] sm:$0xff] }
 0xfde   :  { %v3520_v1 = vsel %vm142_vm1, %v3504_v17, 0.0  ;;  %4129 = vmatpush.bf16.msrb.mxu2 %v4712_v61  ;;  %v4710_v17 = vld [vmem:[%s7210_s19 + $0x8] sm:$0xff] }
 0xfdf   :  { %3521 = vadd.xlane.f32.xlu0 %v3520_v1 }
 0xfea   :  { %v4036_v58 = vpop.f32.mrf.mxu0 }
 0xff2   :  { %v4038_v15 = vpop.f32.mrf.mxu0 }
 0xff6   :  { %v4016_v22 = vpop.f32.mrf.mxu3 }
 0xff7   :  { %v4017_v8 = vadd.f32 %v4828_v41, %v4016_v22 }
 0xff9   :  { %v4037_v6 = vadd.f32 %v4036_v58, %v4017_v8 }
 0xffb   :  { %v4047_v47 = vadd.f32 %v4037_v6, %v6946_v4 }
 0xffe   :  { %v4018_v19 = vpop.f32.mrf.mxu3 }
0x1048   :  { %v3495_v35 = vpop.xlane.xlu0 %3494 }
0x1049   :  { %v3527_v33 = vmul.f32 0.015625, %v3495_v35 }
0x104a   :  { %v3519_v32 = vpop.xlane.xlu2 %3518 }
0x104b   :  { %v3539_v42 = vmul.f32 %v3527_v33, %v3527_v33  ;;  %v3533_v3 = vmul.f32 0.015625, %v3519_v32  ;;  %v3551_v23 = vsub.f32 %v7136_v55, %v3527_v33 }
0x104d   :  { %v3545_v63 = vsub.f32 %v3533_v3, %v3539_v42 }
0x104e   :  { %v4040_v51 = vpop.f32.mrf.mxu0 }
0x104f   :  { %v3557_v46 = vadd.f32 1e-05, %v3545_v63 }
0x1050   :  { %v3498_v52 = vpop.xlane.xlu1 %3497 }
0x1051   :  { %5119 = vrsqrt.f32 %v3557_v46  ;;  %v3528_v24 = vmul.f32 0.015625, %v3498_v52  ;;  %vm3605_vm10 = vweird.f32 %v3557_v46 }
0x1052   :  { %v3522_v60 = vpop.xlane.xlu0 %3521 }
0x1053   :  { %v3540_v30 = vmul.f32 %v3528_v24, %v3528_v24  ;;  %v3534_v54 = vmul.f32 0.015625, %v3522_v60  ;;  %v3552_v44 = vsub.f32 %v7145_v37, %v3528_v24 }
0x1055   :  { %v3546_v10 = vsub.f32 %v3534_v54, %v3540_v30 }
0x1056   :  { %v4041_v45 = vpop.f32.mrf.mxu0 }
0x1057   :  { %v5120_v7 = vpop.eup %5119  ;;  %v3558_v53 = vadd.f32 1e-05, %v3546_v10 }
0x1058   :  { %v3600_v48 = vmul.f32 %v5120_v7, %v3557_v46  ;;  %vm3606_vm0 = vweird.f32 %v5120_v7 }
0x1059   :  { %5121 = vrsqrt.f32 %v3558_v53  ;;  %vm3607_vm14 = vmor %vm3605_vm10, %vm3606_vm0  ;;  %vm3615_vm13 = vweird.f32 %v3558_v53 }
0x105a   :  { %v3601_v9 = vmul.f32 %v5120_v7, %v3600_v48  ;;  %v4020_v18 = vpop.f32.mrf.mxu3 }
0x105c   :  { %v3602_v34 = vmul.f32 0.5, %v3601_v9 }
0x105e   :  { %v3603_v11 = vsub.f32 1.5, %v3602_v34  ;;  %v4830_v34 = vld [vmem:[%s7209_s18] ss:$0 sm:$0xff] }
0x105f   :  { %v5122_v25 = vpop.eup %5121 }
0x1060   :  { %v3604_v13 = vmul.f32 %v5120_v7, %v3603_v11  ;;  %v3610_v26 = vmul.f32 %v5122_v25, %v3558_v53  ;;  %vm3616_vm11 = vweird.f32 %v5122_v25 }
0x1061   :  { %vm3617_vm8 = vmor %vm3615_vm13, %vm3616_vm11 }
0x1062   :  { %v3611_v59 = vmul.f32 %v5122_v25, %v3610_v26  ;;  %v4021_v57 = vpop.f32.mrf.mxu3  ;;  %v3608_v12 = vsel %vm3607_vm14, %v5120_v7, %v3604_v13  ;;  %v4829_v7 = vld [vmem:[%s7208_s17] ss:$0 sm:$0xff]  ;;  %s5167_s17 = smov [#allocation2]  }
0x1063   :  { %v4022_v29 = vadd.f32 %v4828_v41, %v4021_v57  ;;  %v3623_v56 = vmul.f32 %v3608_v12, %v3551_v23  ;;  %s4145_s18 = sshll.u32 %s5167_s17, 4  ;;  %s4146_s18 = int_to_ptr.vmem [resolvable:$true] %s4145_s18 }
0x1064   :  { %v3612_v14 = vmul.f32 0.5, %v3611_v59 }
0x1065   :  { %v4042_v27 = vadd.f32 %v4041_v45, %v4022_v29  ;;  %v3632_v55 = vmul.f32 %v7038_v5, %v3623_v56 }
0x1066   :  { %v3613_v28 = vsub.f32 1.5, %v3612_v14 }
0x1067   :  { %v4048_v43 = vadd.f32 %v4042_v27, %v6975_v21  ;;  %v3641_v16 = vadd.f32 %v7044_v2, %v3632_v55 }
0x1068   :  { %v3614_v49 = vmul.f32 %v5122_v25, %v3613_v28 }
0x1069   :  { %v4050_v0 = vrot.slane %v4048_v43, 7 }
0x106a   :  { %v3618_v20 = vsel %vm3617_vm8, %v5122_v25, %v3614_v49 }
0x106b   :  { %v3624_v39 = vmul.f32 %v3618_v20, %v3552_v44  ;;  %v4053_v62 = vsel %vm4052_vm7, %v4047_v47, %v4050_v0 }
0x106c   :  { %v4057_v38 = vsel %vm4056_vm9, %v4053_v62, 0.0  ;;  %v4060_v40 = vmul.f32 %v4053_v62, %v4053_v62 }
0x106d   :  { %4058 = vadd.xlane.f32.xlu1 %v4057_v38  ;;  %v3633_v21 = vmul.f32 %v7038_v5, %v3624_v39  ;;  %v4711_v5 = vld [vmem:[%s7210_s19 + $0x10] sm:$0xff] }
0x106e   :  { %v4061_v31 = vsel %vm4056_vm9, %v4060_v40, 0.0  ;;  %4130 = vmatpush.bf16.msrb.mxu2 %v4711_v5 }
0x106f   :  { %4062 = vadd.xlane.f32.xlu2 %v4061_v31  ;;  %v3642_v4 = vadd.f32 %v7044_v2, %v3633_v21  ;;  %v4709_v2 = vld [vmem:[%s7210_s19] sm:$0xff] }
0x1071   :  { %v3645_v37 = vpack.c.bf16 %v3642_v4, %v3641_v16 }
0x1072   :  { %4131 = vmatpush.bf16.msrb.mxu2 %v4710_v17 }
0x1073   :  { %4516 = vmatmul.msk.bf16.gmra.mxu2 %vm142_vm1, %v3645_v37  ;;  %4519 = vmatmul.msk.bf16.gmra.mxu1 %vm142_vm1, %v3645_v37 }
0x1076   :  { %4132 = vmatpush.bf16.msrb.mxu2 %v4709_v2 }
0x10e0   :  { %v4059_v1 = vpop.xlane.xlu1 %4058 }
0x10e1   :  { %v4064_v58 = vmul.f32 0.015625, %v4059_v1 }
0x10e2   :  { %v4063_v15 = vpop.xlane.xlu2 %4062 }
0x10e3   :  { %v4066_v41 = vmul.f32 %v4064_v58, %v4064_v58  ;;  %v4065_v22 = vmul.f32 0.015625, %v4063_v15  ;;  %v4068_v10 = vsub.f32 %v4053_v62, %v4064_v58 }
0x10e5   :  { %v4067_v8 = vsub.f32 %v4065_v22, %v4066_v41 }
0x10e7   :  { %v4069_v6 = vadd.f32 1e-05, %v4067_v8 }
0x10e9   :  { %5123 = vrsqrt.f32 %v4069_v6  ;;  %vm4076_vm15 = vweird.f32 %v4069_v6 }
0x10ef   :  { %v5124_v19 = vpop.eup %5123 }
0x10f0   :  { %v4071_v35 = vmul.f32 %v5124_v19, %v4069_v6  ;;  %v3754_v33 = vpop.f32.mrf.mxu1  ;;  %vm4077_vm12 = vweird.f32 %v5124_v19 }
0x10f1   :  { %v3755_v32 = vadd.f32 %v3754_v33, %v7101_v50  ;;  %vm4078_vm2 = vmor %vm4076_vm15, %vm4077_vm12 }
0x10f2   :  { %v4072_v42 = vmul.f32 %v5124_v19, %v4071_v35 }
0x10f3   :  { %v3768_v3 = vmul.f32 %v3755_v32, %v3755_v32 }
0x10f4   :  { %v4073_v63 = vmul.f32 0.5, %v4072_v42 }
0x10f5   :  { %v3780_v51 = vmul.f32 %v3768_v3, %v3755_v32 }
0x10f6   :  { %v4074_v46 = vsub.f32 1.5, %v4073_v63  ;;  %v3730_v52 = vpop.f32.mrf.mxu2 }
0x10f7   :  { %v3792_v24 = vmul.f32 0.044715, %v3780_v51  ;;  %v3731_v60 = vadd.f32 %v3730_v52, %v7113_v36 }
0x10f8   :  { %v4075_v30 = vmul.f32 %v5124_v19, %v4074_v46  ;;  %v3756_v54 = vpop.f32.mrf.mxu1 }
0x10f9   :  { %v3804_v53 = vadd.f32 %v3792_v24, %v3755_v32  ;;  %v3767_v48 = vmul.f32 %v3731_v60, %v3731_v60  ;;  %v3757_v9 = vadd.f32 %v3756_v54, %v7101_v50 }
0x10fa   :  { %v4079_v18 = vsel %vm4078_vm2, %v5124_v19, %v4075_v30 }
0x10fb   :  { %v4080_v11 = vmul.f32 %v4079_v18, %v4068_v10  ;;  %v3816_v25 = vmul.f32 0.7978846, %v3804_v53  ;;  %v3779_v13 = vmul.f32 %v3767_v48, %v3731_v60  ;;  %v3770_v26 = vmul.f32 %v3757_v9, %v3757_v9 }
0x10fd   :  { %v4084_v59 = vmul.f32 %v4829_v7, %v4080_v11  ;;  %v3791_v57 = vmul.f32 0.044715, %v3779_v13  ;;  %v3782_v29 = vmul.f32 %v3770_v26, %v3757_v9  ;;  %5125 = vtanh.f32 %v3816_v25 }
0x10fe   :  { %v3732_v12 = vpop.f32.mrf.mxu2 }
0x10ff   :  { %v4088_v14 = vadd.f32 %v4830_v34, %v4084_v59  ;;  %v3803_v45 = vadd.f32 %v3791_v57, %v3731_v60  ;;  %v3794_v23 = vmul.f32 0.044715, %v3782_v29  ;;  %v3733_v27 = vadd.f32 %v3732_v12, %v7113_v36 }
0x1101   :  { %v4089_v50 = vpack.c.bf16 %v4088_v14, %v4088_v14  ;;  %v3815_v28 = vmul.f32 0.7978846, %v3803_v45  ;;  %v3806_v56 = vadd.f32 %v3794_v23, %v3757_v9  ;;  %v3769_v43 = vmul.f32 %v3733_v27, %v3733_v27 }
0x1103   :  { %v3818_v49 = vmul.f32 0.7978846, %v3806_v56  ;;  %v3781_v47 = vmul.f32 %v3769_v43, %v3733_v27  ;;  %4633 = vmatmul.msk.bf16.vlgmr.msrb.gmra.mxu2 %vm142_vm1, %v4089_v50  ;;  %v5126_v44 = vpop.eup %5125  ;;  %5127 = vtanh.f32 %v3815_v28  ;;  %vm4138_vm1 = vcmask 254976  }
0x1104   :  { %v3840_v39 = vadd.f32 1.0, %v5126_v44 }
0x1105   :  { %5129 = vtanh.f32 %v3818_v49  ;;  %v3793_v0 = vmul.f32 0.044715, %v3781_v47 }
0x1106   :  { %v3852_v36 = vmul.f32 0.5, %v3840_v39 }
0x1107   :  { %v3805_v20 = vadd.f32 %v3793_v0, %v3733_v27 }
0x1108   :  { %v3864_v16 = vmul.f32 %v3852_v36, %v3755_v32 }
0x1109   :  { %v3817_v62 = vmul.f32 0.7978846, %v3805_v20  ;;  %v5128_v55 = vpop.eup %5127 }
0x110a   :  { %v3839_v31 = vadd.f32 1.0, %v5128_v55 }
0x110b   :  { %v5130_v38 = vpop.eup %5129  ;;  %5131 = vtanh.f32 %v3817_v62 }
0x110c   :  { %v3842_v40 = vadd.f32 1.0, %v5130_v38  ;;  %v3851_v17 = vmul.f32 0.5, %v3839_v31 }
0x110e   :  { %v3854_v21 = vmul.f32 0.5, %v3842_v40  ;;  %v3863_v1 = vmul.f32 %v3851_v17, %v3731_v60 }
0x1110   :  { %v3866_v4 = vmul.f32 %v3854_v21, %v3757_v9 }
0x1111   :  { %v5132_v37 = vpop.eup %5131 }
0x1112   :  { %v3872_v61 = vpack.c.bf16 %v3866_v4, %v3864_v16  ;;  %v3841_v5 = vadd.f32 1.0, %v5132_v37 }
0x1114   :  { %4043 = vmatmul.bf16.gmra.mxu0 %v3872_v61  ;;  %v3853_v2 = vmul.f32 0.5, %v3841_v5 }
0x1116   :  { %v3865_v58 = vmul.f32 %v3853_v2, %v3733_v27 }
0x1118   :  { %v3871_v15 = vpack.c.bf16 %v3865_v58, %v3863_v1 }
0x111a   :  { %4023 = vmatmul.bf16.gmra.mxu3 %v3871_v15 }
0x1186   :  { %v4134_v41 = vpop.f32.mrf.mxu2 }
0x1187   :  { %4139 = vst.msk [vmem:[#allocation2] sm:$0x3] %vm4138_vm1, %v4134_v41 }
0x1188   :  { %4150 = dma.vmem_to_hbm [thread:$0]  %s4146_s18, 32, %s4148_s25, [#allocation3]  }
0x118e   :  { %v4136_v22 = vpop.f32.mrf.mxu2 }
0x1191   :  { %v4044_v8 = vpop.f32.mrf.mxu0 }
0x1199   :  { %v4045_v6 = vpop.f32.mrf.mxu0 }
0x119d   :  { %v4024_v19 = vpop.f32.mrf.mxu3 }
0x11a5   :  { %v4025_v35 = vpop.f32.mrf.mxu3 }
0x11a6   :  { %5157 = dma.done.wait [#allocation3], 32  }
0x11a7   :  { %5158 = vsyncadd [#allocation3], 4294967264 }
0x11a8   :  { %4155 = vsyncpa [#allocation3], 1 }

</bundles_post_ra>
